<compile_context>
chip_gen: v7x
topology: tpu7x:2x2x1
jax: 0.10.0
libtpu: 0.0.40
codegen_flags: <defaults>
</compile_context>

<pallas_src>
import functools

import jax
import jax.numpy as jnp
from jax.experimental import pallas as pl
from jax.experimental.pallas import tpu as pltpu

_VMEM = pl.BlockSpec(memory_space=pltpu.MemorySpace.VMEM)
_COMPILER_PARAMS = pltpu.CompilerParams(vmem_limit_bytes=32 * 1024 * 1024)


# ---------------------------------------------------------------------------
# Fused ARMAConv kernel: whole S x K recursion in one kernel invocation.
#   h_0^s = x
#   h_t^s = ReLU(A_hat @ (h_{t-1}^s @ W_t^s) + x @ V_t^s + b_t^s)
#   out   = mean_s h_K^s
# ---------------------------------------------------------------------------
def _arma_conv_kernel(a_ref, x_ref, init_w_ref, weight_ref, root_w_flat_ref,
                      bias_ref, o_ref, *, num_stacks, num_layers, f_out):
    s_total = num_stacks * f_out
    a_bf = a_ref[...]                                   # (N, N) bf16
    x_bf = x_ref[...].astype(jnp.bfloat16)              # (N, F_in)

    # Hoisted root term for every (t, s) in one MXU matmul: (N, K*S*F_out), f32 acc.
    root_all = jnp.dot(x_bf, root_w_flat_ref[...],
                       preferred_element_type=jnp.float32)

    # Per-stack hidden state (bf16 MXU inputs); S and K are small static ints,
    # so the whole recursion is unrolled at trace time.
    h = [x_bf for _ in range(num_stacks)]
    h_cat = None
    for t in range(num_layers):
        hw = []
        for s in range(num_stacks):
            w_ts = init_w_ref[s] if t == 0 else weight_ref[t - 1, s]
            hw.append(
                jnp.dot(h[s], w_ts, preferred_element_type=jnp.float32)
                .astype(jnp.bfloat16))
        hw_cat = jnp.concatenate(hw, axis=-1)            # (N, S*F_out) bf16
        # Stack-batched propagation: one (N,N) x (N, S*F_out) matmul, f32 acc.
        prop = jnp.dot(a_bf, hw_cat, preferred_element_type=jnp.float32)
        root_t = root_all[:, t * s_total:(t + 1) * s_total]
        h_cat = jnp.maximum(prop + root_t + bias_ref[t], 0.0)   # (N, S*F_out) f32
        h = [h_cat[:, s * f_out:(s + 1) * f_out].astype(jnp.bfloat16)
             for s in range(num_stacks)]

    # In-kernel mean over stacks.
    acc = h_cat[:, 0:f_out]
    for s in range(1, num_stacks):
        acc = acc + h_cat[:, s * f_out:(s + 1) * f_out]
    o_ref[...] = acc * (1.0 / num_stacks)


def arma_conv(x, a_hat_bf16, params):
    """One fused ARMAConv layer. x: (N, F_in) f32, a_hat_bf16: (N, N) bf16."""
    init_w, weight, root_w, bias = params
    num_layers, num_stacks, f_in, f_out = root_w.shape
    n = x.shape[0]

    # (K, S, F_in, F_out) -> (F_in, K*S*F_out), flattened t-major then s then f.
    root_w_flat = jnp.transpose(root_w, (2, 0, 1, 3)).reshape(
        f_in, num_layers * num_stacks * f_out).astype(jnp.bfloat16)
    # (K, S, 1, F_out) -> (K, 1, S*F_out), matching the stack-concat layout.
    bias_flat = bias.reshape(num_layers, 1, num_stacks * f_out).astype(jnp.float32)

    kernel = functools.partial(_arma_conv_kernel, num_stacks=num_stacks,
                               num_layers=num_layers, f_out=f_out)
    return pl.pallas_call(
        kernel,
        out_shape=jax.ShapeDtypeStruct((n, f_out), jnp.float32),
        in_specs=[_VMEM] * 6,
        out_specs=_VMEM,
        compiler_params=_COMPILER_PARAMS,
    )(a_hat_bf16, x.astype(jnp.float32), init_w.astype(jnp.bfloat16),
      weight.astype(jnp.bfloat16), root_w_flat, bias_flat)


# ---------------------------------------------------------------------------
# Fused head: lin1 (Linear + ReLU) followed by output Linear + final ReLU.
# ---------------------------------------------------------------------------
def _head_kernel(x_ref, w1_ref, b1_ref, w2_ref, b2_ref, o_ref):
    h = jnp.dot(x_ref[...].astype(jnp.bfloat16), w1_ref[...],
                preferred_element_type=jnp.float32) + b1_ref[...]
    h = jnp.maximum(h, 0.0)
    y = jnp.dot(h.astype(jnp.bfloat16), w2_ref[...],
                preferred_element_type=jnp.float32) + b2_ref[...]
    o_ref[...] = jnp.maximum(y, 0.0)


def head(x, w1, b1, w2, b2):
    n = x.shape[0]
    return pl.pallas_call(
        _head_kernel,
        out_shape=jax.ShapeDtypeStruct((n, w2.shape[-1]), jnp.float32),
        in_specs=[_VMEM] * 5,
        out_specs=_VMEM,
        compiler_params=_COMPILER_PARAMS,
    )(x, w1.astype(jnp.bfloat16), b1, w2.astype(jnp.bfloat16), b2)


# ---------------------------------------------------------------------------
# Full forward: conv1 -> conv2 -> lin1+ReLU -> output Linear -> ReLU.
# The outer F.relu after each conv is omitted: the last ARMA layer already
# applies ReLU, so the composition is numerically identical.
# ---------------------------------------------------------------------------
def forward(params, x, a_hat):
    conv1, conv2, lin1_w, lin1_b, out_w, out_b = params
    a_bf16 = a_hat.astype(jnp.bfloat16)
    x1 = arma_conv(x, a_bf16, conv1)
    x2 = arma_conv(x1, a_bf16, conv2)
    return head(x2, lin1_w, lin1_b, out_w, out_b)


# ---------------------------------------------------------------------------
# Glue: dense normalized adjacency (gcn_norm, add_self_loops=False) + params.
# NOTE: dense O(N^2) adjacency is a scaling limit, not a correctness issue;
# fine for small graphs like this test.
# ---------------------------------------------------------------------------
def build_norm_adj(edge_index, edge_weight, num_nodes):
    row, col = edge_index[0], edge_index[1]          # row = source, col = target
    deg = jnp.zeros((num_nodes,), jnp.float32).at[col].add(edge_weight)
    dinv = jnp.where(deg > 0, jax.lax.rsqrt(jnp.maximum(deg, 1e-12)), 0.0)
    norm = dinv[row] * edge_weight * dinv[col]
    # out_i = sum_{edges j->i} norm * x_j   =>   A_hat[i, j] += norm
    a_hat = jnp.zeros((num_nodes, num_nodes), jnp.float32).at[col, row].add(norm)
    return a_hat


def _glorot(key, shape):
    fan_in, fan_out = shape[-2], shape[-1]
    scale = jnp.sqrt(2.0 / (fan_in + fan_out))
    return scale * jax.random.normal(key, shape, jnp.float32)


def init_arma_params(key, f_in, f_out, num_stacks, num_layers):
    k0, k1, k2, k3 = jax.random.split(key, 4)
    init_w = _glorot(k0, (num_stacks, f_in, f_out))
    weight = _glorot(k1, (num_layers - 1, num_stacks, f_out, f_out))
    root_w = _glorot(k2, (num_layers, num_stacks, f_in, f_out))
    bias = 0.01 * jax.random.normal(k3, (num_layers, num_stacks, 1, f_out), jnp.float32)
    return init_w, weight, root_w, bias


def init_params(key, node_features, num_filters=128, K=3, num_stacks=3):
    k1, k2, k3, k4, k5, k6 = jax.random.split(key, 6)
    conv1 = init_arma_params(k1, node_features, num_filters, num_stacks, K)
    conv2 = init_arma_params(k2, num_filters, num_filters, num_stacks, K)
    lin1_w = _glorot(k3, (num_filters, num_filters))
    lin1_b = 0.01 * jax.random.normal(k4, (1, num_filters), jnp.float32)
    out_w = _glorot(k5, (num_filters, 1))
    out_b = 0.01 * jax.random.normal(k6, (1, 1), jnp.float32)
    return conv1, conv2, lin1_w, lin1_b, out_w, out_b


# TODO(synk): training-mode dropout (module arg dropout=0.5) is never applied in
# the reference forward (ARMAConv internal dropout defaults to 0); inference only.

if __name__ == "__main__":
    NUM_NODES = 64
    NODE_FEATURES = 16
    NUM_FILTERS = 128
    NUM_EDGES = 256
    K = 3
    NUM_STACKS = 3

    key = jax.random.PRNGKey(0)
    kx, ksrc, kdst, kw, kp = jax.random.split(key, 5)

    x = jax.random.normal(kx, (NUM_NODES, NODE_FEATURES), jnp.float32)
    src = jax.random.randint(ksrc, (NUM_EDGES,), 0, NUM_NODES)
    dst = jax.random.randint(kdst, (NUM_EDGES,), 0, NUM_NODES)
    edge_index = jnp.stack([src, dst], axis=0)
    edge_attr = jax.random.uniform(kw, (NUM_EDGES,), jnp.float32, 0.5, 1.5)

    a_hat = build_norm_adj(edge_index, edge_attr, NUM_NODES)
    params = init_params(kp, NODE_FEATURES, NUM_FILTERS, K, NUM_STACKS)

    out = jax.jit(forward)(params, x, a_hat)
    out = jax.block_until_ready(out)
    assert out.shape == (NUM_NODES, 1) and out.dtype == jnp.float32
    print("KERNEL_OK")
</pallas_src>

<mosaic_0001>
module attributes {stable_mosaic.version = 11 : i64} {
  func.func @_arma_conv_kernel(%arg0: memref<64x64xbf16, #tpu.memory_space<vmem>>, %arg1: memref<64x16xf32, #tpu.memory_space<vmem>>, %arg2: memref<3x16x128xbf16, #tpu.memory_space<vmem>>, %arg3: memref<2x3x128x128xbf16, #tpu.memory_space<vmem>>, %arg4: memref<16x1152xbf16, #tpu.memory_space<vmem>>, %arg5: memref<3x1x384xf32, #tpu.memory_space<vmem>>, %arg6: memref<64x128xf32, #tpu.memory_space<vmem>>) attributes {dimension_semantics = [], scalar_prefetch = 0 : i64, scratch_operands = 0 : i64, tpu.core_type = #tpu.core_type<tc>} {
    %c0 = arith.constant 0 : index
    %c0_0 = arith.constant 0 : index
    %0 = vector.load %arg0[%c0, %c0_0] : memref<64x64xbf16, #tpu.memory_space<vmem>>, vector<64x64xbf16>
    %c0_1 = arith.constant 0 : index
    %c0_2 = arith.constant 0 : index
    %1 = vector.load %arg1[%c0_1, %c0_2] : memref<64x16xf32, #tpu.memory_space<vmem>>, vector<64x16xf32>
    %2 = arith.truncf %1 : vector<64x16xf32> to vector<64x16xbf16>
    %c0_3 = arith.constant 0 : index
    %c0_4 = arith.constant 0 : index
    %3 = vector.load %arg4[%c0_3, %c0_4] : memref<16x1152xbf16, #tpu.memory_space<vmem>>, vector<16x1152xbf16>
    %cst = arith.constant dense<0.000000e+00> : vector<64x1152xf32>
    %4 = tpu.matmul %2, %3, %cst {dimension_numbers = #tpu.dot_dimension_numbers<[1], [0], [0], [1], [0, 0, 1, 1], [], []>} : vector<64x16xbf16>, vector<16x1152xbf16>, vector<64x1152xf32> -> vector<64x1152xf32>
    %c0_5 = arith.constant 0 : index
    %c0_6 = arith.constant 0 : index
    %c0_7 = arith.constant 0 : index
    %5 = vector.load %arg2[%c0_5, %c0_6, %c0_7] : memref<3x16x128xbf16, #tpu.memory_space<vmem>>, vector<1x16x128xbf16>
    %6 = vector.shape_cast %5 : vector<1x16x128xbf16> to vector<16x128xbf16>
    %cst_8 = arith.constant dense<0.000000e+00> : vector<64x128xf32>
    %7 = tpu.matmul %2, %6, %cst_8 {dimension_numbers = #tpu.dot_dimension_numbers<[1], [0], [0], [1], [0, 0, 1, 1], [], []>} : vector<64x16xbf16>, vector<16x128xbf16>, vector<64x128xf32> -> vector<64x128xf32>
    %8 = arith.truncf %7 : vector<64x128xf32> to vector<64x128xbf16>
    %c1 = arith.constant 1 : index
    %c0_9 = arith.constant 0 : index
    %c0_10 = arith.constant 0 : index
    %9 = vector.load %arg2[%c1, %c0_9, %c0_10] : memref<3x16x128xbf16, #tpu.memory_space<vmem>>, vector<1x16x128xbf16>
    %10 = vector.shape_cast %9 : vector<1x16x128xbf16> to vector<16x128xbf16>
    %cst_11 = arith.constant dense<0.000000e+00> : vector<64x128xf32>
    %11 = tpu.matmul %2, %10, %cst_11 {dimension_numbers = #tpu.dot_dimension_numbers<[1], [0], [0], [1], [0, 0, 1, 1], [], []>} : vector<64x16xbf16>, vector<16x128xbf16>, vector<64x128xf32> -> vector<64x128xf32>
    %12 = arith.truncf %11 : vector<64x128xf32> to vector<64x128xbf16>
    %c2 = arith.constant 2 : index
    %c0_12 = arith.constant 0 : index
    %c0_13 = arith.constant 0 : index
    %13 = vector.load %arg2[%c2, %c0_12, %c0_13] : memref<3x16x128xbf16, #tpu.memory_space<vmem>>, vector<1x16x128xbf16>
    %14 = vector.shape_cast %13 : vector<1x16x128xbf16> to vector<16x128xbf16>
    %cst_14 = arith.constant dense<0.000000e+00> : vector<64x128xf32>
    %15 = tpu.matmul %2, %14, %cst_14 {dimension_numbers = #tpu.dot_dimension_numbers<[1], [0], [0], [1], [0, 0, 1, 1], [], []>} : vector<64x16xbf16>, vector<16x128xbf16>, vector<64x128xf32> -> vector<64x128xf32>
    %16 = arith.truncf %15 : vector<64x128xf32> to vector<64x128xbf16>
    %17 = tpu.concatenate %8, %12, %16 in 1 : vector<64x128xbf16>, vector<64x128xbf16>, vector<64x128xbf16> -> vector<64x384xbf16>
    %cst_15 = arith.constant dense<0.000000e+00> : vector<64x384xf32>
    %18 = tpu.matmul %0, %17, %cst_15 {dimension_numbers = #tpu.dot_dimension_numbers<[1], [0], [0], [1], [0, 0, 1, 1], [], []>} : vector<64x64xbf16>, vector<64x384xbf16>, vector<64x384xf32> -> vector<64x384xf32>
    %19 = vector.extract_strided_slice %4 {offsets = [0, 0], sizes = [64, 384], strides = [1, 1]} : vector<64x1152xf32> to vector<64x384xf32>
    %20 = arith.addf %18, %19 : vector<64x384xf32>
    %c0_16 = arith.constant 0 : index
    %c0_17 = arith.constant 0 : index
    %c0_18 = arith.constant 0 : index
    %21 = vector.load %arg5[%c0_16, %c0_17, %c0_18] : memref<3x1x384xf32, #tpu.memory_space<vmem>>, vector<1x1x384xf32>
    %22 = vector.shape_cast %21 : vector<1x1x384xf32> to vector<1x384xf32>
    %23 = vector.broadcast %22 : vector<1x384xf32> to vector<64x384xf32>
    %24 = arith.addf %20, %23 : vector<64x384xf32>
    %cst_19 = arith.constant 0.000000e+00 : f32
    %25 = vector.broadcast %cst_19 : f32 to vector<64x384xf32>
    %26 = arith.maximumf %24, %25 : vector<64x384xf32>
    %27 = vector.extract_strided_slice %26 {offsets = [0, 0], sizes = [64, 128], strides = [1, 1]} : vector<64x384xf32> to vector<64x128xf32>
    %28 = arith.truncf %27 : vector<64x128xf32> to vector<64x128xbf16>
    %29 = vector.extract_strided_slice %26 {offsets = [0, 128], sizes = [64, 128], strides = [1, 1]} : vector<64x384xf32> to vector<64x128xf32>
    %30 = arith.truncf %29 : vector<64x128xf32> to vector<64x128xbf16>
    %31 = vector.extract_strided_slice %26 {offsets = [0, 256], sizes = [64, 128], strides = [1, 1]} : vector<64x384xf32> to vector<64x128xf32>
    %32 = arith.truncf %31 : vector<64x128xf32> to vector<64x128xbf16>
    %c0_20 = arith.constant 0 : index
    %c0_21 = arith.constant 0 : index
    %c0_22 = arith.constant 0 : index
    %c0_23 = arith.constant 0 : index
    %33 = vector.load %arg3[%c0_20, %c0_21, %c0_22, %c0_23] : memref<2x3x128x128xbf16, #tpu.memory_space<vmem>>, vector<1x1x128x128xbf16>
    %34 = vector.shape_cast %33 : vector<1x1x128x128xbf16> to vector<128x128xbf16>
    %cst_24 = arith.constant dense<0.000000e+00> : vector<64x128xf32>
    %35 = tpu.matmul %28, %34, %cst_24 {dimension_numbers = #tpu.dot_dimension_numbers<[1], [0], [0], [1], [0, 0, 1, 1], [], []>} : vector<64x128xbf16>, vector<128x128xbf16>, vector<64x128xf32> -> vector<64x128xf32>
    %36 = arith.truncf %35 : vector<64x128xf32> to vector<64x128xbf16>
    %c0_25 = arith.constant 0 : index
    %c1_26 = arith.constant 1 : index
    %c0_27 = arith.constant 0 : index
    %c0_28 = arith.constant 0 : index
    %37 = vector.load %arg3[%c0_25, %c1_26, %c0_27, %c0_28] : memref<2x3x128x128xbf16, #tpu.memory_space<vmem>>, vector<1x1x128x128xbf16>
    %38 = vector.shape_cast %37 : vector<1x1x128x128xbf16> to vector<128x128xbf16>
    %cst_29 = arith.constant dense<0.000000e+00> : vector<64x128xf32>
    %39 = tpu.matmul %30, %38, %cst_29 {dimension_numbers = #tpu.dot_dimension_numbers<[1], [0], [0], [1], [0, 0, 1, 1], [], []>} : vector<64x128xbf16>, vector<128x128xbf16>, vector<64x128xf32> -> vector<64x128xf32>
    %40 = arith.truncf %39 : vector<64x128xf32> to vector<64x128xbf16>
    %c0_30 = arith.constant 0 : index
    %c2_31 = arith.constant 2 : index
    %c0_32 = arith.constant 0 : index
    %c0_33 = arith.constant 0 : index
    %41 = vector.load %arg3[%c0_30, %c2_31, %c0_32, %c0_33] : memref<2x3x128x128xbf16, #tpu.memory_space<vmem>>, vector<1x1x128x128xbf16>
    %42 = vector.shape_cast %41 : vector<1x1x128x128xbf16> to vector<128x128xbf16>
    %cst_34 = arith.constant dense<0.000000e+00> : vector<64x128xf32>
    %43 = tpu.matmul %32, %42, %cst_34 {dimension_numbers = #tpu.dot_dimension_numbers<[1], [0], [0], [1], [0, 0, 1, 1], [], []>} : vector<64x128xbf16>, vector<128x128xbf16>, vector<64x128xf32> -> vector<64x128xf32>
    %44 = arith.truncf %43 : vector<64x128xf32> to vector<64x128xbf16>
    %45 = tpu.concatenate %36, %40, %44 in 1 : vector<64x128xbf16>, vector<64x128xbf16>, vector<64x128xbf16> -> vector<64x384xbf16>
    %cst_35 = arith.constant dense<0.000000e+00> : vector<64x384xf32>
    %46 = tpu.matmul %0, %45, %cst_35 {dimension_numbers = #tpu.dot_dimension_numbers<[1], [0], [0], [1], [0, 0, 1, 1], [], []>} : vector<64x64xbf16>, vector<64x384xbf16>, vector<64x384xf32> -> vector<64x384xf32>
    %47 = vector.extract_strided_slice %4 {offsets = [0, 384], sizes = [64, 384], strides = [1, 1]} : vector<64x1152xf32> to vector<64x384xf32>
    %48 = arith.addf %46, %47 : vector<64x384xf32>
    %c1_36 = arith.constant 1 : index
    %c0_37 = arith.constant 0 : index
    %c0_38 = arith.constant 0 : index
    %49 = vector.load %arg5[%c1_36, %c0_37, %c0_38] : memref<3x1x384xf32, #tpu.memory_space<vmem>>, vector<1x1x384xf32>
    %50 = vector.shape_cast %49 : vector<1x1x384xf32> to vector<1x384xf32>
    %51 = vector.broadcast %50 : vector<1x384xf32> to vector<64x384xf32>
    %52 = arith.addf %48, %51 : vector<64x384xf32>
    %cst_39 = arith.constant 0.000000e+00 : f32
    %53 = vector.broadcast %cst_39 : f32 to vector<64x384xf32>
    %54 = arith.maximumf %52, %53 : vector<64x384xf32>
    %55 = vector.extract_strided_slice %54 {offsets = [0, 0], sizes = [64, 128], strides = [1, 1]} : vector<64x384xf32> to vector<64x128xf32>
    %56 = arith.truncf %55 : vector<64x128xf32> to vector<64x128xbf16>
    %57 = vector.extract_strided_slice %54 {offsets = [0, 128], sizes = [64, 128], strides = [1, 1]} : vector<64x384xf32> to vector<64x128xf32>
    %58 = arith.truncf %57 : vector<64x128xf32> to vector<64x128xbf16>
    %59 = vector.extract_strided_slice %54 {offsets = [0, 256], sizes = [64, 128], strides = [1, 1]} : vector<64x384xf32> to vector<64x128xf32>
    %60 = arith.truncf %59 : vector<64x128xf32> to vector<64x128xbf16>
    %c1_40 = arith.constant 1 : index
    %c0_41 = arith.constant 0 : index
    %c0_42 = arith.constant 0 : index
    %c0_43 = arith.constant 0 : index
    %61 = vector.load %arg3[%c1_40, %c0_41, %c0_42, %c0_43] : memref<2x3x128x128xbf16, #tpu.memory_space<vmem>>, vector<1x1x128x128xbf16>
    %62 = vector.shape_cast %61 : vector<1x1x128x128xbf16> to vector<128x128xbf16>
    %cst_44 = arith.constant dense<0.000000e+00> : vector<64x128xf32>
    %63 = tpu.matmul %56, %62, %cst_44 {dimension_numbers = #tpu.dot_dimension_numbers<[1], [0], [0], [1], [0, 0, 1, 1], [], []>} : vector<64x128xbf16>, vector<128x128xbf16>, vector<64x128xf32> -> vector<64x128xf32>
    %64 = arith.truncf %63 : vector<64x128xf32> to vector<64x128xbf16>
    %c1_45 = arith.constant 1 : index
    %c1_46 = arith.constant 1 : index
    %c0_47 = arith.constant 0 : index
    %c0_48 = arith.constant 0 : index
    %65 = vector.load %arg3[%c1_45, %c1_46, %c0_47, %c0_48] : memref<2x3x128x128xbf16, #tpu.memory_space<vmem>>, vector<1x1x128x128xbf16>
    %66 = vector.shape_cast %65 : vector<1x1x128x128xbf16> to vector<128x128xbf16>
    %cst_49 = arith.constant dense<0.000000e+00> : vector<64x128xf32>
    %67 = tpu.matmul %58, %66, %cst_49 {dimension_numbers = #tpu.dot_dimension_numbers<[1], [0], [0], [1], [0, 0, 1, 1], [], []>} : vector<64x128xbf16>, vector<128x128xbf16>, vector<64x128xf32> -> vector<64x128xf32>
    %68 = arith.truncf %67 : vector<64x128xf32> to vector<64x128xbf16>
    %c1_50 = arith.constant 1 : index
    %c2_51 = arith.constant 2 : index
    %c0_52 = arith.constant 0 : index
    %c0_53 = arith.constant 0 : index
    %69 = vector.load %arg3[%c1_50, %c2_51, %c0_52, %c0_53] : memref<2x3x128x128xbf16, #tpu.memory_space<vmem>>, vector<1x1x128x128xbf16>
    %70 = vector.shape_cast %69 : vector<1x1x128x128xbf16> to vector<128x128xbf16>
    %cst_54 = arith.constant dense<0.000000e+00> : vector<64x128xf32>
    %71 = tpu.matmul %60, %70, %cst_54 {dimension_numbers = #tpu.dot_dimension_numbers<[1], [0], [0], [1], [0, 0, 1, 1], [], []>} : vector<64x128xbf16>, vector<128x128xbf16>, vector<64x128xf32> -> vector<64x128xf32>
    %72 = arith.truncf %71 : vector<64x128xf32> to vector<64x128xbf16>
    %73 = tpu.concatenate %64, %68, %72 in 1 : vector<64x128xbf16>, vector<64x128xbf16>, vector<64x128xbf16> -> vector<64x384xbf16>
    %cst_55 = arith.constant dense<0.000000e+00> : vector<64x384xf32>
    %74 = tpu.matmul %0, %73, %cst_55 {dimension_numbers = #tpu.dot_dimension_numbers<[1], [0], [0], [1], [0, 0, 1, 1], [], []>} : vector<64x64xbf16>, vector<64x384xbf16>, vector<64x384xf32> -> vector<64x384xf32>
    %75 = vector.extract_strided_slice %4 {offsets = [0, 768], sizes = [64, 384], strides = [1, 1]} : vector<64x1152xf32> to vector<64x384xf32>
    %76 = arith.addf %74, %75 : vector<64x384xf32>
    %c2_56 = arith.constant 2 : index
    %c0_57 = arith.constant 0 : index
    %c0_58 = arith.constant 0 : index
    %77 = vector.load %arg5[%c2_56, %c0_57, %c0_58] : memref<3x1x384xf32, #tpu.memory_space<vmem>>, vector<1x1x384xf32>
    %78 = vector.shape_cast %77 : vector<1x1x384xf32> to vector<1x384xf32>
    %79 = vector.broadcast %78 : vector<1x384xf32> to vector<64x384xf32>
    %80 = arith.addf %76, %79 : vector<64x384xf32>
    %cst_59 = arith.constant 0.000000e+00 : f32
    %81 = vector.broadcast %cst_59 : f32 to vector<64x384xf32>
    %82 = arith.maximumf %80, %81 : vector<64x384xf32>
    %83 = vector.extract_strided_slice %82 {offsets = [0, 0], sizes = [64, 128], strides = [1, 1]} : vector<64x384xf32> to vector<64x128xf32>
    %84 = vector.extract_strided_slice %82 {offsets = [0, 128], sizes = [64, 128], strides = [1, 1]} : vector<64x384xf32> to vector<64x128xf32>
    %85 = arith.addf %83, %84 : vector<64x128xf32>
    %86 = vector.extract_strided_slice %82 {offsets = [0, 256], sizes = [64, 128], strides = [1, 1]} : vector<64x384xf32> to vector<64x128xf32>
    %87 = arith.addf %85, %86 : vector<64x128xf32>
    %cst_60 = arith.constant 0.333333343 : f32
    %88 = vector.broadcast %cst_60 : f32 to vector<64x128xf32>
    %89 = arith.mulf %87, %88 : vector<64x128xf32>
    %c0_61 = arith.constant 0 : index
    %c0_62 = arith.constant 0 : index
    %90 = vector.load %arg6[%c0_61, %c0_62] : memref<64x128xf32, #tpu.memory_space<vmem>>, vector<64x128xf32>
    tpu.vector_store %arg6[%c0_61, %c0_62], %89 {strides = array<i32>} : memref<64x128xf32, #tpu.memory_space<vmem>>, vector<64x128xf32>,
    return
  }
}

module attributes {stable_mosaic.version = 11 : i64} {
  func.func @_arma_conv_kernel(%arg0: memref<64x64xbf16, #tpu.memory_space<vmem>>, %arg1: memref<64x128xf32, #tpu.memory_space<vmem>>, %arg2: memref<3x128x128xbf16, #tpu.memory_space<vmem>>, %arg3: memref<2x3x128x128xbf16, #tpu.memory_space<vmem>>, %arg4: memref<128x1152xbf16, #tpu.memory_space<vmem>>, %arg5: memref<3x1x384xf32, #tpu.memory_space<vmem>>, %arg6: memref<64x128xf32, #tpu.memory_space<vmem>>) attributes {dimension_semantics = [], scalar_prefetch = 0 : i64, scratch_operands = 0 : i64, tpu.core_type = #tpu.core_type<tc>} {
    %c0 = arith.constant 0 : index
    %c0_0 = arith.constant 0 : index
    %0 = vector.load %arg0[%c0, %c0_0] : memref<64x64xbf16, #tpu.memory_space<vmem>>, vector<64x64xbf16>
    %c0_1 = arith.constant 0 : index
    %c0_2 = arith.constant 0 : index
    %1 = vector.load %arg1[%c0_1, %c0_2] : memref<64x128xf32, #tpu.memory_space<vmem>>, vector<64x128xf32>
    %2 = arith.truncf %1 : vector<64x128xf32> to vector<64x128xbf16>
    %c0_3 = arith.constant 0 : index
    %c0_4 = arith.constant 0 : index
    %3 = vector.load %arg4[%c0_3, %c0_4] : memref<128x1152xbf16, #tpu.memory_space<vmem>>, vector<128x1152xbf16>
    %cst = arith.constant dense<0.000000e+00> : vector<64x1152xf32>
    %4 = tpu.matmul %2, %3, %cst {dimension_numbers = #tpu.dot_dimension_numbers<[1], [0], [0], [1], [0, 0, 1, 1], [], []>} : vector<64x128xbf16>, vector<128x1152xbf16>, vector<64x1152xf32> -> vector<64x1152xf32>
    %c0_5 = arith.constant 0 : index
    %c0_6 = arith.constant 0 : index
    %c0_7 = arith.constant 0 : index
    %5 = vector.load %arg2[%c0_5, %c0_6, %c0_7] : memref<3x128x128xbf16, #tpu.memory_space<vmem>>, vector<1x128x128xbf16>
    %6 = vector.shape_cast %5 : vector<1x128x128xbf16> to vector<128x128xbf16>
    %cst_8 = arith.constant dense<0.000000e+00> : vector<64x128xf32>
    %7 = tpu.matmul %2, %6, %cst_8 {dimension_numbers = #tpu.dot_dimension_numbers<[1], [0], [0], [1], [0, 0, 1, 1], [], []>} : vector<64x128xbf16>, vector<128x128xbf16>, vector<64x128xf32> -> vector<64x128xf32>
    %8 = arith.truncf %7 : vector<64x128xf32> to vector<64x128xbf16>
    %c1 = arith.constant 1 : index
    %c0_9 = arith.constant 0 : index
    %c0_10 = arith.constant 0 : index
    %9 = vector.load %arg2[%c1, %c0_9, %c0_10] : memref<3x128x128xbf16, #tpu.memory_space<vmem>>, vector<1x128x128xbf16>
    %10 = vector.shape_cast %9 : vector<1x128x128xbf16> to vector<128x128xbf16>
    %cst_11 = arith.constant dense<0.000000e+00> : vector<64x128xf32>
    %11 = tpu.matmul %2, %10, %cst_11 {dimension_numbers = #tpu.dot_dimension_numbers<[1], [0], [0], [1], [0, 0, 1, 1], [], []>} : vector<64x128xbf16>, vector<128x128xbf16>, vector<64x128xf32> -> vector<64x128xf32>
    %12 = arith.truncf %11 : vector<64x128xf32> to vector<64x128xbf16>
    %c2 = arith.constant 2 : index
    %c0_12 = arith.constant 0 : index
    %c0_13 = arith.constant 0 : index
    %13 = vector.load %arg2[%c2, %c0_12, %c0_13] : memref<3x128x128xbf16, #tpu.memory_space<vmem>>, vector<1x128x128xbf16>
    %14 = vector.shape_cast %13 : vector<1x128x128xbf16> to vector<128x128xbf16>
    %cst_14 = arith.constant dense<0.000000e+00> : vector<64x128xf32>
    %15 = tpu.matmul %2, %14, %cst_14 {dimension_numbers = #tpu.dot_dimension_numbers<[1], [0], [0], [1], [0, 0, 1, 1], [], []>} : vector<64x128xbf16>, vector<128x128xbf16>, vector<64x128xf32> -> vector<64x128xf32>
    %16 = arith.truncf %15 : vector<64x128xf32> to vector<64x128xbf16>
    %17 = tpu.concatenate %8, %12, %16 in 1 : vector<64x128xbf16>, vector<64x128xbf16>, vector<64x128xbf16> -> vector<64x384xbf16>
    %cst_15 = arith.constant dense<0.000000e+00> : vector<64x384xf32>
    %18 = tpu.matmul %0, %17, %cst_15 {dimension_numbers = #tpu.dot_dimension_numbers<[1], [0], [0], [1], [0, 0, 1, 1], [], []>} : vector<64x64xbf16>, vector<64x384xbf16>, vector<64x384xf32> -> vector<64x384xf32>
    %19 = vector.extract_strided_slice %4 {offsets = [0, 0], sizes = [64, 384], strides = [1, 1]} : vector<64x1152xf32> to vector<64x384xf32>
    %20 = arith.addf %18, %19 : vector<64x384xf32>
    %c0_16 = arith.constant 0 : index
    %c0_17 = arith.constant 0 : index
    %c0_18 = arith.constant 0 : index
    %21 = vector.load %arg5[%c0_16, %c0_17, %c0_18] : memref<3x1x384xf32, #tpu.memory_space<vmem>>, vector<1x1x384xf32>
    %22 = vector.shape_cast %21 : vector<1x1x384xf32> to vector<1x384xf32>
    %23 = vector.broadcast %22 : vector<1x384xf32> to vector<64x384xf32>
    %24 = arith.addf %20, %23 : vector<64x384xf32>
    %cst_19 = arith.constant 0.000000e+00 : f32
    %25 = vector.broadcast %cst_19 : f32 to vector<64x384xf32>
    %26 = arith.maximumf %24, %25 : vector<64x384xf32>
    %27 = vector.extract_strided_slice %26 {offsets = [0, 0], sizes = [64, 128], strides = [1, 1]} : vector<64x384xf32> to vector<64x128xf32>
    %28 = arith.truncf %27 : vector<64x128xf32> to vector<64x128xbf16>
    %29 = vector.extract_strided_slice %26 {offsets = [0, 128], sizes = [64, 128], strides = [1, 1]} : vector<64x384xf32> to vector<64x128xf32>
    %30 = arith.truncf %29 : vector<64x128xf32> to vector<64x128xbf16>
    %31 = vector.extract_strided_slice %26 {offsets = [0, 256], sizes = [64, 128], strides = [1, 1]} : vector<64x384xf32> to vector<64x128xf32>
    %32 = arith.truncf %31 : vector<64x128xf32> to vector<64x128xbf16>
    %c0_20 = arith.constant 0 : index
    %c0_21 = arith.constant 0 : index
    %c0_22 = arith.constant 0 : index
    %c0_23 = arith.constant 0 : index
    %33 = vector.load %arg3[%c0_20, %c0_21, %c0_22, %c0_23] : memref<2x3x128x128xbf16, #tpu.memory_space<vmem>>, vector<1x1x128x128xbf16>
    %34 = vector.shape_cast %33 : vector<1x1x128x128xbf16> to vector<128x128xbf16>
    %cst_24 = arith.constant dense<0.000000e+00> : vector<64x128xf32>
    %35 = tpu.matmul %28, %34, %cst_24 {dimension_numbers = #tpu.dot_dimension_numbers<[1], [0], [0], [1], [0, 0, 1, 1], [], []>} : vector<64x128xbf16>, vector<128x128xbf16>, vector<64x128xf32> -> vector<64x128xf32>
    %36 = arith.truncf %35 : vector<64x128xf32> to vector<64x128xbf16>
    %c0_25 = arith.constant 0 : index
    %c1_26 = arith.constant 1 : index
    %c0_27 = arith.constant 0 : index
    %c0_28 = arith.constant 0 : index
    %37 = vector.load %arg3[%c0_25, %c1_26, %c0_27, %c0_28] : memref<2x3x128x128xbf16, #tpu.memory_space<vmem>>, vector<1x1x128x128xbf16>
    %38 = vector.shape_cast %37 : vector<1x1x128x128xbf16> to vector<128x128xbf16>
    %cst_29 = arith.constant dense<0.000000e+00> : vector<64x128xf32>
    %39 = tpu.matmul %30, %38, %cst_29 {dimension_numbers = #tpu.dot_dimension_numbers<[1], [0], [0], [1], [0, 0, 1, 1], [], []>} : vector<64x128xbf16>, vector<128x128xbf16>, vector<64x128xf32> -> vector<64x128xf32>
    %40 = arith.truncf %39 : vector<64x128xf32> to vector<64x128xbf16>
    %c0_30 = arith.constant 0 : index
    %c2_31 = arith.constant 2 : index
    %c0_32 = arith.constant 0 : index
    %c0_33 = arith.constant 0 : index
    %41 = vector.load %arg3[%c0_30, %c2_31, %c0_32, %c0_33] : memref<2x3x128x128xbf16, #tpu.memory_space<vmem>>, vector<1x1x128x128xbf16>
    %42 = vector.shape_cast %41 : vector<1x1x128x128xbf16> to vector<128x128xbf16>
    %cst_34 = arith.constant dense<0.000000e+00> : vector<64x128xf32>
    %43 = tpu.matmul %32, %42, %cst_34 {dimension_numbers = #tpu.dot_dimension_numbers<[1], [0], [0], [1], [0, 0, 1, 1], [], []>} : vector<64x128xbf16>, vector<128x128xbf16>, vector<64x128xf32> -> vector<64x128xf32>
    %44 = arith.truncf %43 : vector<64x128xf32> to vector<64x128xbf16>
    %45 = tpu.concatenate %36, %40, %44 in 1 : vector<64x128xbf16>, vector<64x128xbf16>, vector<64x128xbf16> -> vector<64x384xbf16>
    %cst_35 = arith.constant dense<0.000000e+00> : vector<64x384xf32>
    %46 = tpu.matmul %0, %45, %cst_35 {dimension_numbers = #tpu.dot_dimension_numbers<[1], [0], [0], [1], [0, 0, 1, 1], [], []>} : vector<64x64xbf16>, vector<64x384xbf16>, vector<64x384xf32> -> vector<64x384xf32>
    %47 = vector.extract_strided_slice %4 {offsets = [0, 384], sizes = [64, 384], strides = [1, 1]} : vector<64x1152xf32> to vector<64x384xf32>
    %48 = arith.addf %46, %47 : vector<64x384xf32>
    %c1_36 = arith.constant 1 : index
    %c0_37 = arith.constant 0 : index
    %c0_38 = arith.constant 0 : index
    %49 = vector.load %arg5[%c1_36, %c0_37, %c0_38] : memref<3x1x384xf32, #tpu.memory_space<vmem>>, vector<1x1x384xf32>
    %50 = vector.shape_cast %49 : vector<1x1x384xf32> to vector<1x384xf32>
    %51 = vector.broadcast %50 : vector<1x384xf32> to vector<64x384xf32>
    %52 = arith.addf %48, %51 : vector<64x384xf32>
    %cst_39 = arith.constant 0.000000e+00 : f32
    %53 = vector.broadcast %cst_39 : f32 to vector<64x384xf32>
    %54 = arith.maximumf %52, %53 : vector<64x384xf32>
    %55 = vector.extract_strided_slice %54 {offsets = [0, 0], sizes = [64, 128], strides = [1, 1]} : vector<64x384xf32> to vector<64x128xf32>
    %56 = arith.truncf %55 : vector<64x128xf32> to vector<64x128xbf16>
    %57 = vector.extract_strided_slice %54 {offsets = [0, 128], sizes = [64, 128], strides = [1, 1]} : vector<64x384xf32> to vector<64x128xf32>
    %58 = arith.truncf %57 : vector<64x128xf32> to vector<64x128xbf16>
    %59 = vector.extract_strided_slice %54 {offsets = [0, 256], sizes = [64, 128], strides = [1, 1]} : vector<64x384xf32> to vector<64x128xf32>
    %60 = arith.truncf %59 : vector<64x128xf32> to vector<64x128xbf16>
    %c1_40 = arith.constant 1 : index
    %c0_41 = arith.constant 0 : index
    %c0_42 = arith.constant 0 : index
    %c0_43 = arith.constant 0 : index
    %61 = vector.load %arg3[%c1_40, %c0_41, %c0_42, %c0_43] : memref<2x3x128x128xbf16, #tpu.memory_space<vmem>>, vector<1x1x128x128xbf16>
    %62 = vector.shape_cast %61 : vector<1x1x128x128xbf16> to vector<128x128xbf16>
    %cst_44 = arith.constant dense<0.000000e+00> : vector<64x128xf32>
    %63 = tpu.matmul %56, %62, %cst_44 {dimension_numbers = #tpu.dot_dimension_numbers<[1], [0], [0], [1], [0, 0, 1, 1], [], []>} : vector<64x128xbf16>, vector<128x128xbf16>, vector<64x128xf32> -> vector<64x128xf32>
    %64 = arith.truncf %63 : vector<64x128xf32> to vector<64x128xbf16>
    %c1_45 = arith.constant 1 : index
    %c1_46 = arith.constant 1 : index
    %c0_47 = arith.constant 0 : index
    %c0_48 = arith.constant 0 : index
    %65 = vector.load %arg3[%c1_45, %c1_46, %c0_47, %c0_48] : memref<2x3x128x128xbf16, #tpu.memory_space<vmem>>, vector<1x1x128x128xbf16>
    %66 = vector.shape_cast %65 : vector<1x1x128x128xbf16> to vector<128x128xbf16>
    %cst_49 = arith.constant dense<0.000000e+00> : vector<64x128xf32>
    %67 = tpu.matmul %58, %66, %cst_49 {dimension_numbers = #tpu.dot_dimension_numbers<[1], [0], [0], [1], [0, 0, 1, 1], [], []>} : vector<64x128xbf16>, vector<128x128xbf16>, vector<64x128xf32> -> vector<64x128xf32>
    %68 = arith.truncf %67 : vector<64x128xf32> to vector<64x128xbf16>
    %c1_50 = arith.constant 1 : index
    %c2_51 = arith.constant 2 : index
    %c0_52 = arith.constant 0 : index
    %c0_53 = arith.constant 0 : index
    %69 = vector.load %arg3[%c1_50, %c2_51, %c0_52, %c0_53] : memref<2x3x128x128xbf16, #tpu.memory_space<vmem>>, vector<1x1x128x128xbf16>
    %70 = vector.shape_cast %69 : vector<1x1x128x128xbf16> to vector<128x128xbf16>
    %cst_54 = arith.constant dense<0.000000e+00> : vector<64x128xf32>
    %71 = tpu.matmul %60, %70, %cst_54 {dimension_numbers = #tpu.dot_dimension_numbers<[1], [0], [0], [1], [0, 0, 1, 1], [], []>} : vector<64x128xbf16>, vector<128x128xbf16>, vector<64x128xf32> -> vector<64x128xf32>
    %72 = arith.truncf %71 : vector<64x128xf32> to vector<64x128xbf16>
    %73 = tpu.concatenate %64, %68, %72 in 1 : vector<64x128xbf16>, vector<64x128xbf16>, vector<64x128xbf16> -> vector<64x384xbf16>
    %cst_55 = arith.constant dense<0.000000e+00> : vector<64x384xf32>
    %74 = tpu.matmul %0, %73, %cst_55 {dimension_numbers = #tpu.dot_dimension_numbers<[1], [0], [0], [1], [0, 0, 1, 1], [], []>} : vector<64x64xbf16>, vector<64x384xbf16>, vector<64x384xf32> -> vector<64x384xf32>
    %75 = vector.extract_strided_slice %4 {offsets = [0, 768], sizes = [64, 384], strides = [1, 1]} : vector<64x1152xf32> to vector<64x384xf32>
    %76 = arith.addf %74, %75 : vector<64x384xf32>
    %c2_56 = arith.constant 2 : index
    %c0_57 = arith.constant 0 : index
    %c0_58 = arith.constant 0 : index
    %77 = vector.load %arg5[%c2_56, %c0_57, %c0_58] : memref<3x1x384xf32, #tpu.memory_space<vmem>>, vector<1x1x384xf32>
    %78 = vector.shape_cast %77 : vector<1x1x384xf32> to vector<1x384xf32>
    %79 = vector.broadcast %78 : vector<1x384xf32> to vector<64x384xf32>
    %80 = arith.addf %76, %79 : vector<64x384xf32>
    %cst_59 = arith.constant 0.000000e+00 : f32
    %81 = vector.broadcast %cst_59 : f32 to vector<64x384xf32>
    %82 = arith.maximumf %80, %81 : vector<64x384xf32>
    %83 = vector.extract_strided_slice %82 {offsets = [0, 0], sizes = [64, 128], strides = [1, 1]} : vector<64x384xf32> to vector<64x128xf32>
    %84 = vector.extract_strided_slice %82 {offsets = [0, 128], sizes = [64, 128], strides = [1, 1]} : vector<64x384xf32> to vector<64x128xf32>
    %85 = arith.addf %83, %84 : vector<64x128xf32>
    %86 = vector.extract_strided_slice %82 {offsets = [0, 256], sizes = [64, 128], strides = [1, 1]} : vector<64x384xf32> to vector<64x128xf32>
    %87 = arith.addf %85, %86 : vector<64x128xf32>
    %cst_60 = arith.constant 0.333333343 : f32
    %88 = vector.broadcast %cst_60 : f32 to vector<64x128xf32>
    %89 = arith.mulf %87, %88 : vector<64x128xf32>
    %c0_61 = arith.constant 0 : index
    %c0_62 = arith.constant 0 : index
    %90 = vector.load %arg6[%c0_61, %c0_62] : memref<64x128xf32, #tpu.memory_space<vmem>>, vector<64x128xf32>
    tpu.vector_store %arg6[%c0_61, %c0_62], %89 {strides = array<i32>} : memref<64x128xf32, #tpu.memory_space<vmem>>, vector<64x128xf32>,
    return
  }
}

module attributes {stable_mosaic.version = 11 : i64} {
  func.func @_head_kernel(%arg0: memref<64x128xf32, #tpu.memory_space<vmem>>, %arg1: memref<128x128xbf16, #tpu.memory_space<vmem>>, %arg2: memref<1x128xf32, #tpu.memory_space<vmem>>, %arg3: memref<128x1xbf16, #tpu.memory_space<vmem>>, %arg4: memref<1x1xf32, #tpu.memory_space<vmem>>, %arg5: memref<64x1xf32, #tpu.memory_space<vmem>>) attributes {dimension_semantics = [], scalar_prefetch = 0 : i64, scratch_operands = 0 : i64, tpu.core_type = #tpu.core_type<tc>} {
    %c0 = arith.constant 0 : index
    %c0_0 = arith.constant 0 : index
    %0 = vector.load %arg0[%c0, %c0_0] : memref<64x128xf32, #tpu.memory_space<vmem>>, vector<64x128xf32>
    %1 = arith.truncf %0 : vector<64x128xf32> to vector<64x128xbf16>
    %c0_1 = arith.constant 0 : index
    %c0_2 = arith.constant 0 : index
    %2 = vector.load %arg1[%c0_1, %c0_2] : memref<128x128xbf16, #tpu.memory_space<vmem>>, vector<128x128xbf16>
    %cst = arith.constant dense<0.000000e+00> : vector<64x128xf32>
    %3 = tpu.matmul %1, %2, %cst {dimension_numbers = #tpu.dot_dimension_numbers<[1], [0], [0], [1], [0, 0, 1, 1], [], []>} : vector<64x128xbf16>, vector<128x128xbf16>, vector<64x128xf32> -> vector<64x128xf32>
    %c0_3 = arith.constant 0 : index
    %c0_4 = arith.constant 0 : index
    %4 = vector.load %arg2[%c0_3, %c0_4] : memref<1x128xf32, #tpu.memory_space<vmem>>, vector<1x128xf32>
    %5 = vector.broadcast %4 : vector<1x128xf32> to vector<64x128xf32>
    %6 = arith.addf %3, %5 : vector<64x128xf32>
    %cst_5 = arith.constant 0.000000e+00 : f32
    %7 = vector.broadcast %cst_5 : f32 to vector<64x128xf32>
    %8 = arith.maximumf %6, %7 : vector<64x128xf32>
    %9 = arith.truncf %8 : vector<64x128xf32> to vector<64x128xbf16>
    %c0_6 = arith.constant 0 : index
    %c0_7 = arith.constant 0 : index
    %10 = vector.load %arg3[%c0_6, %c0_7] : memref<128x1xbf16, #tpu.memory_space<vmem>>, vector<128x1xbf16>
    %cst_8 = arith.constant dense<0.000000e+00> : vector<64x1xf32>
    %11 = tpu.matmul %9, %10, %cst_8 {dimension_numbers = #tpu.dot_dimension_numbers<[1], [0], [0], [1], [0, 0, 1, 1], [], []>} : vector<64x128xbf16>, vector<128x1xbf16>, vector<64x1xf32> -> vector<64x1xf32>
    %c0_9 = arith.constant 0 : index
    %c0_10 = arith.constant 0 : index
    %12 = vector.load %arg4[%c0_9, %c0_10] : memref<1x1xf32, #tpu.memory_space<vmem>>, vector<1x1xf32>
    %13 = vector.broadcast %12 : vector<1x1xf32> to vector<64x1xf32>
    %14 = arith.addf %11, %13 : vector<64x1xf32>
    %cst_11 = arith.constant 0.000000e+00 : f32
    %15 = vector.broadcast %cst_11 : f32 to vector<64x1xf32>
    %16 = arith.maximumf %14, %15 : vector<64x1xf32>
    %c0_12 = arith.constant 0 : index
    %c0_13 = arith.constant 0 : index
    %17 = vector.load %arg5[%c0_12, %c0_13] : memref<64x1xf32, #tpu.memory_space<vmem>>, vector<64x1xf32>
    tpu.vector_store %arg5[%c0_12, %c0_13], %16 {strides = array<i32>} : memref<64x1xf32, #tpu.memory_space<vmem>>, vector<64x1xf32>,
    return
  }
}

</mosaic_0001>

<bundles_post_ra>
// kernel: forward.3
= control target key start
LH: loop header
LB: loop body
LE: loop exit
PB: predicated region body
PF: predicated region fallthrough
CT: control target
= control target key end

     0   :  { %v2879_v1 = vmov 0   ;;  %vm100_vm0 = vcmask 130048   ;;  %vm723_vm1 = vcmask 523264   ;;  %s3491_s4 = inlined_call_operand.vmem [shape: bf16[16,1152], index: 4, kind: input, shape index: {}]   ;;  %s3492_s1 = inlined_call_operand.vmem [shape: f32[64,16], index: 1, kind: input, shape index: {}]   ;;  %s3493_s2 = inlined_call_operand.vmem [shape: bf16[3,16,128], index: 2, kind: input, shape index: {}]   ;;  %s3494_s0 = inlined_call_operand.vmem [shape: bf16[64,64], index: 0, kind: input, shape index: {}]   ;;  %s3495_s3 = inlined_call_operand.vmem [shape: bf16[2,3,128,128], index: 3, kind: input, shape index: {}]   ;;  %s3496_s5 = inlined_call_operand.vmem [shape: f32[3,1,384], index: 5, kind: input, shape index: {}]   ;;  %s3497_s6 = inlined_call_operand.vmem [shape: f32[64,128], index: 6, kind: output, shape index: {}]  }
   0x1   :  { %v2807_v0 = vld [vmem:[%s3491_s4 + $0x4] ss:$36 sps:$4 sm:$0xff]   ;;  %145 = vmatprep.mubr.bf16.mxu0 %v2879_v1  ;;  %228 = vmatprep.mubr.bf16.mxu1 %v2879_v1  ;;  %v2809_v2 = vld [vmem:[%s3491_s4 + $0xc] ss:$36 sps:$4 sm:$0xff]   ;;  %v35_v8 = vld [vmem:[%s3492_s1 + $0x18] sm:$0xff] }
   0x2   :  { %113 = vmatprep.subr.bf16.mxu0 %v2807_v0  ;;  %v2811_v3 = vld [vmem:[%s3491_s4] ss:$36 sps:$4 sm:$0xff]   ;;  %v2812_v4 = vld [vmem:[%s3491_s4 + $0x8] ss:$36 sps:$4 sm:$0xff]   ;;  %2764 = vmatprep.subr.bf16.mxu1 %v2809_v2  ;;  %v34_v7 = vld [vmem:[%s3492_s1 + $0x10] sm:$0xff] }
   0x3   :  { %v32_v5 = vld [vmem:[%s3492_s1] sm:$0xff]  ;;  %v33_v6 = vld [vmem:[%s3492_s1 + $0x8] sm:$0xff]  ;;  %114 = vmatpush1.bf16.msra.mxu0 %v2811_v3  ;;  %2765 = vmatpush1.bf16.msra.mxu1 %v2812_v4  ;;  %v2943_v10 = vpack.c.bf16 %v35_v8, %v34_v7  ;;  %v2813_v11 = vld [vmem:[%s3491_s4 + $0x18] ss:$36 sps:$4 sm:$0xff]  }
   0x4   :  { %v2941_v9 = vpack.c.bf16 %v33_v6, %v32_v5  ;;  %186 = vmatprep.subr.bf16.mxu0 %v2809_v2  ;;  %v2815_v12 = vld [vmem:[%s3491_s4 + $0x1c] ss:$36 sps:$4 sm:$0xff]   ;;  %v2818_v14 = vld [vmem:[%s3491_s4 + $0x14] ss:$36 sps:$4 sm:$0xff]   ;;  %v37_v15 = vld [vmem:[%s3492_s1 + $0x28] sm:$0xff] }
   0x5   :  { %v36_v13 = vld [vmem:[%s3492_s1 + $0x20] sm:$0xff]  ;;  %332 = vmatprep.subr.bf16.mxu1 %v2815_v12  ;;  %v38_v18 = vld [vmem:[%s3492_s1 + $0x30] sm:$0xff]  ;;  %v39_v19 = vld [vmem:[%s3492_s1 + $0x38] sm:$0xff] }
   0x6   :  { %2219 = vmatmul.mubr.msk.bf16.vlgmr.msra.gmra.mrb[0].mxu0 %vm100_vm0, %v2941_v9  ;;  %2224 = vmatmul.mubr.msk.bf16.vlgmr.msra.gmra.mrb[0].mxu1 %vm100_vm0, %v2943_v10  ;;  %v2820_v16 = vld [vmem:[%s3493_s2] sm:$0xff]   ;;  %v42_v17 = vpack.c.bf16 %v37_v15, %v36_v13  ;;  %v43_v20 = vpack.c.bf16 %v39_v19, %v38_v18  ;;  %v2821_v21 = vld [vmem:[%s3493_s2 + $0x10] sm:$0xff]   ;;  %v2822_v24 = vld [vmem:[%s3493_s2 + $0x8] sm:$0xff]  }
   0x7   :  { %187 = vmatpush1.bf16.msra.mxu0 %v2812_v4  ;;  %155 = vmatprep.mubr.bf16.mxu0 %v2879_v1  ;;  %v2816_v22 = vld [vmem:[%s3491_s4 + $0x10] ss:$36 sps:$4 sm:$0xff]   ;;  %v2819_v23 = vld [vmem:[%s3491_s4 + $0x20] ss:$36 sps:$4 sm:$0xff]  }
   0x8   :  { %238 = vmatprep.mubr.bf16.mxu1 %v2879_v1  ;;  %333 = vmatpush1.bf16.msra.mxu1 %v2813_v11  ;;  %v3047_v25 = vld [vmem:[%s3494_s0] sm:$0xff]  }
   0x9   :  { %259 = vmatprep.subr.bf16.mxu0 %v2818_v14  ;;  %2542 = vmatprep.subr.bf16.mxu1 %v2820_v16 }
   0xe   :  { %2220 = vmatmul.mubr.msk.bf16.gmra.mrb[4].mxu0 %vm100_vm0, %v2943_v10  ;;  %2225 = vmatmul.mubr.msk.bf16.gmra.mrb[4].mxu1 %vm100_vm0, %v42_v17 }
   0xf   :  { %165 = vmatprep.mubr.bf16.mxu0 %v2879_v1  ;;  %248 = vmatprep.mubr.bf16.mxu1 %v2879_v1 }
  0x16   :  { %2221 = vmatmul.mubr.msk.bf16.gmra.mrb[8].mxu0 %vm100_vm0, %v42_v17  ;;  %2226 = vmatmul.mubr.msk.bf16.gmra.mrb[8].mxu1 %vm100_vm0, %v43_v20 }
  0x17   :  { %175 = vmatprep.mubr.bf16.mxu0 %v2879_v1  ;;  %364 = vmatprep.mubr.bf16.mxu1 %v2879_v1 }
  0x1e   :  { %2222 = vmatmul.mubr.msk.bf16.gmra.mrb[12].mxu0 %vm100_vm0, %v43_v20  ;;  %2231 = vmatmul.mubr.msk.bf16.vlgmr.msra.gmra.mrb[12].mxu1 %vm100_vm0, %v2941_v9 }
  0x1f   :  { %218 = vmatprep.mubr.bf16.mxu0 %v2879_v1  ;;  %374 = vmatprep.mubr.bf16.mxu1 %v2879_v1 }
  0x20   :  { %2543 = vmatpush3.bf16.msra.mxu1 %v2820_v16 }
  0x21   :  { %2562 = vmatprep.subr.bf16.mxu1 %v2821_v21 }
  0x26   :  { %2223 = vmatmul.mubr.msk.bf16.vlgmr.msra.gmra.mrb[16].mxu0 %vm100_vm0, %v2941_v9  ;;  %2232 = vmatmul.mubr.msk.bf16.gmra.mrb[16].mxu1 %vm100_vm0, %v2943_v10 }
  0x27   :  { %260 = vmatpush1.bf16.msra.mxu0 %v2816_v22  ;;  %291 = vmatprep.mubr.bf16.mxu0 %v2879_v1  ;;  %v3118_v22 = vld [vmem:[%s3494_s0 + $0x8] sm:$0xff]  }
  0x28   :  { %384 = vmatprep.mubr.bf16.mxu1 %v2879_v1  ;;  %2532 = vmatprep.subr.bf16.mxu0 %v2819_v23 }
  0x2e   :  { %2227 = vmatmul.mubr.msk.bf16.vlgmr.msra.gmra.mrb[20].mxu0 %vm100_vm0, %v2941_v9  ;;  %2233 = vmatmul.mubr.msk.bf16.gmra.mrb[20].mxu1 %vm100_vm0, %v42_v17 }
  0x2f   :  { %2533 = vmatpush3.bf16.msra.mxu0 %v2819_v23  ;;  %301 = vmatprep.mubr.bf16.mxu0 %v2879_v1 }
  0x30   :  { %394 = vmatprep.mubr.bf16.mxu1 %v2879_v1  ;;  %2552 = vmatprep.subr.bf16.mxu0 %v2822_v24 }
  0x36   :  { %2228 = vmatmul.mubr.msk.bf16.gmra.mrb[24].mxu0 %vm100_vm0, %v2943_v10  ;;  %2234 = vmatmul.mubr.msk.bf16.gmra.mrb[24].mxu1 %vm100_vm0, %v43_v20 }
  0x37   :  { %311 = vmatprep.mubr.bf16.mxu0 %v2879_v1  ;;  %2544 = vmatprep.mubr.msk.bf16.mxu1 %vm100_vm0, %v2941_v9 }
  0x3e   :  { %2229 = vmatmul.mubr.msk.bf16.gmra.mrb[28].mxu0 %vm100_vm0, %v42_v17  ;;  %2545 = vmatmul.mubr.msk.bf16.vlgmr.msra.gmra.mrb[28].mxu1 %vm100_vm0, %v2943_v10 }
  0x3f   :  { %321 = vmatprep.mubr.bf16.mxu0 %v2879_v1  ;;  %2548 = vmatprep.mubr.msk.bf16.mxu1 %vm100_vm0, %v42_v17 }
  0x40   :  { %2563 = vmatpush3.bf16.msra.mxu1 %v2821_v21 }
  0x46   :  { %2230 = vmatmul.mubr.msk.bf16.gmra.mrb[32].mxu0 %vm100_vm0, %v43_v20  ;;  %2549 = vmatmul.mubr.msk.bf16.gmra.mrb[32].mxu1 %vm100_vm0, %v43_v20 }
  0x47   :  { %2534 = vmatprep.mubr.msk.bf16.mxu0 %vm100_vm0, %v2941_v9  ;;  %2564 = vmatprep.mubr.msk.bf16.mxu1 %vm100_vm0, %v2941_v9 }
  0x4e   :  { %2535 = vmatmul.mubr.msk.bf16.vlgmr.msra.gmra.mrb[36].mxu0 %vm100_vm0, %v2943_v10  ;;  %2565 = vmatmul.mubr.msk.bf16.vlgmr.msra.gmra.mrb[36].mxu1 %vm100_vm0, %v2943_v10 }
  0x4f   :  { %2553 = vmatpush3.bf16.msra.mxu0 %v2822_v24  ;;  %2538 = vmatprep.mubr.msk.bf16.mxu0 %vm100_vm0, %v42_v17 }
  0x50   :  { %2568 = vmatprep.mubr.msk.bf16.mxu1 %vm100_vm0, %v42_v17 }
  0x56   :  { %2539 = vmatmul.mubr.msk.bf16.gmra.mrb[40].mxu0 %vm100_vm0, %v43_v20  ;;  %2569 = vmatmul.mubr.msk.bf16.gmra.mrb[40].mxu1 %vm100_vm0, %v43_v20 }
  0x57   :  { %2554 = vmatprep.mubr.msk.bf16.mxu0 %vm100_vm0, %v2941_v9  ;;  %2580 = vmatprep.mubr.msk.bf16.mxu1 %vm723_vm1, %v3047_v25 }
  0x5e   :  { %2555 = vmatmul.mubr.msk.bf16.vlgmr.msra.gmra.mrb[44].mxu0 %vm100_vm0, %v2943_v10 }
  0x5f   :  { %2558 = vmatprep.mubr.msk.bf16.mxu0 %vm100_vm0, %v42_v17 }
  0x66   :  { %2559 = vmatmul.mubr.msk.bf16.gmra.mrb[48].mxu0 %vm100_vm0, %v43_v20 }
  0x67   :  { %768 = vmatprep.mubr.bf16.mxu0 %v2879_v1 }
  0xd9   :  { %v3051_v26 = vpop.f32.mrb[0].mxu1 }
  0xda   :  { %v3053_v27 = vpop.f32.mrb[1].mxu1 }
  0xdb   :  { %v3055_v28 = vpop.f32.mrb[2].mxu1 }
  0xdc   :  { %v3057_v29 = vpop.f32.mrb[3].mxu1 }
  0xe1   :  { %v3059_v30 = vpop.f32.mrb[4].mxu1 }
  0xe2   :  { %v3061_v31 = vpop.f32.mrb[5].mxu1 }
  0xe3   :  { %v3063_v32 = vpop.f32.mrb[6].mxu1 }
  0xe4   :  { %v3065_v33 = vpop.f32.mrb[7].mxu1 }
  0xe9   :  { %v3067_v34 = vpop.f32.mrb[8].mxu1 }
  0xea   :  { %v3069_v35 = vpop.f32.mrb[9].mxu1 }
  0xeb   :  { %v3071_v36 = vpop.f32.mrb[10].mxu1 }
  0xec   :  { %v3073_v37 = vpop.f32.mrb[11].mxu1 }
  0xf9   :  { %v3075_v38 = vpop.f32.mrb[16].mxu0 }
  0xfa   :  { %v3077_v39 = vpop.f32.mrb[17].mxu0 }
  0xfb   :  { %v3079_v40 = vpop.f32.mrb[18].mxu0 }
  0xfc   :  { %v3081_v41 = vpop.f32.mrb[19].mxu0 }
 0x101   :  { %v3083_v42 = vpop.f32.mrb[20].mxu0 }
 0x102   :  { %v3085_v43 = vpop.f32.mrb[21].mxu0 }
 0x103   :  { %v3087_v44 = vpop.f32.mrb[22].mxu0 }
 0x104   :  { %v3089_v45 = vpop.f32.mrb[23].mxu0 }
 0x109   :  { %v3091_v46 = vpop.f32.mrb[24].mxu0 }
 0x10a   :  { %v3093_v47 = vpop.f32.mrb[25].mxu0 }
 0x10b   :  { %v3095_v48 = vpop.f32.mrb[26].mxu0 }
 0x10c   :  { %v3097_v49 = vpop.f32.mrb[27].mxu0 }
 0x111   :  { %v3099_v50 = vpop.f32.mrb[28].mxu0  ;;  %v2546_v51 = vpop.f32.mrb[28].mxu1 }
 0x112   :  { %v3101_v52 = vpop.f32.mrb[29].mxu0  ;;  %v512_v53 = vpop.f32.mrb[29].mxu1 }
 0x113   :  { %v3103_v54 = vpop.f32.mrb[30].mxu0  ;;  %v2547_v55 = vpop.f32.mrb[30].mxu1 }
 0x114   :  { %v3105_v56 = vpop.f32.mrb[31].mxu0  ;;  %v544_v57 = vpack.c.bf16 %v2547_v55, %v2546_v51  ;;  %v515_v58 = vpop.f32.mrb[31].mxu1  ;;  %v3123_v51 = vld [vmem:[%s3494_s0 + $0x10] sm:$0xff]  }
 0x115   :  { %v543_v59 = vpack.c.bf16 %v515_v58, %v512_v53 }
 0x119   :  { %v3107_v60 = vpop.f32.mrb[32].mxu0  ;;  %v2550_v61 = vpop.f32.mrb[32].mxu1 }
 0x11a   :  { %v3109_v62 = vpop.f32.mrb[33].mxu0  ;;  %v528_v63 = vpop.f32.mrb[33].mxu1 }
 0x11b   :  { %v3111_v0 = vpop.f32.mrb[34].mxu0  ;;  %v2551_v2 = vpop.f32.mrb[34].mxu1 }
 0x11c   :  { %v3113_v3 = vpop.f32.mrb[35].mxu0  ;;  %v546_v4 = vpack.c.bf16 %v2551_v2, %v2550_v61  ;;  %v531_v5 = vpop.f32.mrb[35].mxu1 }
 0x11d   :  { %v545_v6 = vpack.c.bf16 %v531_v5, %v528_v63  ;;  %v3132_v63 = vld [vmem:[%s3494_s0 + $0x18] sm:$0xff]  }
 0x121   :  { %v2566_v7 = vpop.f32.mrb[36].mxu1 }
 0x122   :  { %v668_v8 = vpop.f32.mrb[37].mxu1 }
 0x123   :  { %v2567_v9 = vpop.f32.mrb[38].mxu1 }
 0x124   :  { %v700_v10 = vpack.c.bf16 %v2567_v9, %v2566_v7  ;;  %v671_v11 = vpop.f32.mrb[39].mxu1  ;;  %v2832_v9 = vld [vmem:[%s3495_s3 + $0x50] sm:$0xff]  }
 0x125   :  { %v699_v12 = vpack.c.bf16 %v671_v11, %v668_v8  ;;  %v2831_v8 = vld [vmem:[%s3495_s3 + $0x10] sm:$0xff]   ;;  %v2834_v11 = vld [vmem:[%s3495_s3 + $0x58] sm:$0xff]  }
 0x127   :  { %2572 = vmatprep.subr.bf16.mxu1 %v699_v12 }
 0x128   :  { %2573 = vmatpush3.bf16.msra.mxu1 %v699_v12  ;;  %v2835_v12 = vld [vmem:[%s3495_s3 + $0x20] sm:$0xff]  }
 0x129   :  { %v2570_v13 = vpop.f32.mrb[40].mxu1  ;;  %2574 = vmatprep.subr.bf16.mxu1 %v700_v10 }
 0x12a   :  { %v684_v14 = vpop.f32.mrb[41].mxu1 }
 0x12b   :  { %v2571_v15 = vpop.f32.mrb[42].mxu1 }
 0x12c   :  { %v702_v16 = vpack.c.bf16 %v2571_v15, %v2570_v13  ;;  %v687_v17 = vpop.f32.mrb[43].mxu1  ;;  %2575 = vmatpush3.bf16.msra.mxu1 %v700_v10  ;;  %v2833_v10 = vld [vmem:[%s3495_s3 + $0x18] sm:$0xff]   ;;  %v2836_v13 = vld [vmem:[%s3495_s3 + $0x60] sm:$0xff]   ;;  %v2838_v15 = vld [vmem:[%s3495_s3 + $0x68] sm:$0xff]  }
 0x12d   :  { %v701_v18 = vpack.c.bf16 %v687_v17, %v684_v14  ;;  %v2837_v14 = vld [vmem:[%s3495_s3 + $0x28] sm:$0xff]   ;;  %v2840_v17 = vld [vmem:[%s3495_s3 + $0x70] sm:$0xff]  }
 0x12f   :  { %2576 = vmatprep.subr.bf16.mxu1 %v701_v18 }
 0x130   :  { %2577 = vmatpush3.bf16.msra.mxu1 %v701_v18  ;;  %v2841_v18 = vld [vmem:[%s3495_s3 + $0x38] sm:$0xff]  }
 0x131   :  { %v2556_v19 = vpop.f32.mrb[44].mxu0  ;;  %2578 = vmatprep.subr.bf16.mxu1 %v702_v16 }
 0x132   :  { %v590_v20 = vpop.f32.mrb[45].mxu0 }
 0x133   :  { %v2557_v21 = vpop.f32.mrb[46].mxu0 }
 0x134   :  { %v622_v23 = vpack.c.bf16 %v2557_v21, %v2556_v19  ;;  %v593_v24 = vpop.f32.mrb[47].mxu0  ;;  %2579 = vmatpush3.bf16.msra.mxu1 %v702_v16  ;;  %v2839_v16 = vld [vmem:[%s3495_s3 + $0x30] sm:$0xff]   ;;  %v2842_v19 = vld [vmem:[%s3495_s3 + $0x78] sm:$0xff]   ;;  %v876_v21 = vlaneseq }
 0x135   :  { %v621_v53 = vpack.c.bf16 %v593_v24, %v590_v20  ;;  %v3198_v20 = vld [vmem:[%s3495_s3 + $0x80] sm:$0xff]  }
 0x137   :  { %736 = vmatprep.subr.bf16.mxu0 %v621_v53  ;;  %2581 = vmatmul.mubr.msk.bf16.vlgmr.msra.gmra.mrb[44].mxu1 %vm723_vm1, %v3118_v22  ;;  %v874_v53 = vld [vmem:[%s3496_s5] sm:$0x7] }
 0x138   :  { %737 = vmatpush1.bf16.msra.mxu0 %v543_v59  ;;  %2584 = vmatprep.mubr.msk.bf16.mxu1 %vm723_vm1, %v3123_v51  ;;  %v2828_v59 = vld [vmem:[%s3495_s3 + $0x40] sm:$0xff]  }
 0x139   :  { %v2560_v55 = vpop.f32.mrb[48].mxu0  ;;  %738 = vmatprep.subr.bf16.mxu0 %v622_v23  ;;  %2612 = vmatprep.subr.bf16.mxu1 %v2828_v59  ;;  %v877_v23 = vshrl.u32 %v876_v21, 7 }
 0x13a   :  { %v606_v58 = vpop.f32.mrb[49].mxu0  ;;  %2613 = vmatpush3.bf16.msra.mxu1 %v2828_v59 }
 0x13b   :  { %v2561_v61 = vpop.f32.mrb[50].mxu0  ;;  %v3201_v24 = vsub.s32 2, %v877_v23 }
 0x13c   :  { %v624_v2 = vpack.c.bf16 %v2561_v61, %v2560_v55  ;;  %v609_v5 = vpop.f32.mrb[51].mxu0  ;;  %739 = vmatpush1.bf16.msra.mxu0 %v544_v57  ;;  %v2827_v57 = vld [vmem:[%s3495_s3] sm:$0xff]  }
 0x13d   :  { %v623_v7 = vpack.c.bf16 %v609_v5, %v606_v58  ;;  %v887_v55 = vrot.slane %v874_v53, %v3201_v24 }
 0x13f   :  { %740 = vmatprep.subr.bf16.mxu0 %v623_v7  ;;  %2585 = vmatmul.mubr.msk.bf16.gmra.mrb[48].mxu1 %vm723_vm1, %v3132_v63 }
 0x140   :  { %741 = vmatpush1.bf16.msra.mxu0 %v545_v6  ;;  %v2830_v6 = vld [vmem:[%s3495_s3 + $0x48] sm:$0xff]  }
 0x141   :  { %742 = vmatprep.subr.bf16.mxu0 %v624_v2  ;;  %2614 = vmatprep.subr.bf16.mxu1 %v2830_v6 }
 0x142   :  { %2615 = vmatpush3.bf16.msra.mxu1 %v2830_v6 }
 0x143   :  { %2616 = vmatprep.subr.bf16.mxu1 %v2832_v9 }
 0x144   :  { %743 = vmatpush1.bf16.msra.mxu0 %v546_v4  ;;  %v2829_v4 = vld [vmem:[%s3495_s3 + $0x8] sm:$0xff]  }
 0x145   :  { %2588 = vmatprep.subr.bf16.mxu0 %v2827_v57 }
 0x146   :  { %2617 = vmatpush3.bf16.msra.mxu1 %v2832_v9 }
 0x147   :  { %2262 = vmatmul.mubr.msk.bf16.vlgmr.msra.gmra.mrb[0].mxu0 %vm723_vm1, %v3047_v25  ;;  %2618 = vmatprep.subr.bf16.mxu1 %v2834_v11 }
 0x148   :  { %778 = vmatprep.mubr.bf16.mxu0 %v2879_v1  ;;  %2589 = vmatpush3.bf16.msra.mxu0 %v2827_v57 }
 0x149   :  { %2590 = vmatprep.subr.bf16.mxu0 %v2829_v4 }
 0x14a   :  { %2619 = vmatpush3.bf16.msra.mxu1 %v2834_v11 }
 0x14b   :  { %2620 = vmatprep.subr.bf16.mxu1 %v2836_v13 }
 0x14c   :  { %2591 = vmatpush3.bf16.msra.mxu0 %v2829_v4 }
 0x14d   :  { %2592 = vmatprep.subr.bf16.mxu0 %v2831_v8 }
 0x14e   :  { %2621 = vmatpush3.bf16.msra.mxu1 %v2836_v13 }
 0x14f   :  { %2263 = vmatmul.mubr.msk.bf16.gmra.mrb[4].mxu0 %vm723_vm1, %v3118_v22  ;;  %2622 = vmatprep.subr.bf16.mxu1 %v2838_v15 }
 0x150   :  { %788 = vmatprep.mubr.bf16.mxu0 %v2879_v1  ;;  %2593 = vmatpush3.bf16.msra.mxu0 %v2831_v8 }
 0x151   :  { %2594 = vmatprep.subr.bf16.mxu0 %v2833_v10 }
 0x152   :  { %2623 = vmatpush3.bf16.msra.mxu1 %v2838_v15 }
 0x153   :  { %2624 = vmatprep.subr.bf16.mxu1 %v2840_v17 }
 0x154   :  { %2595 = vmatpush3.bf16.msra.mxu0 %v2833_v10 }
 0x155   :  { %2596 = vmatprep.subr.bf16.mxu0 %v2835_v12 }
 0x156   :  { %2625 = vmatpush3.bf16.msra.mxu1 %v2840_v17  ;;  %v3214_v17 = vsub.s32 0, %v877_v23 }
 0x157   :  { %2264 = vmatmul.mubr.msk.bf16.gmra.mrb[8].mxu0 %vm723_vm1, %v3123_v51  ;;  %2626 = vmatprep.subr.bf16.mxu1 %v2842_v19 }
 0x158   :  { %798 = vmatprep.mubr.bf16.mxu0 %v2879_v1  ;;  %2597 = vmatpush3.bf16.msra.mxu0 %v2835_v12 }
 0x159   :  { %2598 = vmatprep.subr.bf16.mxu0 %v2837_v14 }
 0x15a   :  { %2627 = vmatpush3.bf16.msra.mxu1 %v2842_v19  ;;  %v3217_v19 = vsub.s32 1, %v877_v23 }
 0x15c   :  { %2599 = vmatpush3.bf16.msra.mxu0 %v2837_v14 }
 0x15d   :  { %2600 = vmatprep.subr.bf16.mxu0 %v2839_v16 }
 0x15f   :  { %2265 = vmatmul.mubr.msk.bf16.gmra.mrb[12].mxu0 %vm723_vm1, %v3132_v63 }
 0x160   :  { %2601 = vmatpush3.bf16.msra.mxu0 %v2839_v16 }
 0x161   :  { %2602 = vmatprep.subr.bf16.mxu0 %v2841_v18 }
 0x164   :  { %2603 = vmatpush3.bf16.msra.mxu0 %v2841_v18 }
 0x165   :  { %2636 = vmatprep.subr.bf16.mxu0 %v3198_v20 }
 0x20a   :  { %v2582_v58 = vpop.f32.mrb[44].mxu1 }
 0x20b   :  { %v852_v61 = vadd.f32 %v2582_v58, %v3051_v26  ;;  %v843_v2 = vpop.f32.mrb[45].mxu1 }
 0x20c   :  { %v844_v5 = vadd.f32 %v843_v2, %v3075_v38  ;;  %v2583_v7 = vpop.f32.mrb[46].mxu1 }
 0x20d   :  { %v899_v57 = vadd.f32 %v887_v55, %v852_v61  ;;  %v855_v59 = vadd.f32 %v2583_v7, %v3055_v28  ;;  %v846_v4 = vpop.f32.mrb[47].mxu1 }
 0x20e   :  { %v893_v6 = vadd.f32 %v887_v55, %v844_v5  ;;  %v847_v8 = vadd.f32 %v846_v4, %v3079_v40 }
 0x20f   :  { %v902_v9 = vadd.f32 %v887_v55, %v855_v59  ;;  %v923_v11 = vmax.f32 %v899_v57, 0.0  ;;  %v3227_v59 = vrot.slane %v874_v53, %v3217_v19 }
 0x210   :  { %v896_v10 = vadd.f32 %v887_v55, %v847_v8  ;;  %v917_v13 = vmax.f32 %v893_v6, 0.0 }
 0x211   :  { %v926_v12 = vmax.f32 %v902_v9, 0.0 }
 0x212   :  { %v920_v14 = vmax.f32 %v896_v10, 0.0  ;;  %v2586_v15 = vpop.f32.mrb[48].mxu1 }
 0x213   :  { %v3211_v16 = vpack.c.bf16 %v926_v12, %v923_v11  ;;  %v868_v26 = vadd.f32 %v2586_v15, %v3067_v34  ;;  %v859_v38 = vpop.f32.mrb[49].mxu1  ;;  %v3224_v34 = vrot.slane %v874_v53, %v3214_v17 }
 0x214   :  { %v860_v28 = vadd.f32 %v859_v38, %v3059_v30  ;;  %v2587_v18 = vpop.f32.mrb[50].mxu1  ;;  %v3219_v40 = vpack.c.bf16 %v920_v14, %v917_v13 }
 0x215   :  { %v911_v21 = vadd.f32 %v887_v55, %v868_v26  ;;  %v871_v58 = vadd.f32 %v2587_v18, %v3071_v36  ;;  %v862_v61 = vpop.f32.mrb[51].mxu1 }
 0x216   :  { %v905_v2 = vadd.f32 %v887_v55, %v860_v28  ;;  %v863_v5 = vadd.f32 %v862_v61, %v3063_v32 }
 0x217   :  { %v914_v7 = vadd.f32 %v887_v55, %v871_v58  ;;  %v935_v30 = vmax.f32 %v911_v21, 0.0 }
 0x218   :  { %v908_v57 = vadd.f32 %v887_v55, %v863_v5  ;;  %v929_v4 = vmax.f32 %v905_v2, 0.0 }
 0x219   :  { %v938_v23 = vmax.f32 %v914_v7, 0.0 }
 0x21a   :  { %v932_v6 = vmax.f32 %v908_v57, 0.0  ;;  %v770_v8 = vpop.f32.mrb[0].mxu0 }
 0x21b   :  { %v891_v9 = vadd.f32 %v3224_v34, %v770_v8  ;;  %v772_v36 = vpop.f32.mrb[1].mxu0  ;;  %v3230_v10 = vpack.c.bf16 %v938_v23, %v935_v30 }
 0x21c   :  { %v892_v32 = vadd.f32 %v3227_v59, %v772_v36  ;;  %v774_v11 = vpop.f32.mrb[2].mxu0  ;;  %v3233_v12 = vpack.c.bf16 %v932_v6, %v929_v4  ;;  %v2844_v36 = vld [vmem:[%s3495_s3 + $0x88] sm:$0xff]  }
 0x21d   :  { %v894_v55 = vadd.f32 %v3224_v34, %v774_v11  ;;  %v776_v13 = vpop.f32.mrb[3].mxu0  ;;  %v915_v14 = vmax.f32 %v891_v9, 0.0 }
 0x21e   :  { %v895_v53 = vadd.f32 %v3227_v59, %v776_v13  ;;  %v916_v26 = vmax.f32 %v892_v32, 0.0 }
 0x21f   :  { %v918_v15 = vmax.f32 %v894_v55, 0.0 }
 0x220   :  { %v919_v38 = vmax.f32 %v895_v53, 0.0 }
 0x221   :  { %v939_v28 = vpack.c.bf16 %v918_v15, %v915_v14 }
 0x222   :  { %v943_v18 = vpack.c.bf16 %v919_v38, %v916_v26  ;;  %v780_v21 = vpop.f32.mrb[4].mxu0  ;;  %v2845_v38 = vld [vmem:[%s3495_s3 + $0x90] sm:$0xff]  }
 0x223   :  { %v897_v58 = vadd.f32 %v3224_v34, %v780_v21  ;;  %v782_v61 = vpop.f32.mrb[5].mxu0  ;;  %2604 = vmatprep.mubr.bf16.mxu0 %v939_v28 }
 0x224   :  { %v898_v2 = vadd.f32 %v3227_v59, %v782_v61  ;;  %v784_v5 = vpop.f32.mrb[6].mxu0  ;;  %2628 = vmatprep.mubr.bf16.mxu1 %v943_v18 }
 0x225   :  { %v900_v7 = vadd.f32 %v3224_v34, %v784_v5  ;;  %v786_v57 = vpop.f32.mrb[7].mxu0  ;;  %v921_v23 = vmax.f32 %v897_v58, 0.0 }
 0x226   :  { %v901_v30 = vadd.f32 %v3227_v59, %v786_v57  ;;  %v922_v6 = vmax.f32 %v898_v2, 0.0 }
 0x227   :  { %v924_v4 = vmax.f32 %v900_v7, 0.0 }
 0x228   :  { %v925_v8 = vmax.f32 %v901_v30, 0.0 }
 0x229   :  { %v940_v9 = vpack.c.bf16 %v924_v4, %v921_v23 }
 0x22a   :  { %v944_v32 = vpack.c.bf16 %v925_v8, %v922_v6  ;;  %v790_v11 = vpop.f32.mrb[8].mxu0 }
 0x22b   :  { %v903_v55 = vadd.f32 %v3224_v34, %v790_v11  ;;  %v792_v13 = vpop.f32.mrb[9].mxu0  ;;  %2605 = vmatmul.mubr.bf16.vlgmr.msra.gmra.mrb[52].mxu0 %v940_v9  ;;  %v2847_v9 = vld [vmem:[%s3495_s3 + $0xa0] sm:$0xff]  }
 0x22c   :  { %v904_v53 = vadd.f32 %v3227_v59, %v792_v13  ;;  %2637 = vmatpush3.bf16.msra.mxu0 %v3198_v20  ;;  %v794_v14 = vpop.f32.mrb[10].mxu0  ;;  %2629 = vmatmul.mubr.bf16.vlgmr.msra.gmra.mrb[52].mxu1 %v944_v32  ;;  %v2846_v20 = vld [vmem:[%s3495_s3 + $0x98] sm:$0xff]  }
 0x22d   :  { %v906_v15 = vadd.f32 %v3224_v34, %v794_v14  ;;  %v796_v26 = vpop.f32.mrb[11].mxu0  ;;  %2638 = vmatprep.subr.bf16.mxu0 %v2844_v36  ;;  %v927_v18 = vmax.f32 %v903_v55, 0.0  ;;  %v2848_v14 = vld [vmem:[%s3495_s3 + $0xa8] sm:$0xff]  }
 0x22e   :  { %v907_v28 = vadd.f32 %v3227_v59, %v796_v26  ;;  %v928_v58 = vmax.f32 %v904_v53, 0.0 }
 0x22f   :  { %v930_v21 = vmax.f32 %v906_v15, 0.0  ;;  %v2850_v15 = vld [vmem:[%s3495_s3 + $0xb8] sm:$0xff]  }
 0x230   :  { %v931_v61 = vmax.f32 %v907_v28, 0.0  ;;  %2639 = vmatpush3.bf16.msra.mxu0 %v2844_v36 }
 0x231   :  { %v941_v2 = vpack.c.bf16 %v930_v21, %v927_v18  ;;  %2640 = vmatprep.subr.bf16.mxu0 %v2845_v38 }
 0x232   :  { %v945_v5 = vpack.c.bf16 %v931_v61, %v928_v58  ;;  %v800_v7 = vpop.f32.mrb[12].mxu0 }
 0x233   :  { %v909_v57 = vadd.f32 %v3224_v34, %v800_v7  ;;  %v802_v30 = vpop.f32.mrb[13].mxu0  ;;  %2608 = vmatprep.mubr.bf16.mxu0 %v941_v2 }
 0x234   :  { %v910_v23 = vadd.f32 %v3227_v59, %v802_v30  ;;  %2641 = vmatpush3.bf16.msra.mxu0 %v2845_v38  ;;  %v804_v4 = vpop.f32.mrb[14].mxu0  ;;  %2632 = vmatprep.mubr.bf16.mxu1 %v945_v5 }
 0x235   :  { %v912_v6 = vadd.f32 %v3224_v34, %v804_v4  ;;  %v806_v8 = vpop.f32.mrb[15].mxu0  ;;  %2642 = vmatprep.subr.bf16.mxu0 %v2846_v20  ;;  %v933_v32 = vmax.f32 %v909_v57, 0.0 }
 0x236   :  { %v913_v36 = vadd.f32 %v3227_v59, %v806_v8  ;;  %v934_v55 = vmax.f32 %v910_v23, 0.0  ;;  %v2849_v59 = vld [vmem:[%s3495_s3 + $0xb0] sm:$0xff]  }
 0x237   :  { %v936_v11 = vmax.f32 %v912_v6, 0.0 }
 0x238   :  { %v937_v13 = vmax.f32 %v913_v36, 0.0  ;;  %2643 = vmatpush3.bf16.msra.mxu0 %v2846_v20 }
 0x239   :  { %v942_v53 = vpack.c.bf16 %v936_v11, %v933_v32  ;;  %2644 = vmatprep.subr.bf16.mxu0 %v2847_v9  ;;  %v2851_v11 = vld [vmem:[%s3495_s3 + $0xc0] sm:$0xff]  }
 0x23a   :  { %v946_v34 = vpack.c.bf16 %v937_v13, %v934_v55  ;;  %v2853_v55 = vld [vmem:[%s3495_s3 + $0xc8] sm:$0xff]  }
 0x23b   :  { %2609 = vmatmul.mubr.bf16.gmra.mrb[56].mxu0 %v942_v53 }
 0x23c   :  { %2645 = vmatpush3.bf16.msra.mxu0 %v2847_v9  ;;  %2633 = vmatmul.mubr.bf16.gmra.mrb[56].mxu1 %v946_v34 }
 0x23d   :  { %2652 = vmatprep.mubr.bf16.mxu0 %v3219_v40  ;;  %2646 = vmatprep.subr.bf16.mxu0 %v2848_v14 }
 0x23e   :  { %1384 = vmatprep.mubr.bf16.mxu1 %v2879_v1 }
 0x240   :  { %2647 = vmatpush3.bf16.msra.mxu0 %v2848_v14  ;;  %v2855_v14 = vld [vmem:[%s3495_s3 + $0xd0] sm:$0xff]  }
 0x241   :  { %2648 = vmatprep.subr.bf16.mxu0 %v2849_v59 }
 0x244   :  { %2649 = vmatpush3.bf16.msra.mxu0 %v2849_v59 }
 0x245   :  { %2650 = vmatprep.subr.bf16.mxu0 %v2850_v15 }
 0x248   :  { %2651 = vmatpush3.bf16.msra.mxu0 %v2850_v15 }
 0x24b   :  { %2653 = vmatmul.mubr.bf16.vlgmr.msra.gmra.mrb[60].mxu0 %v3211_v16 }
 0x24c   :  { %2656 = vmatprep.mubr.bf16.mxu0 %v3233_v12 }
 0x253   :  { %2657 = vmatmul.mubr.bf16.gmra.mrb[64].mxu0 %v3230_v10 }
 0x254   :  { %2668 = vmatprep.mubr.msk.bf16.mxu0 %vm723_vm1, %v3047_v25 }
 0x2fe   :  { %v2606_v40 = vpop.f32.mrb[52].mxu0 }
 0x2ff   :  { %v1049_v26 = vpop.f32.mrb[53].mxu0  ;;  %v2630_v38 = vpop.f32.mrb[52].mxu1 }
 0x300   :  { %v2607_v28 = vpop.f32.mrb[54].mxu0  ;;  %v1183_v18 = vpop.f32.mrb[53].mxu1 }
 0x301   :  { %v1081_v21 = vpack.c.bf16 %v2607_v28, %v2606_v40  ;;  %v1052_v58 = vpop.f32.mrb[55].mxu0  ;;  %v2631_v61 = vpop.f32.mrb[54].mxu1 }
 0x302   :  { %v1080_v2 = vpack.c.bf16 %v1052_v58, %v1049_v26  ;;  %v1215_v20 = vpack.c.bf16 %v2631_v61, %v2630_v38  ;;  %v1186_v5 = vpop.f32.mrb[55].mxu1  ;;  %v2852_v61 = vld [vmem:[%s3495_s3 + $0x100] sm:$0xff]  }
 0x303   :  { %v1214_v7 = vpack.c.bf16 %v1186_v5, %v1183_v18  ;;  %v2860_v5 = vld [vmem:[%s3495_s3 + $0x120] sm:$0xff]  }
 0x305   :  { %1352 = vmatprep.subr.bf16.mxu1 %v1214_v7  ;;  %v2862_v7 = vld [vmem:[%s3495_s3 + $0x128] sm:$0xff]  }
 0x306   :  { %1353 = vmatpush1.bf16.msra.mxu1 %v1080_v2  ;;  %v2854_v2 = vld [vmem:[%s3495_s3 + $0x108] sm:$0xff]  }
 0x307   :  { %1354 = vmatprep.subr.bf16.mxu1 %v1215_v20  ;;  %v2856_v20 = vld [vmem:[%s3495_s3 + $0x110] sm:$0xff]  }
 0x30a   :  { %1355 = vmatpush1.bf16.msra.mxu1 %v1081_v21 }
 0x30e   :  { %v2610_v16 = vpop.f32.mrb[56].mxu0 }
 0x30f   :  { %v1065_v10 = vpop.f32.mrb[57].mxu0  ;;  %v2634_v12 = vpop.f32.mrb[56].mxu1 }
 0x310   :  { %v2611_v57 = vpop.f32.mrb[58].mxu0  ;;  %v1199_v30 = vpop.f32.mrb[57].mxu1 }
 0x311   :  { %v1083_v23 = vpack.c.bf16 %v2611_v57, %v2610_v16  ;;  %v1068_v4 = vpop.f32.mrb[59].mxu0  ;;  %v2635_v6 = vpop.f32.mrb[58].mxu1  ;;  %v2863_v16 = vld [vmem:[%s3495_s3 + $0xf0] sm:$0xff]   ;;  %v2866_v57 = vld [vmem:[%s3495_s3 + $0x138] sm:$0xff]  }
 0x312   :  { %v1082_v8 = vpack.c.bf16 %v1068_v4, %v1065_v10  ;;  %v1217_v9 = vpack.c.bf16 %v2635_v6, %v2634_v12  ;;  %v1202_v36 = vpop.f32.mrb[59].mxu1  ;;  %v2864_v10 = vld [vmem:[%s3495_s3 + $0x130] sm:$0xff]   ;;  %v2865_v12 = vld [vmem:[%s3495_s3 + $0xf8] sm:$0xff]  }
 0x313   :  { %v1216_v32 = vpack.c.bf16 %v1202_v36, %v1199_v30  ;;  %v2867_v30 = vld [vmem:[%s3495_s3 + $0x140] sm:$0xff]  }
 0x315   :  { %1356 = vmatprep.subr.bf16.mxu1 %v1216_v32 }
 0x316   :  { %1357 = vmatpush1.bf16.msra.mxu1 %v1082_v8 }
 0x317   :  { %1358 = vmatprep.subr.bf16.mxu1 %v1217_v9 }
 0x31a   :  { %1359 = vmatpush1.bf16.msra.mxu1 %v1083_v23  ;;  %v2334_v23 = vld [vmem:[%s3496_s5 + $0x3] sm:$0x7] }
 0x31b   :  { %2676 = vmatprep.subr.bf16.mxu1 %v2851_v11  ;;  %v3350_v4 = vrot.slane %v2334_v23, %v3214_v17  ;;  %v3353_v8 = vrot.slane %v2334_v23, %v3217_v19 }
 0x31d   :  { %2326 = vmatmul.mubr.msk.bf16.vlgmr.msra.gmra.mrb[60].mxu1 %vm723_vm1, %v3047_v25  ;;  %v2857_v25 = vld [vmem:[%s3495_s3 + $0xd8] sm:$0xff]  }
 0x31e   :  { %v2654_v13 = vpop.f32.mrb[60].mxu0  ;;  %1394 = vmatprep.mubr.bf16.mxu1 %v2879_v1  ;;  %2677 = vmatpush3.bf16.msra.mxu1 %v2851_v11 }
 0x31f   :  { %v1317_v53 = vpop.f32.mrb[61].mxu0  ;;  %2678 = vmatprep.subr.bf16.mxu1 %v2853_v55 }
 0x320   :  { %v2655_v34 = vpop.f32.mrb[62].mxu0 }
 0x321   :  { %v1349_v59 = vpack.c.bf16 %v2655_v34, %v2654_v13  ;;  %v1320_v15 = vpop.f32.mrb[63].mxu0 }
 0x322   :  { %v1348_v40 = vpack.c.bf16 %v1320_v15, %v1317_v53  ;;  %2679 = vmatpush3.bf16.msra.mxu1 %v2853_v55 }
 0x323   :  { %2680 = vmatprep.subr.bf16.mxu1 %v2855_v14 }
 0x324   :  { %2660 = vmatprep.subr.bf16.mxu0 %v1348_v40 }
 0x325   :  { %2661 = vmatpush3.bf16.msra.mxu0 %v1348_v40  ;;  %2327 = vmatmul.mubr.msk.bf16.gmra.mrb[64].mxu1 %vm723_vm1, %v3118_v22 }
 0x326   :  { %v2658_v26 = vpop.f32.mrb[64].mxu0  ;;  %2662 = vmatprep.subr.bf16.mxu0 %v1349_v59  ;;  %1404 = vmatprep.mubr.bf16.mxu1 %v2879_v1 }
 0x327   :  { %v1333_v38 = vpop.f32.mrb[65].mxu0  ;;  %2681 = vmatpush3.bf16.msra.mxu1 %v2855_v14 }
 0x328   :  { %v2659_v28 = vpop.f32.mrb[66].mxu0  ;;  %2682 = vmatprep.subr.bf16.mxu1 %v2857_v25 }
 0x329   :  { %v1351_v18 = vpack.c.bf16 %v2659_v28, %v2658_v26  ;;  %v1336_v21 = vpop.f32.mrb[67].mxu0  ;;  %2663 = vmatpush3.bf16.msra.mxu0 %v1349_v59 }
 0x32a   :  { %v1350_v58 = vpack.c.bf16 %v1336_v21, %v1333_v38 }
 0x32b   :  { %2683 = vmatpush3.bf16.msra.mxu1 %v2857_v25 }
 0x32c   :  { %2664 = vmatprep.subr.bf16.mxu0 %v1350_v58 }
 0x32d   :  { %2665 = vmatpush3.bf16.msra.mxu0 %v1350_v58  ;;  %2328 = vmatmul.mubr.msk.bf16.gmra.mrb[68].mxu1 %vm723_vm1, %v3123_v51 }
 0x32e   :  { %2666 = vmatprep.subr.bf16.mxu0 %v1351_v18  ;;  %1414 = vmatprep.mubr.bf16.mxu1 %v2879_v1 }
 0x331   :  { %2667 = vmatpush3.bf16.msra.mxu0 %v1351_v18 }
 0x332   :  { %2700 = vmatprep.subr.bf16.mxu0 %v2852_v61 }
 0x334   :  { %2669 = vmatmul.mubr.msk.bf16.vlgmr.msra.gmra.mrb[68].mxu0 %vm723_vm1, %v3118_v22  ;;  %v2858_v22 = vld [vmem:[%s3495_s3 + $0x118] sm:$0xff]  }
 0x335   :  { %2329 = vmatmul.mubr.msk.bf16.gmra.mrb[72].mxu1 %vm723_vm1, %v3132_v63  ;;  %2672 = vmatprep.mubr.msk.bf16.mxu0 %vm723_vm1, %v3123_v51  ;;  %v2859_v51 = vld [vmem:[%s3495_s3 + $0xe0] sm:$0xff]  }
 0x336   :  { %2701 = vmatpush3.bf16.msra.mxu0 %v2852_v61  ;;  %2684 = vmatprep.subr.bf16.mxu1 %v2859_v51 }
 0x337   :  { %2702 = vmatprep.subr.bf16.mxu0 %v2854_v2  ;;  %2685 = vmatpush3.bf16.msra.mxu1 %v2859_v51 }
 0x33a   :  { %2703 = vmatpush3.bf16.msra.mxu0 %v2854_v2 }
 0x33b   :  { %2704 = vmatprep.subr.bf16.mxu0 %v2856_v20 }
 0x33c   :  { %2673 = vmatmul.mubr.msk.bf16.gmra.mrb[72].mxu0 %vm723_vm1, %v3132_v63  ;;  %v2861_v63 = vld [vmem:[%s3495_s3 + $0xe8] sm:$0xff]  }
 0x33d   :  { %2686 = vmatprep.subr.bf16.mxu1 %v2861_v63 }
 0x33e   :  { %2705 = vmatpush3.bf16.msra.mxu0 %v2856_v20  ;;  %2687 = vmatpush3.bf16.msra.mxu1 %v2861_v63 }
 0x33f   :  { %2706 = vmatprep.subr.bf16.mxu0 %v2858_v22  ;;  %2688 = vmatprep.subr.bf16.mxu1 %v2863_v16 }
 0x342   :  { %2707 = vmatpush3.bf16.msra.mxu0 %v2858_v22  ;;  %2689 = vmatpush3.bf16.msra.mxu1 %v2863_v16 }
 0x343   :  { %2708 = vmatprep.subr.bf16.mxu0 %v2860_v5  ;;  %2690 = vmatprep.subr.bf16.mxu1 %v2865_v12 }
 0x346   :  { %2709 = vmatpush3.bf16.msra.mxu0 %v2860_v5  ;;  %2691 = vmatpush3.bf16.msra.mxu1 %v2865_v12 }
 0x347   :  { %2710 = vmatprep.subr.bf16.mxu0 %v2862_v7  ;;  %2724 = vmatprep.subr.bf16.mxu1 %v2867_v30 }
 0x34a   :  { %2711 = vmatpush3.bf16.msra.mxu0 %v2862_v7 }
 0x34b   :  { %2712 = vmatprep.subr.bf16.mxu0 %v2864_v10 }
 0x34e   :  { %2713 = vmatpush3.bf16.msra.mxu0 %v2864_v10 }
 0x34f   :  { %2714 = vmatprep.subr.bf16.mxu0 %v2866_v57 }
 0x352   :  { %2715 = vmatpush3.bf16.msra.mxu0 %v2866_v57  ;;  %v2868_v57 = vld [vmem:[%s3495_s3 + $0x148] sm:$0xff]  }
 0x3f0   :  { %v1386_v6 = vpop.f32.mrb[60].mxu1 }
 0x3f1   :  { %v1387_v9 = vadd.f32 %v1386_v6, %v3077_v39  ;;  %v1388_v36 = vpop.f32.mrb[61].mxu1 }
 0x3f2   :  { %v1389_v32 = vadd.f32 %v1388_v36, %v3083_v42  ;;  %v1390_v11 = vpop.f32.mrb[62].mxu1 }
 0x3f3   :  { %v1508_v55 = vadd.f32 %v3350_v4, %v1387_v9  ;;  %v1391_v13 = vadd.f32 %v1390_v11, %v3081_v41  ;;  %v1392_v53 = vpop.f32.mrb[63].mxu1 }
 0x3f4   :  { %v1509_v14 = vadd.f32 %v3353_v8, %v1389_v32  ;;  %v1393_v34 = vadd.f32 %v1392_v53, %v3087_v44 }
 0x3f5   :  { %v1511_v59 = vadd.f32 %v3350_v4, %v1391_v13  ;;  %v1532_v40 = vmax.f32 %v1508_v55, 0.0 }
 0x3f6   :  { %v1512_v15 = vadd.f32 %v3353_v8, %v1393_v34  ;;  %v1533_v39 = vmax.f32 %v1509_v14, 0.0  ;;  %v3386_v14 = vrot.slane %v2334_v23, %v3201_v24  ;;  %v2870_v23 = vld [vmem:[%s3495_s3 + $0x158] sm:$0xff]  }
 0x3f7   :  { %v1535_v25 = vmax.f32 %v1511_v59, 0.0 }
 0x3f8   :  { %v1536_v26 = vmax.f32 %v1512_v15, 0.0  ;;  %v1396_v38 = vpop.f32.mrb[64].mxu1 }
 0x3f9   :  { %v1397_v42 = vadd.f32 %v1396_v38, %v3053_v27  ;;  %v1398_v28 = vpop.f32.mrb[65].mxu1  ;;  %v1556_v18 = vpack.c.bf16 %v1535_v25, %v1532_v40 }
 0x3fa   :  { %v1399_v41 = vadd.f32 %v1398_v28, %v3091_v46  ;;  %v1400_v21 = vpop.f32.mrb[66].mxu1  ;;  %v1560_v58 = vpack.c.bf16 %v1536_v26, %v1533_v39 }
 0x3fb   :  { %v1514_v61 = vadd.f32 %v3350_v4, %v1397_v42  ;;  %v1401_v44 = vadd.f32 %v1400_v21, %v3057_v29  ;;  %v1402_v2 = vpop.f32.mrb[67].mxu1  ;;  %2692 = vmatprep.mubr.bf16.mxu1 %v1556_v18 }
 0x3fc   :  { %v1515_v20 = vadd.f32 %v3353_v8, %v1399_v41  ;;  %v1403_v22 = vadd.f32 %v1402_v2, %v3095_v48  ;;  %2716 = vmatprep.mubr.bf16.mxu0 %v1560_v58 }
 0x3fd   :  { %v1517_v51 = vadd.f32 %v3350_v4, %v1401_v44  ;;  %v1538_v5 = vmax.f32 %v1514_v61, 0.0 }
 0x3fe   :  { %v1518_v27 = vadd.f32 %v3353_v8, %v1403_v22  ;;  %v1539_v46 = vmax.f32 %v1515_v20, 0.0 }
 0x3ff   :  { %v1541_v63 = vmax.f32 %v1517_v51, 0.0 }
 0x400   :  { %v1542_v7 = vmax.f32 %v1518_v27, 0.0  ;;  %v1406_v16 = vpop.f32.mrb[68].mxu1 }
 0x401   :  { %v1557_v10 = vpack.c.bf16 %v1541_v63, %v1538_v5  ;;  %v1407_v12 = vadd.f32 %v1406_v16, %v3061_v31  ;;  %v1408_v29 = vpop.f32.mrb[69].mxu1 }
 0x402   :  { %v1561_v6 = vpack.c.bf16 %v1542_v7, %v1539_v46  ;;  %v1409_v48 = vadd.f32 %v1408_v29, %v3099_v50  ;;  %v1410_v9 = vpop.f32.mrb[70].mxu1  ;;  %v2869_v50 = vld [vmem:[%s3495_s3 + $0x150] sm:$0xff]  }
 0x403   :  { %v1520_v36 = vadd.f32 %v3350_v4, %v1407_v12  ;;  %v1411_v32 = vadd.f32 %v1410_v9, %v3065_v33  ;;  %v1412_v11 = vpop.f32.mrb[71].mxu1  ;;  %2693 = vmatmul.mubr.bf16.vlgmr.msra.gmra.mrb[76].mxu1 %v1557_v10 }
 0x404   :  { %v1521_v55 = vadd.f32 %v3353_v8, %v1409_v48  ;;  %v1413_v13 = vadd.f32 %v1412_v11, %v3103_v54  ;;  %2725 = vmatpush3.bf16.msra.mxu1 %v2867_v30  ;;  %2717 = vmatmul.mubr.bf16.vlgmr.msra.gmra.mrb[76].mxu0 %v1561_v6 }
 0x405   :  { %v1523_v31 = vadd.f32 %v3350_v4, %v1411_v32  ;;  %2726 = vmatprep.subr.bf16.mxu1 %v2868_v57  ;;  %v1544_v33 = vmax.f32 %v1520_v36, 0.0 }
 0x406   :  { %v1524_v53 = vadd.f32 %v3353_v8, %v1413_v13  ;;  %v1545_v15 = vmax.f32 %v1521_v55, 0.0 }
 0x407   :  { %v1547_v34 = vmax.f32 %v1523_v31, 0.0  ;;  %v2670_v59 = vpop.f32.mrb[68].mxu0 }
 0x408   :  { %v1548_v40 = vmax.f32 %v1524_v53, 0.0  ;;  %v1468_v54 = vadd.f32 %v2670_v59, %v3093_v47  ;;  %v1459_v30 = vpop.f32.mrb[69].mxu0  ;;  %2727 = vmatpush3.bf16.msra.mxu1 %v2868_v57  ;;  %v1416_v25 = vpop.f32.mrb[72].mxu1  ;;  %v2875_v59 = vld [vmem:[%s3494_s0] sm:$0xff]  }
 0x409   :  { %v1460_v39 = vadd.f32 %v1459_v30, %v3085_v43  ;;  %v1417_v26 = vadd.f32 %v1416_v25, %v3069_v35  ;;  %v2671_v38 = vpop.f32.mrb[70].mxu0  ;;  %v1418_v42 = vpop.f32.mrb[73].mxu1  ;;  %2728 = vmatprep.subr.bf16.mxu1 %v2869_v50  ;;  %v1558_v28 = vpack.c.bf16 %v1547_v34, %v1544_v33  ;;  %v2873_v33 = vld [vmem:[%s3495_s3 + $0x170] sm:$0xff]  }
 0x40a   :  { %v1516_v18 = vadd.f32 %v3386_v14, %v1468_v54  ;;  %v1471_v41 = vadd.f32 %v2671_v38, %v3097_v49  ;;  %v1419_v47 = vadd.f32 %v1418_v42, %v3107_v60  ;;  %v1462_v21 = vpop.f32.mrb[71].mxu0  ;;  %v1420_v58 = vpop.f32.mrb[74].mxu1  ;;  %v1562_v61 = vpack.c.bf16 %v1548_v40, %v1545_v15 }
 0x40b   :  { %v1510_v43 = vadd.f32 %v3386_v14, %v1460_v39  ;;  %v1526_v35 = vadd.f32 %v3350_v4, %v1417_v26  ;;  %v1463_v44 = vadd.f32 %v1462_v21, %v3089_v45  ;;  %v1421_v2 = vadd.f32 %v1420_v58, %v3073_v37  ;;  %v1422_v20 = vpop.f32.mrb[75].mxu1  ;;  %2696 = vmatprep.mubr.bf16.mxu1 %v1558_v28  ;;  %v2871_v45 = vld [vmem:[%s3495_s3 + $0x160] sm:$0xff]  }
 0x40c   :  { %v1519_v22 = vadd.f32 %v3386_v14, %v1471_v41  ;;  %v1527_v51 = vadd.f32 %v3353_v8, %v1419_v47  ;;  %v1423_v49 = vadd.f32 %v1422_v20, %v3111_v0  ;;  %2729 = vmatpush3.bf16.msra.mxu1 %v2869_v50  ;;  %2720 = vmatprep.mubr.bf16.mxu0 %v1562_v61  ;;  %v1540_v37 = vmax.f32 %v1516_v18, 0.0 }
 0x40d   :  { %v1513_v60 = vadd.f32 %v3386_v14, %v1463_v44  ;;  %v1529_v27 = vadd.f32 %v3350_v4, %v1421_v2  ;;  %2730 = vmatprep.subr.bf16.mxu1 %v2870_v23  ;;  %v1534_v46 = vmax.f32 %v1510_v43, 0.0  ;;  %v1550_v7 = vmax.f32 %v1526_v35, 0.0 }
 0x40e   :  { %v1543_v5 = vmax.f32 %v1519_v22, 0.0  ;;  %v1530_v63 = vadd.f32 %v3353_v8, %v1423_v49  ;;  %v1551_v29 = vmax.f32 %v1527_v51, 0.0  ;;  %v2872_v8 = vld [vmem:[%s3495_s3 + $0x168] sm:$0xff]  }
 0x40f   :  { %v1537_v16 = vmax.f32 %v1513_v60, 0.0  ;;  %v1553_v10 = vmax.f32 %v1529_v27, 0.0  ;;  %v2674_v0 = vpop.f32.mrb[72].mxu0 }
 0x410   :  { %v1565_v12 = vpack.c.bf16 %v1543_v5, %v1540_v37  ;;  %v1554_v57 = vmax.f32 %v1530_v63, 0.0  ;;  %v1484_v6 = vadd.f32 %v2674_v0, %v3109_v62  ;;  %v1475_v4 = vpop.f32.mrb[73].mxu0  ;;  %2731 = vmatpush3.bf16.msra.mxu1 %v2870_v23 }
 0x411   :  { %v1476_v48 = vadd.f32 %v1475_v4, %v3101_v52  ;;  %v2675_v9 = vpop.f32.mrb[74].mxu0  ;;  %2732 = vmatprep.subr.bf16.mxu1 %v2871_v45  ;;  %v1559_v36 = vpack.c.bf16 %v1553_v10, %v1550_v7  ;;  %v1564_v32 = vpack.c.bf16 %v1537_v16, %v1534_v46  ;;  %v2876_v16 = vld [vmem:[%s3494_s0 + $0x8] sm:$0xff]   ;;  %v2877_v4 = vld [vmem:[%s3494_s0 + $0x10] sm:$0xff]  }
 0x412   :  { %v1528_v11 = vadd.f32 %v3386_v14, %v1484_v6  ;;  %v1487_v55 = vadd.f32 %v2675_v9, %v3113_v3  ;;  %v1478_v13 = vpop.f32.mrb[75].mxu0  ;;  %v1563_v31 = vpack.c.bf16 %v1554_v57, %v1551_v29  ;;  %v2415_v9 = vld [vmem:[%s3496_s5 + $0x6] sm:$0x7] }
 0x413   :  { %v1522_v62 = vadd.f32 %v3386_v14, %v1476_v48  ;;  %v1479_v50 = vadd.f32 %v1478_v13, %v3105_v56  ;;  %2697 = vmatmul.mubr.bf16.gmra.mrb[80].mxu1 %v1559_v36  ;;  %v2878_v48 = vld [vmem:[%s3494_s0 + $0x18] sm:$0xff]   ;;  %v2114_v36 = vrot.slane %v2415_v9, %v3214_v17 }
 0x414   :  { %v1531_v52 = vadd.f32 %v3386_v14, %v1487_v55  ;;  %2733 = vmatpush3.bf16.msra.mxu1 %v2871_v45  ;;  %2721 = vmatmul.mubr.bf16.gmra.mrb[80].mxu0 %v1563_v31  ;;  %v1552_v3 = vmax.f32 %v1528_v11, 0.0 }
 0x415   :  { %v1525_v53 = vadd.f32 %v3386_v14, %v1479_v50  ;;  %2740 = vmatprep.mubr.bf16.mxu1 %v1564_v32  ;;  %2734 = vmatprep.subr.bf16.mxu1 %v2872_v8  ;;  %v1546_v56 = vmax.f32 %v1522_v62, 0.0  ;;  %v2874_v14 = vld [vmem:[%s3495_s3 + $0x178] sm:$0xff]  }
 0x416   :  { %v1555_v34 = vmax.f32 %v1531_v52, 0.0  ;;  %2756 = vmatprep.mubr.msk.bf16.mxu0 %vm723_vm1, %v2875_v59 }
 0x417   :  { %v1549_v15 = vmax.f32 %v1525_v53, 0.0 }
 0x418   :  { %2735 = vmatpush3.bf16.msra.mxu1 %v2872_v8  ;;  %v1567_v40 = vpack.c.bf16 %v1555_v34, %v1552_v3 }
 0x419   :  { %2736 = vmatprep.subr.bf16.mxu1 %v2873_v33  ;;  %v1566_v54 = vpack.c.bf16 %v1549_v15, %v1546_v56 }
 0x41c   :  { %2737 = vmatpush3.bf16.msra.mxu1 %v2873_v33 }
 0x41d   :  { %2738 = vmatprep.subr.bf16.mxu1 %v2874_v14 }
 0x420   :  { %2739 = vmatpush3.bf16.msra.mxu1 %v2874_v14 }
 0x423   :  { %2741 = vmatmul.mubr.bf16.vlgmr.msra.gmra.mrb[84].mxu1 %v1565_v12 }
 0x424   :  { %2744 = vmatprep.mubr.bf16.mxu1 %v1566_v54 }
 0x42b   :  { %2745 = vmatmul.mubr.bf16.gmra.mrb[88].mxu1 %v1567_v40 }
 0x42c   :  { %2002 = vmatprep.mubr.bf16.mxu1 %v2879_v1 }
 0x4d6   :  { %v2694_v30 = vpop.f32.mrb[76].mxu1 }
 0x4d7   :  { %v1667_v25 = vpop.f32.mrb[77].mxu1  ;;  %v2718_v39 = vpop.f32.mrb[76].mxu0 }
 0x4d8   :  { %v2695_v26 = vpop.f32.mrb[78].mxu1  ;;  %v1801_v38 = vpop.f32.mrb[77].mxu0 }
 0x4d9   :  { %v1699_v42 = vpack.c.bf16 %v2695_v26, %v2694_v30  ;;  %v1670_v28 = vpop.f32.mrb[79].mxu1  ;;  %v2719_v23 = vpop.f32.mrb[78].mxu0 }
 0x4da   :  { %v1698_v18 = vpack.c.bf16 %v1670_v28, %v1667_v25  ;;  %v1833_v41 = vpack.c.bf16 %v2719_v23, %v2718_v39  ;;  %v1804_v47 = vpop.f32.mrb[79].mxu0 }
 0x4db   :  { %v1832_v21 = vpack.c.bf16 %v1804_v47, %v1801_v38 }
 0x4dd   :  { %1970 = vmatprep.subr.bf16.mxu1 %v1832_v21 }
 0x4de   :  { %1971 = vmatpush1.bf16.msra.mxu1 %v1698_v18 }
 0x4df   :  { %1972 = vmatprep.subr.bf16.mxu1 %v1833_v41 }
 0x4e2   :  { %1973 = vmatpush1.bf16.msra.mxu1 %v1699_v42 }
 0x4e6   :  { %v2698_v58 = vpop.f32.mrb[80].mxu1 }
 0x4e7   :  { %v1683_v61 = vpop.f32.mrb[81].mxu1  ;;  %v2722_v43 = vpop.f32.mrb[80].mxu0 }
 0x4e8   :  { %v2699_v35 = vpop.f32.mrb[82].mxu1  ;;  %v1817_v44 = vpop.f32.mrb[81].mxu0 }
 0x4e9   :  { %v1701_v2 = vpack.c.bf16 %v2699_v35, %v2698_v58  ;;  %v1686_v20 = vpop.f32.mrb[83].mxu1  ;;  %v2723_v22 = vpop.f32.mrb[82].mxu0 }
 0x4ea   :  { %v1700_v51 = vpack.c.bf16 %v1686_v20, %v1683_v61  ;;  %v1835_v49 = vpack.c.bf16 %v2723_v22, %v2722_v43  ;;  %v1820_v60 = vpop.f32.mrb[83].mxu0 }
 0x4eb   :  { %v1834_v27 = vpack.c.bf16 %v1820_v60, %v1817_v44 }
 0x4ed   :  { %1974 = vmatprep.subr.bf16.mxu1 %v1834_v27 }
 0x4ee   :  { %1975 = vmatpush1.bf16.msra.mxu1 %v1700_v51 }
 0x4ef   :  { %1976 = vmatprep.subr.bf16.mxu1 %v1835_v49 }
 0x4f2   :  { %1977 = vmatpush1.bf16.msra.mxu1 %v1701_v2  ;;  %v2122_v2 = vrot.slane %v2415_v9, %v3201_v24 }
 0x4f5   :  { %2407 = vmatmul.mubr.msk.bf16.vlgmr.msra.gmra.mrb[12].mxu1 %vm723_vm1, %v2875_v59 }
 0x4f6   :  { %v2742_v45 = vpop.f32.mrb[84].mxu1  ;;  %2012 = vmatprep.mubr.bf16.mxu1 %v2879_v1 }
 0x4f7   :  { %v1935_v37 = vpop.f32.mrb[85].mxu1 }
 0x4f8   :  { %v2743_v5 = vpop.f32.mrb[86].mxu1 }
 0x4f9   :  { %v1967_v63 = vpack.c.bf16 %v2743_v5, %v2742_v45  ;;  %v1938_v46 = vpop.f32.mrb[87].mxu1 }
 0x4fa   :  { %v1966_v7 = vpack.c.bf16 %v1938_v46, %v1935_v37 }
 0x4fc   :  { %2748 = vmatprep.subr.bf16.mxu0 %v1966_v7 }
 0x4fd   :  { %2749 = vmatpush3.bf16.msra.mxu0 %v1966_v7  ;;  %2408 = vmatmul.mubr.msk.bf16.gmra.mrb[16].mxu1 %vm723_vm1, %v2876_v16 }
 0x4fe   :  { %v2746_v10 = vpop.f32.mrb[88].mxu1  ;;  %2750 = vmatprep.subr.bf16.mxu0 %v1967_v63  ;;  %2022 = vmatprep.mubr.bf16.mxu1 %v2879_v1 }
 0x4ff   :  { %v1951_v0 = vpop.f32.mrb[89].mxu1 }
 0x500   :  { %v2747_v12 = vpop.f32.mrb[90].mxu1 }
 0x501   :  { %v1969_v29 = vpack.c.bf16 %v2747_v12, %v2746_v10  ;;  %v1954_v57 = vpop.f32.mrb[91].mxu1  ;;  %2751 = vmatpush3.bf16.msra.mxu0 %v1967_v63 }
 0x502   :  { %v1968_v6 = vpack.c.bf16 %v1954_v57, %v1951_v0 }
 0x504   :  { %2752 = vmatprep.subr.bf16.mxu0 %v1968_v6 }
 0x505   :  { %2753 = vmatpush3.bf16.msra.mxu0 %v1968_v6  ;;  %2409 = vmatmul.mubr.msk.bf16.gmra.mrb[20].mxu1 %vm723_vm1, %v2877_v4 }
 0x506   :  { %2754 = vmatprep.subr.bf16.mxu0 %v1969_v29  ;;  %2032 = vmatprep.mubr.bf16.mxu1 %v2879_v1  ;;  %v3456_v1 = vrot.slane %v2415_v9, %v3217_v19 }
 0x509   :  { %2755 = vmatpush3.bf16.msra.mxu0 %v1969_v29 }
 0x50c   :  { %2757 = vmatmul.mubr.msk.bf16.vlgmr.msra.gmra.mrb[36].mxu0 %vm723_vm1, %v2876_v16 }
 0x50d   :  { %2410 = vmatmul.mubr.msk.bf16.gmra.mrb[24].mxu1 %vm723_vm1, %v2878_v48  ;;  %2760 = vmatprep.mubr.msk.bf16.mxu0 %vm723_vm1, %v2877_v4 }
 0x514   :  { %2761 = vmatmul.mubr.msk.bf16.gmra.mrb[40].mxu0 %vm723_vm1, %v2878_v48 }
 0x5c8   :  { %v2004_v32 = vpop.f32.mrb[12].mxu1 }
 0x5c9   :  { %v2126_v8 = vadd.f32 %v2114_v36, %v2004_v32  ;;  %v2006_v11 = vpop.f32.mrb[13].mxu1 }
 0x5ca   :  { %v2127_v55 = vadd.f32 %v3456_v1, %v2006_v11  ;;  %v2008_v13 = vpop.f32.mrb[14].mxu1 }
 0x5cb   :  { %v2150_v31 = vmax.f32 %v2126_v8, 0.0  ;;  %v2129_v62 = vadd.f32 %v2114_v36, %v2008_v13  ;;  %v2010_v50 = vpop.f32.mrb[15].mxu1 }
 0x5cc   :  { %v2151_v52 = vmax.f32 %v2127_v55, 0.0  ;;  %v2130_v53 = vadd.f32 %v3456_v1, %v2010_v50 }
 0x5cd   :  { %v2153_v33 = vmax.f32 %v2129_v62, 0.0 }
 0x5ce   :  { %v2174_v3 = vadd.f32 %v2151_v52, %v2150_v31  ;;  %v2154_v34 = vmax.f32 %v2130_v53, 0.0 }
 0x5d0   :  { %v2175_v59 = vadd.f32 %v2154_v34, %v2153_v33  ;;  %v2014_v17 = vpop.f32.mrb[16].mxu1 }
 0x5d1   :  { %v2132_v56 = vadd.f32 %v2114_v36, %v2014_v17  ;;  %v2016_v19 = vpop.f32.mrb[17].mxu1 }
 0x5d2   :  { %v2133_v15 = vadd.f32 %v3456_v1, %v2016_v19  ;;  %v2018_v40 = vpop.f32.mrb[18].mxu1 }
 0x5d3   :  { %v2156_v14 = vmax.f32 %v2132_v56, 0.0  ;;  %v2135_v54 = vadd.f32 %v2114_v36, %v2018_v40  ;;  %v2020_v30 = vpop.f32.mrb[19].mxu1 }
 0x5d4   :  { %v2157_v25 = vmax.f32 %v2133_v15, 0.0  ;;  %v2136_v39 = vadd.f32 %v3456_v1, %v2020_v30 }
 0x5d5   :  { %v2159_v26 = vmax.f32 %v2135_v54, 0.0 }
 0x5d6   :  { %v2176_v38 = vadd.f32 %v2157_v25, %v2156_v14  ;;  %v2160_v42 = vmax.f32 %v2136_v39, 0.0 }
 0x5d8   :  { %v2177_v28 = vadd.f32 %v2160_v42, %v2159_v26  ;;  %v2024_v23 = vpop.f32.mrb[20].mxu1 }
 0x5d9   :  { %v2138_v18 = vadd.f32 %v2114_v36, %v2024_v23  ;;  %v2026_v41 = vpop.f32.mrb[21].mxu1 }
 0x5da   :  { %v2139_v47 = vadd.f32 %v3456_v1, %v2026_v41  ;;  %v2028_v21 = vpop.f32.mrb[22].mxu1 }
 0x5db   :  { %v2162_v58 = vmax.f32 %v2138_v18, 0.0  ;;  %v2141_v61 = vadd.f32 %v2114_v36, %v2028_v21  ;;  %v2030_v43 = vpop.f32.mrb[23].mxu1 }
 0x5dc   :  { %v2163_v35 = vmax.f32 %v2139_v47, 0.0  ;;  %v2142_v44 = vadd.f32 %v3456_v1, %v2030_v43 }
 0x5dd   :  { %v2165_v20 = vmax.f32 %v2141_v61, 0.0 }
 0x5de   :  { %v2178_v22 = vadd.f32 %v2163_v35, %v2162_v58  ;;  %v2166_v51 = vmax.f32 %v2142_v44, 0.0 }
 0x5df   :  { %v2758_v49 = vpop.f32.mrb[36].mxu0 }
 0x5e0   :  { %v2179_v60 = vadd.f32 %v2166_v51, %v2165_v20  ;;  %v2134_v27 = vadd.f32 %v2758_v49, %v2122_v2  ;;  %v2077_v45 = vpop.f32.mrb[37].mxu0  ;;  %v2034_v37 = vpop.f32.mrb[24].mxu1 }
 0x5e1   :  { %v2128_v5 = vadd.f32 %v2122_v2, %v2077_v45  ;;  %v2144_v63 = vadd.f32 %v2114_v36, %v2034_v37  ;;  %v2759_v46 = vpop.f32.mrb[38].mxu0  ;;  %v2036_v7 = vpop.f32.mrb[25].mxu1 }
 0x5e2   :  { %v2158_v16 = vmax.f32 %v2134_v27, 0.0  ;;  %v2137_v10 = vadd.f32 %v2759_v46, %v2122_v2  ;;  %v2145_v0 = vadd.f32 %v3456_v1, %v2036_v7  ;;  %v2080_v12 = vpop.f32.mrb[39].mxu0  ;;  %v2038_v29 = vpop.f32.mrb[26].mxu1 }
 0x5e3   :  { %v2152_v57 = vmax.f32 %v2128_v5, 0.0  ;;  %v2168_v24 = vmax.f32 %v2144_v63, 0.0  ;;  %v2131_v6 = vadd.f32 %v2122_v2, %v2080_v12  ;;  %v2147_v4 = vadd.f32 %v2114_v36, %v2038_v29  ;;  %v2040_v48 = vpop.f32.mrb[27].mxu1 }
 0x5e4   :  { %v2184_v9 = vadd.f32 %v2176_v38, %v2158_v16  ;;  %v2161_v32 = vmax.f32 %v2137_v10, 0.0  ;;  %v2169_v8 = vmax.f32 %v2145_v0, 0.0  ;;  %v2148_v11 = vadd.f32 %v3456_v1, %v2040_v48 }
 0x5e5   :  { %v2182_v55 = vadd.f32 %v2174_v3, %v2152_v57  ;;  %v2155_v13 = vmax.f32 %v2131_v6, 0.0  ;;  %v2171_v31 = vmax.f32 %v2147_v4, 0.0 }
 0x5e6   :  { %v2192_v62 = vmul.f32 0.33333334, %v2184_v9  ;;  %v2185_v50 = vadd.f32 %v2177_v28, %v2161_v32  ;;  %v2180_v52 = vadd.f32 %v2169_v8, %v2168_v24  ;;  %v2172_v53 = vmax.f32 %v2148_v11, 0.0 }
 0x5e7   :  { %v2190_v33 = vmul.f32 0.33333334, %v2182_v55  ;;  %v2183_v34 = vadd.f32 %v2175_v59, %v2155_v13  ;;  %v2762_v17 = vpop.f32.mrb[40].mxu0 }
 0x5e8   :  { %2200 = vst [vmem:[%s3497_s6 + $0x10] sm:$0xff] %v2192_v62  ;;  %v2193_v36 = vmul.f32 0.33333334, %v2185_v50  ;;  %v2181_v56 = vadd.f32 %v2172_v53, %v2171_v31  ;;  %v2146_v19 = vadd.f32 %v2762_v17, %v2122_v2  ;;  %v2093_v15 = vpop.f32.mrb[41].mxu0 }
 0x5e9   :  { %2198 = vst [vmem:[%s3497_s6] sm:$0xff] %v2190_v33  ;;  %v2191_v1 = vmul.f32 0.33333334, %v2183_v34  ;;  %v2140_v3 = vadd.f32 %v2122_v2, %v2093_v15  ;;  %v2763_v40 = vpop.f32.mrb[42].mxu0 }
 0x5ea   :  { %2201 = vst [vmem:[%s3497_s6 + $0x18] sm:$0xff] %v2193_v36  ;;  %v2170_v59 = vmax.f32 %v2146_v19, 0.0  ;;  %v2149_v14 = vadd.f32 %v2763_v40, %v2122_v2  ;;  %v2096_v54 = vpop.f32.mrb[43].mxu0 }
 0x5eb   :  { %2199 = vst [vmem:[%s3497_s6 + $0x8] sm:$0xff] %v2191_v1  ;;  %v2164_v30 = vmax.f32 %v2140_v3, 0.0  ;;  %v2143_v25 = vadd.f32 %v2122_v2, %v2096_v54 }
 0x5ec   :  { %v2188_v39 = vadd.f32 %v2180_v52, %v2170_v59  ;;  %v2173_v26 = vmax.f32 %v2149_v14, 0.0 }
 0x5ed   :  { %v2186_v38 = vadd.f32 %v2178_v22, %v2164_v30  ;;  %v2167_v42 = vmax.f32 %v2143_v25, 0.0 }
 0x5ee   :  { %v2196_v28 = vmul.f32 0.33333334, %v2188_v39  ;;  %v2189_v23 = vadd.f32 %v2181_v56, %v2173_v26 }
 0x5ef   :  { %v2194_v18 = vmul.f32 0.33333334, %v2186_v38  ;;  %v2187_v41 = vadd.f32 %v2179_v60, %v2167_v42 }
 0x5f0   :  { %2204 = vst [vmem:[%s3497_s6 + $0x30] sm:$0xff] %v2196_v28  ;;  %v2197_v47 = vmul.f32 0.33333334, %v2189_v23 }
 0x5f1   :  { %2202 = vst [vmem:[%s3497_s6 + $0x20] sm:$0xff] %v2194_v18  ;;  %v2195_v21 = vmul.f32 0.33333334, %v2187_v41 }
 0x5f2   :  { %2205 = vst [vmem:[%s3497_s6 + $0x38] sm:$0xff] %v2197_v47 }
 0x5f3   :  { %2203 = vst [vmem:[%s3497_s6 + $0x28] sm:$0xff] %v2195_v21 }

// kernel: forward.5
= control target key start
LH: loop header
LB: loop body
LE: loop exit
PB: predicated region body
PF: predicated region fallthrough
CT: control target
= control target key end

     0   :  { %vm327_vm0 = vcmask 7168   ;;  %s586_s1 = inlined_call_operand.vmem [shape: bf16[128,128], index: 1, kind: input, shape index: {}]   ;;  %s587_s0 = inlined_call_operand.vmem [shape: f32[64,128], index: 0, kind: input, shape index: {}]   ;;  %s588_s3 = inlined_call_operand.vmem [shape: bf16[128,1], index: 3, kind: input, shape index: {}]   ;;  %s589_s4 = inlined_call_operand.<no memory space> [shape: f32[1,1], index: 4, kind: input, shape index: {}]   ;;  %s590_s2 = inlined_call_operand.vmem [shape: f32[1,128], index: 2, kind: input, shape index: {}]   ;;  %s591_s5 = inlined_call_operand.vmem [shape: f32[64,1], index: 5, kind: output, shape index: {}]  }
   0x1   :  { %v430_v0 = vld [vmem:[%s586_s1] sm:$0xff]   ;;  %v431_v1 = vld [vmem:[%s586_s1 + $0x8] sm:$0xff]   ;;  %v432_v2 = vld [vmem:[%s586_s1 + $0x10] sm:$0xff]   ;;  %v10_v28 = vstv %s589_s4 }
   0x2   :  { %382 = vmatprep.subr.bf16.mxu0 %v430_v0  ;;  %v433_v3 = vld [vmem:[%s586_s1 + $0x18] sm:$0xff]   ;;  %v23_v4 = vld [vmem:[%s587_s0] sm:$0xff]  ;;  %v24_v5 = vld [vmem:[%s587_s0 + $0x8] sm:$0xff]  ;;  %11 = vst [vmem:[#allocation2] sm:$0x1] %v10_v28 }
   0x3   :  { %383 = vmatpush3.bf16.msra.mxu0 %v430_v0  ;;  %v31_v6 = vpack.c.bf16 %v24_v5, %v23_v4  ;;  %v434_v7 = vld [vmem:[%s586_s1 + $0x20] sm:$0xff]   ;;  %v439_v9 = vld [vmem:[%s588_s3 + $0x8] sm:$0xff]   ;;  %v440_v10 = vld [vmem:[%s588_s3 + $0x10] sm:$0xff]  }
   0x4   :  { %384 = vmatprep.subr.bf16.mxu0 %v431_v1  ;;  %v438_v8 = vld [vmem:[%s588_s3] sm:$0xff]   ;;  %v435_v11 = vld [vmem:[%s586_s1 + $0x28] sm:$0xff]   ;;  %v441_v12 = vld [vmem:[%s588_s3 + $0x18] sm:$0xff]  }
   0x5   :  { %398 = vmatprep.mubr.bf16.mxu0 %v31_v6  ;;  %406 = vmatprep.subr.bf16.mxu1 %v438_v8  ;;  %v436_v13 = vld [vmem:[%s586_s1 + $0x30] sm:$0xff]   ;;  %v442_v14 = vld [vmem:[%s588_s3 + $0x20] sm:$0xff]   ;;  %v437_v15 = vld [vmem:[%s586_s1 + $0x38] sm:$0xff]  }
   0x6   :  { %407 = vmatpush3.bf16.msra.mxu1 %v438_v8  ;;  %v25_v16 = vld [vmem:[%s587_s0 + $0x10] sm:$0xff]  ;;  %v26_v17 = vld [vmem:[%s587_s0 + $0x18] sm:$0xff]  ;;  %v443_v18 = vld [vmem:[%s588_s3 + $0x28] sm:$0xff]  }
   0x7   :  { %385 = vmatpush3.bf16.msra.mxu0 %v431_v1  ;;  %408 = vmatprep.subr.bf16.mxu1 %v439_v9  ;;  %v27_v19 = vld [vmem:[%s587_s0 + $0x20] sm:$0xff]  ;;  %v28_v20 = vld [vmem:[%s587_s0 + $0x28] sm:$0xff]  ;;  %v32_v21 = vpack.c.bf16 %v26_v17, %v25_v16  ;;  %v29_v23 = vld [vmem:[%s587_s0 + $0x30] sm:$0xff] }
   0x8   :  { %386 = vmatprep.subr.bf16.mxu0 %v432_v2  ;;  %v33_v22 = vpack.c.bf16 %v28_v20, %v27_v19  ;;  %v30_v24 = vld [vmem:[%s587_s0 + $0x38] sm:$0xff]  ;;  %v444_v26 = vld [vmem:[%s588_s3 + $0x30] sm:$0xff]   ;;  %v340_v29 = vld [vmem:[%s590_s2] ss:$0 sm:$0xff] }
   0x9   :  { %v34_v25 = vpack.c.bf16 %v30_v24, %v29_v23  ;;  %v445_v27 = vld [vmem:[%s588_s3 + $0x38] sm:$0xff]   ;;  %v349_v58 = vld [vmem:[#allocation2] ss:$0 sm:$0xff] }
   0xa   :  { %409 = vmatpush3.bf16.msra.mxu1 %v439_v9 }
   0xb   :  { %387 = vmatpush3.bf16.msra.mxu0 %v432_v2  ;;  %410 = vmatprep.subr.bf16.mxu1 %v440_v10 }
   0xc   :  { %388 = vmatprep.subr.bf16.mxu0 %v433_v3 }
   0xe   :  { %411 = vmatpush3.bf16.msra.mxu1 %v440_v10 }
   0xf   :  { %389 = vmatpush3.bf16.msra.mxu0 %v433_v3  ;;  %412 = vmatprep.subr.bf16.mxu1 %v441_v12 }
  0x10   :  { %390 = vmatprep.subr.bf16.mxu0 %v434_v7 }
  0x12   :  { %413 = vmatpush3.bf16.msra.mxu1 %v441_v12 }
  0x13   :  { %391 = vmatpush3.bf16.msra.mxu0 %v434_v7  ;;  %414 = vmatprep.subr.bf16.mxu1 %v442_v14 }
  0x14   :  { %392 = vmatprep.subr.bf16.mxu0 %v435_v11 }
  0x16   :  { %415 = vmatpush3.bf16.msra.mxu1 %v442_v14 }
  0x17   :  { %393 = vmatpush3.bf16.msra.mxu0 %v435_v11  ;;  %416 = vmatprep.subr.bf16.mxu1 %v443_v18 }
  0x18   :  { %394 = vmatprep.subr.bf16.mxu0 %v436_v13 }
  0x1a   :  { %417 = vmatpush3.bf16.msra.mxu1 %v443_v18 }
  0x1b   :  { %395 = vmatpush3.bf16.msra.mxu0 %v436_v13  ;;  %418 = vmatprep.subr.bf16.mxu1 %v444_v26 }
  0x1c   :  { %396 = vmatprep.subr.bf16.mxu0 %v437_v15 }
  0x1e   :  { %419 = vmatpush3.bf16.msra.mxu1 %v444_v26 }
  0x1f   :  { %397 = vmatpush3.bf16.msra.mxu0 %v437_v15  ;;  %420 = vmatprep.subr.bf16.mxu1 %v445_v27 }
  0x22   :  { %399 = vmatmul.mubr.bf16.vlgmr.msra.gmra.mrb[0].mxu0 %v32_v21  ;;  %421 = vmatpush3.bf16.msra.mxu1 %v445_v27 }
  0x23   :  { %402 = vmatprep.mubr.bf16.mxu0 %v33_v22 }
  0x2a   :  { %403 = vmatmul.mubr.bf16.gmra.mrb[4].mxu0 %v34_v25 }
  0xf5   :  { %v400_v30 = vpop.f32.mrb[0].mxu0 }
  0xf6   :  { %v149_v31 = vadd.f32 %v400_v30, %v340_v29  ;;  %v140_v32 = vpop.f32.mrb[1].mxu0 }
  0xf7   :  { %v141_v33 = vadd.f32 %v340_v29, %v140_v32  ;;  %v401_v34 = vpop.f32.mrb[2].mxu0 }
  0xf8   :  { %v152_v35 = vadd.f32 %v401_v34, %v340_v29  ;;  %v143_v36 = vpop.f32.mrb[3].mxu0  ;;  %v173_v38 = vmax.f32 %v149_v31, 0.0 }
  0xf9   :  { %v144_v37 = vadd.f32 %v340_v29, %v143_v36  ;;  %v171_v40 = vmax.f32 %v141_v33, 0.0 }
  0xfa   :  { %v174_v39 = vmax.f32 %v152_v35, 0.0 }
  0xfb   :  { %v172_v41 = vmax.f32 %v144_v37, 0.0 }
  0xfc   :  { %v180_v42 = vpack.c.bf16 %v174_v39, %v173_v38 }
  0xfd   :  { %v404_v43 = vpop.f32.mrb[4].mxu0  ;;  %v179_v44 = vpack.c.bf16 %v172_v41, %v171_v40 }
  0xfe   :  { %v165_v45 = vadd.f32 %v404_v43, %v340_v29  ;;  %v156_v46 = vpop.f32.mrb[5].mxu0 }
  0xff   :  { %v157_v47 = vadd.f32 %v340_v29, %v156_v46  ;;  %v405_v48 = vpop.f32.mrb[6].mxu0  ;;  %422 = vmatprep.mubr.bf16.mxu1 %v179_v44 }
 0x100   :  { %v168_v49 = vadd.f32 %v405_v48, %v340_v29  ;;  %v159_v50 = vpop.f32.mrb[7].mxu0  ;;  %423 = vmatmul.mubr.bf16.vlgmr.msra.gmra.mrb[0].mxu1 %v180_v42  ;;  %v177_v52 = vmax.f32 %v165_v45, 0.0 }
 0x101   :  { %v160_v51 = vadd.f32 %v340_v29, %v159_v50  ;;  %v175_v54 = vmax.f32 %v157_v47, 0.0 }
 0x102   :  { %v178_v53 = vmax.f32 %v168_v49, 0.0 }
 0x103   :  { %v176_v55 = vmax.f32 %v160_v51, 0.0 }
 0x104   :  { %v182_v56 = vpack.c.bf16 %v178_v53, %v177_v52 }
 0x105   :  { %v181_v57 = vpack.c.bf16 %v176_v55, %v175_v54 }
 0x107   :  { %426 = vmatprep.mubr.bf16.mxu1 %v181_v57 }
 0x108   :  { %427 = vmatmul.mubr.bf16.gmra.mrb[4].mxu1 %v182_v56 }
 0x1d3   :  { %v424_v59 = vpop.f32.mrb[0].mxu1 }
 0x1d4   :  { %v297_v60 = vadd.f32 %v424_v59, %v349_v58  ;;  %v288_v61 = vpop.f32.mrb[1].mxu1 }
 0x1d5   :  { %v289_v62 = vadd.f32 %v349_v58, %v288_v61  ;;  %v425_v63 = vpop.f32.mrb[2].mxu1 }
 0x1d6   :  { %v321_v0 = vmax.f32 %v297_v60, 0.0  ;;  %v300_v1 = vadd.f32 %v425_v63, %v349_v58  ;;  %v291_v2 = vpop.f32.mrb[3].mxu1 }
 0x1d7   :  { %v319_v3 = vmax.f32 %v289_v62, 0.0  ;;  %v292_v4 = vadd.f32 %v349_v58, %v291_v2 }
 0x1d8   :  { %330 = vst.msk [vmem:[%s591_s5 + $0x10] sm:$0xff] %vm327_vm0, %v321_v0  ;;  %v322_v5 = vmax.f32 %v300_v1, 0.0 }
 0x1d9   :  { %328 = vst.msk [vmem:[%s591_s5] sm:$0xff] %vm327_vm0, %v319_v3  ;;  %v320_v6 = vmax.f32 %v292_v4, 0.0 }
 0x1da   :  { %331 = vst.msk [vmem:[%s591_s5 + $0x18] sm:$0xff] %vm327_vm0, %v322_v5 }
 0x1db   :  { %329 = vst.msk [vmem:[%s591_s5 + $0x8] sm:$0xff] %vm327_vm0, %v320_v6  ;;  %v428_v7 = vpop.f32.mrb[4].mxu1 }
 0x1dc   :  { %v313_v8 = vadd.f32 %v428_v7, %v349_v58  ;;  %v304_v9 = vpop.f32.mrb[5].mxu1 }
 0x1dd   :  { %v305_v10 = vadd.f32 %v349_v58, %v304_v9  ;;  %v429_v11 = vpop.f32.mrb[6].mxu1 }
 0x1de   :  { %v325_v12 = vmax.f32 %v313_v8, 0.0  ;;  %v316_v13 = vadd.f32 %v429_v11, %v349_v58  ;;  %v307_v14 = vpop.f32.mrb[7].mxu1 }
 0x1df   :  { %v323_v15 = vmax.f32 %v305_v10, 0.0  ;;  %v308_v16 = vadd.f32 %v349_v58, %v307_v14 }
 0x1e0   :  { %334 = vst.msk [vmem:[%s591_s5 + $0x30] sm:$0xff] %vm327_vm0, %v325_v12  ;;  %v326_v17 = vmax.f32 %v316_v13, 0.0 }
 0x1e1   :  { %332 = vst.msk [vmem:[%s591_s5 + $0x20] sm:$0xff] %vm327_vm0, %v323_v15  ;;  %v324_v18 = vmax.f32 %v308_v16, 0.0 }
 0x1e2   :  { %335 = vst.msk [vmem:[%s591_s5 + $0x38] sm:$0xff] %vm327_vm0, %v326_v17 }
 0x1e3   :  { %333 = vst.msk [vmem:[%s591_s5 + $0x28] sm:$0xff] %vm327_vm0, %v324_v18 }

// kernel: forward.4
= control target key start
LH: loop header
LB: loop body
LE: loop exit
PB: predicated region body
PF: predicated region fallthrough
CT: control target
= control target key end

     0   :  { %v4552_v1 = vmov 0   ;;  %vm1270_vm0 = vcmask 523264   ;;  %s4545_s4 = inlined_call_operand.vmem [shape: bf16[128,1152], index: 4, kind: input, shape index: {}]   ;;  %s4546_s1 = inlined_call_operand.vmem [shape: f32[64,128], index: 1, kind: input, shape index: {}]   ;;  %s4547_s2 = inlined_call_operand.vmem [shape: bf16[3,128,128], index: 2, kind: input, shape index: {}]   ;;  %s4548_s0 = inlined_call_operand.vmem [shape: bf16[64,64], index: 0, kind: input, shape index: {}]   ;;  %s4549_s3 = inlined_call_operand.vmem [shape: bf16[2,3,128,128], index: 3, kind: input, shape index: {}]   ;;  %s4550_s5 = inlined_call_operand.vmem [shape: f32[3,1,384], index: 5, kind: input, shape index: {}]   ;;  %s4551_s6 = inlined_call_operand.vmem [shape: f32[64,128], index: 6, kind: output, shape index: {}]  }
   0x1   :  { %v3516_v0 = vld [vmem:[%s4545_s4 + $0x4] ss:$36 sps:$4 sm:$0xff]   ;;  %524 = vmatprep.mubr.bf16.mxu0 %v4552_v1  ;;  %597 = vmatprep.mubr.bf16.mxu1 %v4552_v1  ;;  %v3518_v2 = vld [vmem:[%s4545_s4 + $0xc] ss:$36 sps:$4 sm:$0xff]   ;;  %v3524_v6 = vld [vmem:[%s4545_s4 + $0x54] ss:$36 sps:$4 sm:$0xff]  }
   0x2   :  { %492 = vmatprep.subr.bf16.mxu0 %v3516_v0  ;;  %v3520_v3 = vld [vmem:[%s4545_s4] ss:$36 sps:$4 sm:$0xff]   ;;  %v3521_v4 = vld [vmem:[%s4545_s4 + $0x8] ss:$36 sps:$4 sm:$0xff]   ;;  %565 = vmatprep.subr.bf16.mxu1 %v3518_v2  ;;  %v3527_v8 = vld [vmem:[%s4545_s4 + $0x50] ss:$36 sps:$4 sm:$0xff]  }
   0x3   :  { %v3522_v5 = vld [vmem:[%s4545_s4 + $0x4c] ss:$36 sps:$4 sm:$0xff]   ;;  %493 = vmatpush1.bf16.msra.mxu0 %v3520_v3  ;;  %566 = vmatpush1.bf16.msra.mxu1 %v3521_v4  ;;  %v3528_v9 = vld [vmem:[%s4545_s4 + $0x94] ss:$36 sps:$4 sm:$0xff]   ;;  %v3530_v10 = vld [vmem:[%s4545_s4 + $0x9c] ss:$36 sps:$4 sm:$0xff]  }
   0x4   :  { %v3526_v7 = vld [vmem:[%s4545_s4 + $0x48] ss:$36 sps:$4 sm:$0xff]   ;;  %494 = vmatprep.subr.bf16.mxu0 %v3522_v5  ;;  %567 = vmatprep.subr.bf16.mxu1 %v3524_v6  ;;  %v3532_v11 = vld [vmem:[%s4545_s4 + $0x90] ss:$36 sps:$4 sm:$0xff]   ;;  %v3533_v12 = vld [vmem:[%s4545_s4 + $0x98] ss:$36 sps:$4 sm:$0xff]  }
   0x5   :  { %v3534_v13 = vld [vmem:[%s4545_s4 + $0xdc] ss:$36 sps:$4 sm:$0xff]   ;;  %v3536_v14 = vld [vmem:[%s4545_s4 + $0xe4] ss:$36 sps:$4 sm:$0xff]   ;;  %v3542_v18 = vld [vmem:[%s4545_s4 + $0x12c] ss:$36 sps:$4 sm:$0xff]  }
   0x6   :  { %v3538_v15 = vld [vmem:[%s4545_s4 + $0xd8] ss:$36 sps:$4 sm:$0xff]   ;;  %v3539_v16 = vld [vmem:[%s4545_s4 + $0xe0] ss:$36 sps:$4 sm:$0xff]   ;;  %v3545_v20 = vld [vmem:[%s4545_s4 + $0x128] ss:$36 sps:$4 sm:$0xff]  }
   0x7   :  { %495 = vmatpush1.bf16.msra.mxu0 %v3526_v7  ;;  %568 = vmatpush1.bf16.msra.mxu1 %v3527_v8  ;;  %v3540_v17 = vld [vmem:[%s4545_s4 + $0x124] ss:$36 sps:$4 sm:$0xff]   ;;  %v3546_v21 = vld [vmem:[%s4545_s4 + $0x16c] ss:$36 sps:$4 sm:$0xff]   ;;  %v3548_v22 = vld [vmem:[%s4545_s4 + $0x174] ss:$36 sps:$4 sm:$0xff]  }
   0x8   :  { %496 = vmatprep.subr.bf16.mxu0 %v3528_v9  ;;  %569 = vmatprep.subr.bf16.mxu1 %v3530_v10  ;;  %v3544_v19 = vld [vmem:[%s4545_s4 + $0x120] ss:$36 sps:$4 sm:$0xff]   ;;  %v3550_v23 = vld [vmem:[%s4545_s4 + $0x168] ss:$36 sps:$4 sm:$0xff]   ;;  %v3551_v24 = vld [vmem:[%s4545_s4 + $0x170] ss:$36 sps:$4 sm:$0xff]  }
   0x9   :  { %v3552_v25 = vld [vmem:[%s4545_s4 + $0x1b4] ss:$36 sps:$4 sm:$0xff]   ;;  %v3554_v26 = vld [vmem:[%s4545_s4 + $0x1bc] ss:$36 sps:$4 sm:$0xff]   ;;  %v3560_v30 = vld [vmem:[%s4545_s4 + $0x204] ss:$36 sps:$4 sm:$0xff]  }
   0xa   :  { %v3556_v27 = vld [vmem:[%s4545_s4 + $0x1b0] ss:$36 sps:$4 sm:$0xff]   ;;  %v3557_v28 = vld [vmem:[%s4545_s4 + $0x1b8] ss:$36 sps:$4 sm:$0xff]   ;;  %v3563_v32 = vld [vmem:[%s4545_s4 + $0x200] ss:$36 sps:$4 sm:$0xff]  }
   0xb   :  { %497 = vmatpush1.bf16.msra.mxu0 %v3532_v11  ;;  %570 = vmatpush1.bf16.msra.mxu1 %v3533_v12  ;;  %v3558_v29 = vld [vmem:[%s4545_s4 + $0x1fc] ss:$36 sps:$4 sm:$0xff]   ;;  %v33_v34 = vld [vmem:[%s4546_s1 + $0x8] sm:$0xff]  ;;  %v3566_v35 = vld [vmem:[%s4545_s4 + $0x14] ss:$36 sps:$4 sm:$0xff]  }
   0xc   :  { %498 = vmatprep.subr.bf16.mxu0 %v3534_v13  ;;  %571 = vmatprep.subr.bf16.mxu1 %v3536_v14  ;;  %v3562_v31 = vld [vmem:[%s4545_s4 + $0x1f8] ss:$36 sps:$4 sm:$0xff]   ;;  %v32_v33 = vld [vmem:[%s4546_s1] sm:$0xff]  ;;  %v3564_v38 = vld [vmem:[%s4545_s4 + $0x10] ss:$36 sps:$4 sm:$0xff]  }
   0xd   :  { %v3569_v36 = vld [vmem:[%s4545_s4 + $0x1c] ss:$36 sps:$4 sm:$0xff]   ;;  %v3845_v37 = vpack.c.bf16 %v33_v34, %v32_v33  ;;  %v3575_v41 = vld [vmem:[%s4545_s4 + $0x64] ss:$36 sps:$4 sm:$0xff]   ;;  %v34_v44 = vld [vmem:[%s4546_s1 + $0x10] sm:$0xff] }
   0xe   :  { %v3567_v39 = vld [vmem:[%s4545_s4 + $0x18] ss:$36 sps:$4 sm:$0xff]   ;;  %v3573_v43 = vld [vmem:[%s4545_s4 + $0x60] ss:$36 sps:$4 sm:$0xff]   ;;  %v3581_v47 = vld [vmem:[%s4545_s4 + $0xac] ss:$36 sps:$4 sm:$0xff]  }
   0xf   :  { %499 = vmatpush1.bf16.msra.mxu0 %v3538_v15  ;;  %572 = vmatpush1.bf16.msra.mxu1 %v3539_v16  ;;  %v3572_v40 = vld [vmem:[%s4545_s4 + $0x5c] ss:$36 sps:$4 sm:$0xff]   ;;  %v3578_v46 = vld [vmem:[%s4545_s4 + $0xa4] ss:$36 sps:$4 sm:$0xff]   ;;  %v3584_v51 = vld [vmem:[%s4545_s4 + $0xec] ss:$36 sps:$4 sm:$0xff]  }
  0x10   :  { %500 = vmatprep.subr.bf16.mxu0 %v3540_v17  ;;  %573 = vmatprep.subr.bf16.mxu1 %v3542_v18  ;;  %v3570_v42 = vld [vmem:[%s4545_s4 + $0x58] ss:$36 sps:$4 sm:$0xff]   ;;  %v3576_v49 = vld [vmem:[%s4545_s4 + $0xa0] ss:$36 sps:$4 sm:$0xff]   ;;  %v3579_v50 = vld [vmem:[%s4545_s4 + $0xa8] ss:$36 sps:$4 sm:$0xff]  }
  0x11   :  { %v35_v45 = vld [vmem:[%s4546_s1 + $0x18] sm:$0xff]  ;;  %v3582_v53 = vld [vmem:[%s4545_s4 + $0xe8] ss:$36 sps:$4 sm:$0xff]   ;;  %v3585_v54 = vld [vmem:[%s4545_s4 + $0xf0] ss:$36 sps:$4 sm:$0xff]  }
  0x12   :  { %v3881_v48 = vpack.c.bf16 %v35_v45, %v34_v44  ;;  %v3587_v52 = vld [vmem:[%s4545_s4 + $0xf4] ss:$36 sps:$4 sm:$0xff]   ;;  %v36_v55 = vld [vmem:[%s4546_s1 + $0x20] sm:$0xff]  ;;  %v37_v56 = vld [vmem:[%s4546_s1 + $0x28] sm:$0xff] }
  0x13   :  { %501 = vmatpush1.bf16.msra.mxu0 %v3544_v19  ;;  %574 = vmatpush1.bf16.msra.mxu1 %v3545_v20  ;;  %v3590_v57 = vld [vmem:[%s4545_s4 + $0x134] ss:$36 sps:$4 sm:$0xff]   ;;  %v3593_v58 = vld [vmem:[%s4545_s4 + $0x13c] ss:$36 sps:$4 sm:$0xff]   ;;  %v3920_v60 = vpack.c.bf16 %v37_v56, %v36_v55  ;;  %v3599_v63 = vld [vmem:[%s4545_s4 + $0x184] ss:$36 sps:$4 sm:$0xff]  }
  0x14   :  { %502 = vmatprep.subr.bf16.mxu0 %v3546_v21  ;;  %575 = vmatprep.subr.bf16.mxu1 %v3548_v22  ;;  %v3588_v59 = vld [vmem:[%s4545_s4 + $0x130] ss:$36 sps:$4 sm:$0xff]   ;;  %v3591_v61 = vld [vmem:[%s4545_s4 + $0x138] ss:$36 sps:$4 sm:$0xff]   ;;  %v3597_v2 = vld [vmem:[%s4545_s4 + $0x180] ss:$36 sps:$4 sm:$0xff]  }
  0x15   :  { %v3596_v62 = vld [vmem:[%s4545_s4 + $0x17c] ss:$36 sps:$4 sm:$0xff]   ;;  %v38_v3 = vld [vmem:[%s4546_s1 + $0x30] sm:$0xff]  ;;  %v3602_v5 = vld [vmem:[%s4545_s4 + $0x1c4] ss:$36 sps:$4 sm:$0xff]  }
  0x16   :  { %v3594_v0 = vld [vmem:[%s4545_s4 + $0x178] ss:$36 sps:$4 sm:$0xff]   ;;  %v3605_v6 = vld [vmem:[%s4545_s4 + $0x1cc] ss:$36 sps:$4 sm:$0xff]   ;;  %v3600_v7 = vld [vmem:[%s4545_s4 + $0x1c0] ss:$36 sps:$4 sm:$0xff]  }
  0x17   :  { %503 = vmatpush1.bf16.msra.mxu0 %v3550_v23  ;;  %576 = vmatpush1.bf16.msra.mxu1 %v3551_v24  ;;  %v39_v4 = vld [vmem:[%s4546_s1 + $0x38] sm:$0xff]  ;;  %v3603_v9 = vld [vmem:[%s4545_s4 + $0x1c8] ss:$36 sps:$4 sm:$0xff]   ;;  %v3609_v13 = vld [vmem:[%s4545_s4 + $0x210] ss:$36 sps:$4 sm:$0xff]  }
  0x18   :  { %504 = vmatprep.subr.bf16.mxu0 %v3552_v25  ;;  %577 = vmatprep.subr.bf16.mxu1 %v3554_v26  ;;  %v3956_v8 = vpack.c.bf16 %v39_v4, %v38_v3  ;;  %v3608_v10 = vld [vmem:[%s4545_s4 + $0x20c] ss:$36 sps:$4 sm:$0xff]   ;;  %v3611_v11 = vld [vmem:[%s4545_s4 + $0x214] ss:$36 sps:$4 sm:$0xff]   ;;  %v3612_v14 = vld [vmem:[%s4545_s4 + $0x20] ss:$36 sps:$4 sm:$0xff]  }
  0x19   :  { %v3606_v12 = vld [vmem:[%s4545_s4 + $0x208] ss:$36 sps:$4 sm:$0xff]   ;;  %v3613_v15 = vld [vmem:[%s4547_s2] sm:$0xff]   ;;  %v3616_v18 = vld [vmem:[%s4545_s4 + $0xb0] ss:$36 sps:$4 sm:$0xff]  }
  0x1a   :  { %v3614_v16 = vld [vmem:[%s4545_s4 + $0x68] ss:$36 sps:$4 sm:$0xff]   ;;  %v3617_v19 = vld [vmem:[%s4547_s2 + $0x10] sm:$0xff]   ;;  %v3618_v20 = vld [vmem:[%s4545_s4 + $0xf8] ss:$36 sps:$4 sm:$0xff]  }
  0x1b   :  { %505 = vmatpush1.bf16.msra.mxu0 %v3556_v27  ;;  %578 = vmatpush1.bf16.msra.mxu1 %v3557_v28  ;;  %v3615_v17 = vld [vmem:[%s4547_s2 + $0x8] sm:$0xff]   ;;  %v3619_v21 = vld [vmem:[%s4547_s2 + $0x18] sm:$0xff]   ;;  %v3620_v22 = vld [vmem:[%s4545_s4 + $0x140] ss:$36 sps:$4 sm:$0xff]  }
  0x1c   :  { %506 = vmatprep.subr.bf16.mxu0 %v3558_v29  ;;  %579 = vmatprep.subr.bf16.mxu1 %v3560_v30  ;;  %v3621_v23 = vld [vmem:[%s4547_s2 + $0x20] sm:$0xff]   ;;  %v3622_v24 = vld [vmem:[%s4545_s4 + $0x188] ss:$36 sps:$4 sm:$0xff]   ;;  %v3624_v26 = vld [vmem:[%s4545_s4 + $0x1d0] ss:$36 sps:$4 sm:$0xff]  }
  0x1d   :  { %v3623_v25 = vld [vmem:[%s4547_s2 + $0x28] sm:$0xff]   ;;  %v3625_v27 = vld [vmem:[%s4547_s2 + $0x30] sm:$0xff]   ;;  %v3626_v28 = vld [vmem:[%s4545_s4 + $0x218] ss:$36 sps:$4 sm:$0xff]  }
  0x1e   :  { %v3627_v29 = vld [vmem:[%s4547_s2 + $0x38] sm:$0xff]   ;;  %v3628_v30 = vld [vmem:[%s4547_s2 + $0x40] sm:$0xff]   ;;  %v3631_v33 = vld [vmem:[%s4547_s2 + $0x88] sm:$0xff]  }
  0x1f   :  { %507 = vmatpush1.bf16.msra.mxu0 %v3562_v31  ;;  %580 = vmatpush1.bf16.msra.mxu1 %v3563_v32  ;;  %v3629_v31 = vld [vmem:[%s4547_s2 + $0x80] sm:$0xff]   ;;  %v3630_v32 = vld [vmem:[%s4547_s2 + $0x48] sm:$0xff]   ;;  %v3632_v34 = vld [vmem:[%s4547_s2 + $0x50] sm:$0xff]  }
  0x20   :  { %638 = vmatprep.subr.bf16.mxu0 %v3566_v35  ;;  %711 = vmatprep.subr.bf16.mxu1 %v3569_v36  ;;  %v3633_v35 = vld [vmem:[%s4547_s2 + $0x90] sm:$0xff]   ;;  %v3634_v36 = vld [vmem:[%s4547_s2 + $0x58] sm:$0xff]  }
  0x21   :  { %v3642_v44 = vld [vmem:[%s4547_s2 + $0x78] sm:$0xff]  }
  0x22   :  { %525 = vmatmul.mubr.bf16.vlgmr.msra.gmra.mrb[0].mxu0 %v3845_v37  ;;  %598 = vmatmul.mubr.bf16.vlgmr.msra.gmra.mrb[0].mxu1 %v3845_v37  ;;  %v3643_v45 = vld [vmem:[%s4547_s2 + $0xb8] sm:$0xff]  }
  0x23   :  { %639 = vmatpush1.bf16.msra.mxu0 %v3564_v38  ;;  %712 = vmatpush1.bf16.msra.mxu1 %v3567_v39  ;;  %v3635_v38 = vld [vmem:[%s4547_s2 + $0x98] sm:$0xff]   ;;  %v3636_v39 = vld [vmem:[%s4547_s2 + $0x60] sm:$0xff]  }
  0x24   :  { %640 = vmatprep.subr.bf16.mxu0 %v3572_v40  ;;  %713 = vmatprep.subr.bf16.mxu1 %v3575_v41  ;;  %v3637_v40 = vld [vmem:[%s4547_s2 + $0xa0] sm:$0xff]   ;;  %v3638_v41 = vld [vmem:[%s4547_s2 + $0x68] sm:$0xff]  }
  0x25   :  { %534 = vmatprep.mubr.bf16.mxu0 %v4552_v1  ;;  %607 = vmatprep.mubr.bf16.mxu1 %v4552_v1 }
  0x27   :  { %641 = vmatpush1.bf16.msra.mxu0 %v3570_v42  ;;  %714 = vmatpush1.bf16.msra.mxu1 %v3573_v43  ;;  %v3639_v42 = vld [vmem:[%s4547_s2 + $0xa8] sm:$0xff]   ;;  %v3641_v43 = vld [vmem:[%s4547_s2 + $0xb0] sm:$0xff]  }
  0x28   :  { %642 = vmatprep.subr.bf16.mxu0 %v3578_v46  ;;  %715 = vmatprep.subr.bf16.mxu1 %v3581_v47  ;;  %v4107_v46 = vld [vmem:[%s4548_s0] sm:$0xff]  }
  0x2a   :  { %535 = vmatmul.mubr.bf16.gmra.mrb[4].mxu0 %v3881_v48  ;;  %608 = vmatmul.mubr.bf16.gmra.mrb[4].mxu1 %v3881_v48 }
  0x2b   :  { %643 = vmatpush1.bf16.msra.mxu0 %v3576_v49  ;;  %716 = vmatpush1.bf16.msra.mxu1 %v3579_v50 }
  0x2c   :  { %644 = vmatprep.subr.bf16.mxu0 %v3584_v51  ;;  %717 = vmatprep.subr.bf16.mxu1 %v3587_v52 }
  0x2d   :  { %544 = vmatprep.mubr.bf16.mxu0 %v4552_v1  ;;  %617 = vmatprep.mubr.bf16.mxu1 %v4552_v1 }
  0x2f   :  { %645 = vmatpush1.bf16.msra.mxu0 %v3582_v53  ;;  %718 = vmatpush1.bf16.msra.mxu1 %v3585_v54 }
  0x30   :  { %646 = vmatprep.subr.bf16.mxu0 %v3590_v57  ;;  %719 = vmatprep.subr.bf16.mxu1 %v3593_v58 }
  0x32   :  { %545 = vmatmul.mubr.bf16.gmra.mrb[8].mxu0 %v3920_v60  ;;  %618 = vmatmul.mubr.bf16.gmra.mrb[8].mxu1 %v3920_v60 }
  0x33   :  { %647 = vmatpush1.bf16.msra.mxu0 %v3588_v59  ;;  %720 = vmatpush1.bf16.msra.mxu1 %v3591_v61 }
  0x34   :  { %648 = vmatprep.subr.bf16.mxu0 %v3596_v62  ;;  %721 = vmatprep.subr.bf16.mxu1 %v3599_v63 }
  0x35   :  { %554 = vmatprep.mubr.bf16.mxu0 %v4552_v1  ;;  %627 = vmatprep.mubr.bf16.mxu1 %v4552_v1 }
  0x37   :  { %649 = vmatpush1.bf16.msra.mxu0 %v3594_v0  ;;  %722 = vmatpush1.bf16.msra.mxu1 %v3597_v2 }
  0x38   :  { %650 = vmatprep.subr.bf16.mxu0 %v3602_v5  ;;  %723 = vmatprep.subr.bf16.mxu1 %v3605_v6 }
  0x3a   :  { %555 = vmatmul.mubr.bf16.gmra.mrb[12].mxu0 %v3956_v8  ;;  %628 = vmatmul.mubr.bf16.gmra.mrb[12].mxu1 %v3956_v8 }
  0x3b   :  { %651 = vmatpush1.bf16.msra.mxu0 %v3600_v7  ;;  %724 = vmatpush1.bf16.msra.mxu1 %v3603_v9 }
  0x3c   :  { %652 = vmatprep.subr.bf16.mxu0 %v3608_v10  ;;  %725 = vmatprep.subr.bf16.mxu1 %v3611_v11 }
  0x3d   :  { %670 = vmatprep.mubr.bf16.mxu0 %v4552_v1  ;;  %743 = vmatprep.mubr.bf16.mxu1 %v4552_v1 }
  0x3f   :  { %653 = vmatpush1.bf16.msra.mxu0 %v3606_v12  ;;  %726 = vmatpush1.bf16.msra.mxu1 %v3609_v13 }
  0x40   :  { %3187 = vmatprep.subr.bf16.mxu0 %v3612_v14  ;;  %3211 = vmatprep.subr.bf16.mxu1 %v3613_v15 }
  0x42   :  { %671 = vmatmul.mubr.bf16.vlgmr.msra.gmra.mrb[16].mxu0 %v3845_v37  ;;  %744 = vmatmul.mubr.bf16.vlgmr.msra.gmra.mrb[16].mxu1 %v3845_v37 }
  0x43   :  { %3188 = vmatpush3.bf16.msra.mxu0 %v3612_v14  ;;  %3212 = vmatpush3.bf16.msra.mxu1 %v3613_v15 }
  0x44   :  { %3189 = vmatprep.subr.bf16.mxu0 %v3614_v16  ;;  %3213 = vmatprep.subr.bf16.mxu1 %v3615_v17 }
  0x45   :  { %680 = vmatprep.mubr.bf16.mxu0 %v4552_v1  ;;  %753 = vmatprep.mubr.bf16.mxu1 %v4552_v1 }
  0x47   :  { %3190 = vmatpush3.bf16.msra.mxu0 %v3614_v16  ;;  %3214 = vmatpush3.bf16.msra.mxu1 %v3615_v17 }
  0x48   :  { %3191 = vmatprep.subr.bf16.mxu0 %v3616_v18  ;;  %3215 = vmatprep.subr.bf16.mxu1 %v3617_v19 }
  0x4a   :  { %681 = vmatmul.mubr.bf16.gmra.mrb[20].mxu0 %v3881_v48  ;;  %754 = vmatmul.mubr.bf16.gmra.mrb[20].mxu1 %v3881_v48 }
  0x4b   :  { %3192 = vmatpush3.bf16.msra.mxu0 %v3616_v18  ;;  %3216 = vmatpush3.bf16.msra.mxu1 %v3617_v19 }
  0x4c   :  { %3193 = vmatprep.subr.bf16.mxu0 %v3618_v20  ;;  %3217 = vmatprep.subr.bf16.mxu1 %v3619_v21 }
  0x4d   :  { %690 = vmatprep.mubr.bf16.mxu0 %v4552_v1  ;;  %763 = vmatprep.mubr.bf16.mxu1 %v4552_v1 }
  0x4f   :  { %3194 = vmatpush3.bf16.msra.mxu0 %v3618_v20  ;;  %3218 = vmatpush3.bf16.msra.mxu1 %v3619_v21 }
  0x50   :  { %3195 = vmatprep.subr.bf16.mxu0 %v3620_v22  ;;  %3219 = vmatprep.subr.bf16.mxu1 %v3621_v23 }
  0x52   :  { %691 = vmatmul.mubr.bf16.gmra.mrb[24].mxu0 %v3920_v60  ;;  %764 = vmatmul.mubr.bf16.gmra.mrb[24].mxu1 %v3920_v60 }
  0x53   :  { %3196 = vmatpush3.bf16.msra.mxu0 %v3620_v22  ;;  %3220 = vmatpush3.bf16.msra.mxu1 %v3621_v23 }
  0x54   :  { %3197 = vmatprep.subr.bf16.mxu0 %v3622_v24  ;;  %3221 = vmatprep.subr.bf16.mxu1 %v3623_v25 }
  0x55   :  { %700 = vmatprep.mubr.bf16.mxu0 %v4552_v1  ;;  %773 = vmatprep.mubr.bf16.mxu1 %v4552_v1 }
  0x57   :  { %3198 = vmatpush3.bf16.msra.mxu0 %v3622_v24  ;;  %3222 = vmatpush3.bf16.msra.mxu1 %v3623_v25 }
  0x58   :  { %3199 = vmatprep.subr.bf16.mxu0 %v3624_v26  ;;  %3223 = vmatprep.subr.bf16.mxu1 %v3625_v27 }
  0x5a   :  { %701 = vmatmul.mubr.bf16.gmra.mrb[28].mxu0 %v3956_v8  ;;  %774 = vmatmul.mubr.bf16.gmra.mrb[28].mxu1 %v3956_v8 }
  0x5b   :  { %3200 = vmatpush3.bf16.msra.mxu0 %v3624_v26  ;;  %3224 = vmatpush3.bf16.msra.mxu1 %v3625_v27 }
  0x5c   :  { %3201 = vmatprep.subr.bf16.mxu0 %v3626_v28  ;;  %3225 = vmatprep.subr.bf16.mxu1 %v3627_v29 }
  0x5d   :  { %3203 = vmatprep.mubr.bf16.mxu0 %v3845_v37  ;;  %3227 = vmatprep.mubr.bf16.mxu1 %v3845_v37 }
  0x5f   :  { %3202 = vmatpush3.bf16.msra.mxu0 %v3626_v28  ;;  %3226 = vmatpush3.bf16.msra.mxu1 %v3627_v29 }
  0x60   :  { %3235 = vmatprep.subr.bf16.mxu0 %v3628_v30  ;;  %3259 = vmatprep.subr.bf16.mxu1 %v3629_v31 }
  0x62   :  { %3204 = vmatmul.mubr.bf16.vlgmr.msra.gmra.mrb[32].mxu0 %v3881_v48  ;;  %3228 = vmatmul.mubr.bf16.vlgmr.msra.gmra.mrb[32].mxu1 %v3881_v48 }
  0x63   :  { %3236 = vmatpush3.bf16.msra.mxu0 %v3628_v30  ;;  %3260 = vmatpush3.bf16.msra.mxu1 %v3629_v31 }
  0x64   :  { %3237 = vmatprep.subr.bf16.mxu0 %v3630_v32  ;;  %3261 = vmatprep.subr.bf16.mxu1 %v3631_v33 }
  0x65   :  { %3207 = vmatprep.mubr.bf16.mxu0 %v3920_v60  ;;  %3231 = vmatprep.mubr.bf16.mxu1 %v3920_v60 }
  0x67   :  { %3238 = vmatpush3.bf16.msra.mxu0 %v3630_v32  ;;  %3262 = vmatpush3.bf16.msra.mxu1 %v3631_v33 }
  0x68   :  { %3239 = vmatprep.subr.bf16.mxu0 %v3632_v34  ;;  %3263 = vmatprep.subr.bf16.mxu1 %v3633_v35 }
  0x6a   :  { %3208 = vmatmul.mubr.bf16.gmra.mrb[36].mxu0 %v3956_v8  ;;  %3232 = vmatmul.mubr.bf16.gmra.mrb[36].mxu1 %v3956_v8 }
  0x6b   :  { %3240 = vmatpush3.bf16.msra.mxu0 %v3632_v34  ;;  %3264 = vmatpush3.bf16.msra.mxu1 %v3633_v35 }
  0x6c   :  { %3241 = vmatprep.subr.bf16.mxu0 %v3634_v36  ;;  %3265 = vmatprep.subr.bf16.mxu1 %v3635_v38 }
  0x6d   :  { %3251 = vmatprep.mubr.bf16.mxu0 %v3845_v37  ;;  %3275 = vmatprep.mubr.bf16.mxu1 %v3845_v37  ;;  %v3640_v37 = vld [vmem:[%s4547_s2 + $0x70] sm:$0xff]  }
  0x6f   :  { %3242 = vmatpush3.bf16.msra.mxu0 %v3634_v36  ;;  %3266 = vmatpush3.bf16.msra.mxu1 %v3635_v38 }
  0x70   :  { %3243 = vmatprep.subr.bf16.mxu0 %v3636_v39  ;;  %3267 = vmatprep.subr.bf16.mxu1 %v3637_v40 }
  0x73   :  { %3244 = vmatpush3.bf16.msra.mxu0 %v3636_v39  ;;  %3268 = vmatpush3.bf16.msra.mxu1 %v3637_v40 }
  0x74   :  { %3245 = vmatprep.subr.bf16.mxu0 %v3638_v41  ;;  %3269 = vmatprep.subr.bf16.mxu1 %v3639_v42 }
  0x77   :  { %3246 = vmatpush3.bf16.msra.mxu0 %v3638_v41  ;;  %3270 = vmatpush3.bf16.msra.mxu1 %v3639_v42 }
  0x78   :  { %3247 = vmatprep.subr.bf16.mxu0 %v3640_v37  ;;  %3271 = vmatprep.subr.bf16.mxu1 %v3641_v43 }
  0x7b   :  { %3248 = vmatpush3.bf16.msra.mxu0 %v3640_v37  ;;  %3272 = vmatpush3.bf16.msra.mxu1 %v3641_v43 }
  0x7c   :  { %3249 = vmatprep.subr.bf16.mxu0 %v3642_v44  ;;  %3273 = vmatprep.subr.bf16.mxu1 %v3643_v45 }
  0x7f   :  { %3250 = vmatpush3.bf16.msra.mxu0 %v3642_v44  ;;  %3274 = vmatpush3.bf16.msra.mxu1 %v3643_v45 }
  0x82   :  { %3252 = vmatmul.mubr.bf16.vlgmr.msra.gmra.mrb[40].mxu0 %v3881_v48  ;;  %3276 = vmatmul.mubr.bf16.vlgmr.msra.gmra.mrb[40].mxu1 %v3881_v48 }
  0x83   :  { %3255 = vmatprep.mubr.bf16.mxu0 %v3920_v60  ;;  %3279 = vmatprep.mubr.bf16.mxu1 %v3920_v60 }
  0x8a   :  { %3256 = vmatmul.mubr.bf16.gmra.mrb[44].mxu0 %v3956_v8  ;;  %3280 = vmatmul.mubr.bf16.gmra.mrb[44].mxu1 %v3956_v8 }
  0x8b   :  { %1315 = vmatprep.mubr.bf16.mxu0 %v4552_v1  ;;  %3291 = vmatprep.mubr.msk.bf16.mxu1 %vm1270_vm0, %v4107_v46 }
  0xf5   :  { %v4111_v47 = vpop.f32.mrb[0].mxu1 }
  0xf6   :  { %v4113_v48 = vpop.f32.mrb[1].mxu1 }
  0xf7   :  { %v4115_v49 = vpop.f32.mrb[2].mxu1 }
  0xf8   :  { %v4117_v50 = vpop.f32.mrb[3].mxu1 }
  0xfd   :  { %v4119_v51 = vpop.f32.mrb[4].mxu1 }
  0xfe   :  { %v4121_v52 = vpop.f32.mrb[5].mxu1 }
  0xff   :  { %v4123_v53 = vpop.f32.mrb[6].mxu1 }
 0x100   :  { %v4125_v54 = vpop.f32.mrb[7].mxu1 }
 0x105   :  { %v4127_v55 = vpop.f32.mrb[8].mxu1 }
 0x106   :  { %v4129_v56 = vpop.f32.mrb[9].mxu1 }
 0x107   :  { %v4131_v57 = vpop.f32.mrb[10].mxu1 }
 0x108   :  { %v4133_v58 = vpop.f32.mrb[11].mxu1 }
 0x10d   :  { %v4135_v59 = vpop.f32.mrb[12].mxu1 }
 0x10e   :  { %v4137_v60 = vpop.f32.mrb[13].mxu1 }
 0x10f   :  { %v4139_v61 = vpop.f32.mrb[14].mxu1 }
 0x110   :  { %v4141_v62 = vpop.f32.mrb[15].mxu1 }
 0x115   :  { %v4143_v63 = vpop.f32.mrb[16].mxu0 }
 0x116   :  { %v4145_v0 = vpop.f32.mrb[17].mxu0 }
 0x117   :  { %v4147_v2 = vpop.f32.mrb[18].mxu0 }
 0x118   :  { %v4149_v3 = vpop.f32.mrb[19].mxu0 }
 0x11d   :  { %v4151_v4 = vpop.f32.mrb[20].mxu0 }
 0x11e   :  { %v4153_v5 = vpop.f32.mrb[21].mxu0 }
 0x11f   :  { %v4155_v6 = vpop.f32.mrb[22].mxu0 }
 0x120   :  { %v4157_v7 = vpop.f32.mrb[23].mxu0 }
 0x125   :  { %v4159_v8 = vpop.f32.mrb[24].mxu0 }
 0x126   :  { %v4161_v9 = vpop.f32.mrb[25].mxu0 }
 0x127   :  { %v4163_v10 = vpop.f32.mrb[26].mxu0 }
 0x128   :  { %v4165_v11 = vpop.f32.mrb[27].mxu0 }
 0x129   :  { %4554 = vst [vmem:[#allocation2_spill] sm:$0xff] %v4165_v11 }
 0x12d   :  { %v4167_v12 = vpop.f32.mrb[28].mxu0 }
 0x12e   :  { %v4169_v13 = vpop.f32.mrb[29].mxu0 }
 0x12f   :  { %v4171_v14 = vpop.f32.mrb[30].mxu0 }
 0x130   :  { %v4173_v15 = vpop.f32.mrb[31].mxu0 }
 0x131   :  { %4555 = vst [vmem:[#allocation3_spill] sm:$0xff] %v4173_v15 }
 0x135   :  { %v3229_v16 = vpop.f32.mrb[32].mxu1 }
 0x136   :  { %v947_v17 = vpop.f32.mrb[33].mxu1 }
 0x137   :  { %v3230_v18 = vpop.f32.mrb[34].mxu1 }
 0x138   :  { %v979_v19 = vpack.c.bf16 %v3230_v18, %v3229_v16  ;;  %v950_v20 = vpop.f32.mrb[35].mxu1 }
 0x139   :  { %v978_v21 = vpack.c.bf16 %v950_v20, %v947_v17 }
 0x13d   :  { %v3233_v22 = vpop.f32.mrb[36].mxu1 }
 0x13e   :  { %v963_v23 = vpop.f32.mrb[37].mxu1 }
 0x13f   :  { %v3234_v24 = vpop.f32.mrb[38].mxu1 }
 0x140   :  { %v981_v25 = vpack.c.bf16 %v3234_v24, %v3233_v22  ;;  %v966_v26 = vpop.f32.mrb[39].mxu1  ;;  %v3649_v24 = vld [vmem:[%s4549_s3 + $0x40] sm:$0xff]  }
 0x141   :  { %v980_v27 = vpack.c.bf16 %v966_v26, %v963_v23  ;;  %v4189_v26 = vld [vmem:[%s4548_s0 + $0x10] sm:$0xff]  }
 0x155   :  { %v3253_v28 = vpop.f32.mrb[40].mxu0  ;;  %v3277_v29 = vpop.f32.mrb[40].mxu1 }
 0x156   :  { %v1081_v30 = vpop.f32.mrb[41].mxu0  ;;  %v1215_v31 = vpop.f32.mrb[41].mxu1 }
 0x157   :  { %v3254_v32 = vpop.f32.mrb[42].mxu0  ;;  %v3278_v33 = vpop.f32.mrb[42].mxu1 }
 0x158   :  { %v1113_v34 = vpack.c.bf16 %v3254_v32, %v3253_v28  ;;  %v1247_v35 = vpack.c.bf16 %v3278_v33, %v3277_v29  ;;  %v1084_v36 = vpop.f32.mrb[43].mxu0  ;;  %v1218_v38 = vpop.f32.mrb[43].mxu1  ;;  %v3651_v28 = vld [vmem:[%s4549_s3 + $0x48] sm:$0xff]   ;;  %v3653_v29 = vld [vmem:[%s4549_s3 + $0x50] sm:$0xff]   ;;  %v3655_v32 = vld [vmem:[%s4549_s3 + $0x58] sm:$0xff]  }
 0x159   :  { %v1112_v39 = vpack.c.bf16 %v1084_v36, %v1081_v30  ;;  %v1246_v40 = vpack.c.bf16 %v1218_v38, %v1215_v31  ;;  %v4213_v30 = vld [vmem:[%s4548_s0 + $0x18] sm:$0xff]   ;;  %v3656_v33 = vld [vmem:[%s4549_s3 + $0x20] sm:$0xff]   ;;  %v3659_v36 = vld [vmem:[%s4549_s3 + $0x68] sm:$0xff]  }
 0x15a   :  { %v3654_v31 = vld [vmem:[%s4549_s3 + $0x18] sm:$0xff]   ;;  %v3660_v38 = vld [vmem:[%s4549_s3 + $0x30] sm:$0xff]  }
 0x15b   :  { %1283 = vmatprep.subr.bf16.mxu0 %v1112_v39  ;;  %3283 = vmatprep.subr.bf16.mxu1 %v1246_v40  ;;  %v3661_v39 = vld [vmem:[%s4549_s3 + $0x70] sm:$0xff]  }
 0x15c   :  { %1284 = vmatpush1.bf16.msra.mxu0 %v978_v21  ;;  %3284 = vmatpush3.bf16.msra.mxu1 %v1246_v40  ;;  %v3648_v21 = vld [vmem:[%s4549_s3] sm:$0xff]   ;;  %v3662_v40 = vld [vmem:[%s4549_s3 + $0x38] sm:$0xff]  }
 0x15d   :  { %v3257_v41 = vpop.f32.mrb[44].mxu0  ;;  %v3281_v42 = vpop.f32.mrb[44].mxu1  ;;  %1285 = vmatprep.subr.bf16.mxu0 %v1113_v34  ;;  %3285 = vmatprep.subr.bf16.mxu1 %v1247_v35  ;;  %v3657_v34 = vld [vmem:[%s4549_s3 + $0x60] sm:$0xff]  }
 0x15e   :  { %v1097_v37 = vpop.f32.mrb[45].mxu0  ;;  %v1231_v43 = vpop.f32.mrb[45].mxu1 }
 0x15f   :  { %v3258_v44 = vpop.f32.mrb[46].mxu0  ;;  %v3282_v45 = vpop.f32.mrb[46].mxu1 }
 0x160   :  { %v1115_v16 = vpack.c.bf16 %v3258_v44, %v3257_v41  ;;  %v1249_v17 = vpack.c.bf16 %v3282_v45, %v3281_v42  ;;  %v1100_v18 = vpop.f32.mrb[47].mxu0  ;;  %v1234_v20 = vpop.f32.mrb[47].mxu1  ;;  %1286 = vmatpush1.bf16.msra.mxu0 %v979_v19  ;;  %3286 = vmatpush3.bf16.msra.mxu1 %v1247_v35  ;;  %v4184_v19 = vld [vmem:[%s4548_s0 + $0x8] sm:$0xff]   ;;  %v3663_v41 = vld [vmem:[%s4549_s3 + $0x78] sm:$0xff]   ;;  %v4258_v42 = vld [vmem:[%s4549_s3 + $0x80] sm:$0xff]  }
 0x161   :  { %v1114_v22 = vpack.c.bf16 %v1100_v18, %v1097_v37  ;;  %v1248_v23 = vpack.c.bf16 %v1234_v20, %v1231_v43  ;;  %v3658_v35 = vld [vmem:[%s4549_s3 + $0x28] sm:$0xff]   ;;  %v1423_v37 = vlaneseq  ;;  %v1421_v45 = vld [vmem:[%s4550_s5] sm:$0x7] }
 0x163   :  { %1287 = vmatprep.subr.bf16.mxu0 %v1114_v22  ;;  %3287 = vmatprep.subr.bf16.mxu1 %v1248_v23  ;;  %v1424_v43 = vshrl.u32 %v1423_v37, 7 }
 0x164   :  { %1288 = vmatpush1.bf16.msra.mxu0 %v980_v27  ;;  %3288 = vmatpush3.bf16.msra.mxu1 %v1248_v23  ;;  %v3650_v27 = vld [vmem:[%s4549_s3 + $0x8] sm:$0xff]  }
 0x165   :  { %1289 = vmatprep.subr.bf16.mxu0 %v1115_v16  ;;  %3289 = vmatprep.subr.bf16.mxu1 %v1249_v17  ;;  %v4261_v44 = vsub.s32 0, %v1424_v43  ;;  %v4266_v16 = vsub.s32 1, %v1424_v43 }
 0x167   :  { %v4271_v18 = vrot.slane %v1421_v45, %v4261_v44  ;;  %v4274_v20 = vrot.slane %v1421_v45, %v4266_v16 }
 0x168   :  { %1290 = vmatpush1.bf16.msra.mxu0 %v981_v25  ;;  %3290 = vmatpush3.bf16.msra.mxu1 %v1249_v17  ;;  %v3652_v25 = vld [vmem:[%s4549_s3 + $0x10] sm:$0xff]   ;;  %v4268_v17 = vsub.s32 2, %v1424_v43 }
 0x169   :  { %3299 = vmatprep.subr.bf16.mxu0 %v3648_v21  ;;  %3323 = vmatprep.subr.bf16.mxu1 %v3649_v24 }
 0x16a   :  { %v1434_v22 = vrot.slane %v1421_v45, %v4268_v17 }
 0x16b   :  { %2889 = vmatmul.mubr.msk.bf16.vlgmr.msra.gmra.mrb[0].mxu0 %vm1270_vm0, %v4107_v46  ;;  %3292 = vmatmul.mubr.msk.bf16.vlgmr.msra.gmra.mrb[48].mxu1 %vm1270_vm0, %v4184_v19 }
 0x16c   :  { %1325 = vmatprep.mubr.bf16.mxu0 %v4552_v1  ;;  %3295 = vmatprep.mubr.msk.bf16.mxu1 %vm1270_vm0, %v4189_v26 }
 0x16d   :  { %3300 = vmatpush3.bf16.msra.mxu0 %v3648_v21  ;;  %3324 = vmatpush3.bf16.msra.mxu1 %v3649_v24 }
 0x16e   :  { %3301 = vmatprep.subr.bf16.mxu0 %v3650_v27  ;;  %3325 = vmatprep.subr.bf16.mxu1 %v3651_v28 }
 0x171   :  { %3302 = vmatpush3.bf16.msra.mxu0 %v3650_v27  ;;  %3326 = vmatpush3.bf16.msra.mxu1 %v3651_v28 }
 0x172   :  { %3303 = vmatprep.subr.bf16.mxu0 %v3652_v25  ;;  %3327 = vmatprep.subr.bf16.mxu1 %v3653_v29 }
 0x173   :  { %2890 = vmatmul.mubr.msk.bf16.gmra.mrb[4].mxu0 %vm1270_vm0, %v4184_v19  ;;  %3296 = vmatmul.mubr.msk.bf16.gmra.mrb[52].mxu1 %vm1270_vm0, %v4213_v30 }
 0x174   :  { %1335 = vmatprep.mubr.bf16.mxu0 %v4552_v1 }
 0x175   :  { %3304 = vmatpush3.bf16.msra.mxu0 %v3652_v25  ;;  %3328 = vmatpush3.bf16.msra.mxu1 %v3653_v29 }
 0x176   :  { %3305 = vmatprep.subr.bf16.mxu0 %v3654_v31  ;;  %3329 = vmatprep.subr.bf16.mxu1 %v3655_v32 }
 0x179   :  { %3306 = vmatpush3.bf16.msra.mxu0 %v3654_v31  ;;  %3330 = vmatpush3.bf16.msra.mxu1 %v3655_v32 }
 0x17a   :  { %3307 = vmatprep.subr.bf16.mxu0 %v3656_v33  ;;  %3331 = vmatprep.subr.bf16.mxu1 %v3657_v34 }
 0x17b   :  { %2891 = vmatmul.mubr.msk.bf16.gmra.mrb[8].mxu0 %vm1270_vm0, %v4189_v26 }
 0x17c   :  { %1345 = vmatprep.mubr.bf16.mxu0 %v4552_v1 }
 0x17d   :  { %3308 = vmatpush3.bf16.msra.mxu0 %v3656_v33  ;;  %3332 = vmatpush3.bf16.msra.mxu1 %v3657_v34 }
 0x17e   :  { %3309 = vmatprep.subr.bf16.mxu0 %v3658_v35  ;;  %3333 = vmatprep.subr.bf16.mxu1 %v3659_v36 }
 0x181   :  { %3310 = vmatpush3.bf16.msra.mxu0 %v3658_v35  ;;  %3334 = vmatpush3.bf16.msra.mxu1 %v3659_v36 }
 0x182   :  { %3311 = vmatprep.subr.bf16.mxu0 %v3660_v38  ;;  %3335 = vmatprep.subr.bf16.mxu1 %v3661_v39 }
 0x183   :  { %2892 = vmatmul.mubr.msk.bf16.gmra.mrb[12].mxu0 %vm1270_vm0, %v4213_v30 }
 0x185   :  { %3312 = vmatpush3.bf16.msra.mxu0 %v3660_v38  ;;  %3336 = vmatpush3.bf16.msra.mxu1 %v3661_v39 }
 0x186   :  { %3313 = vmatprep.subr.bf16.mxu0 %v3662_v40  ;;  %3337 = vmatprep.subr.bf16.mxu1 %v3663_v41 }
 0x189   :  { %3314 = vmatpush3.bf16.msra.mxu0 %v3662_v40  ;;  %3338 = vmatpush3.bf16.msra.mxu1 %v3663_v41 }
 0x18a   :  { %3347 = vmatprep.subr.bf16.mxu0 %v4258_v42 }
 0x23e   :  { %v1317_v23 = vpop.f32.mrb[0].mxu0  ;;  %v3293_v21 = vpop.f32.mrb[48].mxu1 }
 0x23f   :  { %v1438_v24 = vadd.f32 %v4271_v18, %v1317_v23  ;;  %v1399_v27 = vadd.f32 %v3293_v21, %v4119_v51  ;;  %v1319_v28 = vpop.f32.mrb[1].mxu0  ;;  %v1390_v25 = vpop.f32.mrb[49].mxu1 }
 0x240   :  { %v1439_v29 = vadd.f32 %v4274_v20, %v1319_v28  ;;  %v1391_v31 = vadd.f32 %v1390_v25, %v4111_v47  ;;  %v1321_v32 = vpop.f32.mrb[2].mxu0  ;;  %v3294_v33 = vpop.f32.mrb[50].mxu1 }
 0x241   :  { %v1446_v34 = vadd.f32 %v1434_v22, %v1399_v27  ;;  %v1441_v35 = vadd.f32 %v4271_v18, %v1321_v32  ;;  %v1402_v36 = vadd.f32 %v3294_v33, %v4123_v53  ;;  %v1323_v38 = vpop.f32.mrb[3].mxu0  ;;  %v1393_v39 = vpop.f32.mrb[51].mxu1  ;;  %v1462_v37 = vmax.f32 %v1438_v24, 0.0 }
 0x242   :  { %v1440_v40 = vadd.f32 %v1434_v22, %v1391_v31  ;;  %v1442_v41 = vadd.f32 %v4274_v20, %v1323_v38  ;;  %v1394_v51 = vadd.f32 %v1393_v39, %v4115_v49  ;;  %v1463_v23 = vmax.f32 %v1439_v29, 0.0 }
 0x243   :  { %v1465_v43 = vmax.f32 %v1441_v35, 0.0  ;;  %v1449_v45 = vadd.f32 %v1434_v22, %v1402_v36  ;;  %v1470_v28 = vmax.f32 %v1446_v34, 0.0 }
 0x244   :  { %v1466_v21 = vmax.f32 %v1442_v41, 0.0  ;;  %v1443_v47 = vadd.f32 %v1434_v22, %v1394_v51  ;;  %v1464_v1 = vmax.f32 %v1440_v40, 0.0 }
 0x245   :  { %v1486_v25 = vpack.c.bf16 %v1465_v43, %v1462_v37  ;;  %v1473_v27 = vmax.f32 %v1449_v45, 0.0 }
 0x246   :  { %v1490_v32 = vpack.c.bf16 %v1466_v21, %v1463_v23  ;;  %v1467_v11 = vmax.f32 %v1443_v47, 0.0  ;;  %v1327_v53 = vpop.f32.mrb[4].mxu0  ;;  %v3297_v33 = vpop.f32.mrb[52].mxu1 }
 0x247   :  { %v4285_v15 = vpack.c.bf16 %v1473_v27, %v1470_v28  ;;  %v1444_v31 = vadd.f32 %v4271_v18, %v1327_v53  ;;  %v1415_v49 = vadd.f32 %v3297_v33, %v4135_v59  ;;  %v1329_v24 = vpop.f32.mrb[5].mxu0  ;;  %v1406_v35 = vpop.f32.mrb[53].mxu1  ;;  %3315 = vmatprep.mubr.bf16.mxu0 %v1486_v25 }
 0x248   :  { %v1445_v29 = vadd.f32 %v4274_v20, %v1329_v24  ;;  %v1407_v34 = vadd.f32 %v1406_v35, %v4127_v55  ;;  %v1331_v36 = vpop.f32.mrb[6].mxu0  ;;  %v3298_v38 = vpop.f32.mrb[54].mxu1  ;;  %3339 = vmatprep.mubr.bf16.mxu1 %v1490_v32  ;;  %v4291_v39 = vpack.c.bf16 %v1467_v11, %v1464_v1 }
 0x249   :  { %v1458_v40 = vadd.f32 %v1434_v22, %v1415_v49  ;;  %v1447_v41 = vadd.f32 %v4271_v18, %v1331_v36  ;;  %v1418_v51 = vadd.f32 %v3298_v38, %v4139_v61  ;;  %v1333_v37 = vpop.f32.mrb[7].mxu0  ;;  %v1409_v43 = vpop.f32.mrb[55].mxu1  ;;  %v1468_v21 = vmax.f32 %v1444_v31, 0.0  ;;  %v3665_v61 = vld [vmem:[%s4549_s3 + $0x88] sm:$0xff]  }
 0x24a   :  { %v1452_v59 = vadd.f32 %v1434_v22, %v1407_v34  ;;  %v1448_v45 = vadd.f32 %v4274_v20, %v1333_v37  ;;  %v1410_v23 = vadd.f32 %v1409_v43, %v4131_v57  ;;  %v1469_v28 = vmax.f32 %v1445_v29, 0.0 }
 0x24b   :  { %v1471_v47 = vmax.f32 %v1447_v41, 0.0  ;;  %v1461_v55 = vadd.f32 %v1434_v22, %v1418_v51  ;;  %v1482_v1 = vmax.f32 %v1458_v40, 0.0  ;;  %v3666_v40 = vld [vmem:[%s4549_s3 + $0x90] sm:$0xff]  }
 0x24c   :  { %v1472_v25 = vmax.f32 %v1448_v45, 0.0  ;;  %v1455_v27 = vadd.f32 %v1434_v22, %v1410_v23  ;;  %v1476_v53 = vmax.f32 %v1452_v59, 0.0 }
 0x24d   :  { %v1487_v11 = vpack.c.bf16 %v1471_v47, %v1468_v21  ;;  %v1485_v32 = vmax.f32 %v1461_v55, 0.0 }
 0x24e   :  { %v1491_v33 = vpack.c.bf16 %v1472_v25, %v1469_v28  ;;  %v1479_v49 = vmax.f32 %v1455_v27, 0.0  ;;  %v1337_v24 = vpop.f32.mrb[8].mxu0 }
 0x24f   :  { %v1450_v35 = vadd.f32 %v4271_v18, %v1337_v24  ;;  %v1339_v57 = vpop.f32.mrb[9].mxu0  ;;  %3316 = vmatmul.mubr.bf16.vlgmr.msra.gmra.mrb[48].mxu0 %v1487_v11  ;;  %v1497_v31 = vpack.c.bf16 %v1485_v32, %v1482_v1  ;;  %v3668_v11 = vld [vmem:[%s4549_s3 + $0xa0] sm:$0xff]  }
 0x250   :  { %v1451_v29 = vadd.f32 %v4274_v20, %v1339_v57  ;;  %3348 = vmatpush3.bf16.msra.mxu0 %v4258_v42  ;;  %v1341_v22 = vpop.f32.mrb[10].mxu0  ;;  %3340 = vmatmul.mubr.bf16.vlgmr.msra.gmra.mrb[56].mxu1 %v1491_v33  ;;  %v1496_v34 = vpack.c.bf16 %v1479_v49, %v1476_v53  ;;  %v3667_v42 = vld [vmem:[%s4549_s3 + $0x98] sm:$0xff]   ;;  %v4556_v57 = vmov 0  }
 0x251   :  { %v1453_v36 = vadd.f32 %v4271_v18, %v1341_v22  ;;  %v1343_v38 = vpop.f32.mrb[11].mxu0  ;;  %3349 = vmatprep.subr.bf16.mxu0 %v3665_v61  ;;  %v1474_v51 = vmax.f32 %v1450_v35, 0.0  ;;  %v3669_v35 = vld [vmem:[%s4549_s3 + $0xa8] sm:$0xff]  }
 0x252   :  { %v1454_v41 = vadd.f32 %v4274_v20, %v1343_v38  ;;  %v1475_v43 = vmax.f32 %v1451_v29, 0.0  ;;  %v3671_v29 = vld [vmem:[%s4549_s3 + $0xb8] sm:$0xff]  }
 0x253   :  { %v1477_v37 = vmax.f32 %v1453_v36, 0.0 }
 0x254   :  { %v1478_v59 = vmax.f32 %v1454_v41, 0.0  ;;  %3350 = vmatpush3.bf16.msra.mxu0 %v3665_v61 }
 0x255   :  { %v1488_v45 = vpack.c.bf16 %v1477_v37, %v1474_v51  ;;  %3351 = vmatprep.subr.bf16.mxu0 %v3666_v40 }
 0x256   :  { %v1492_v23 = vpack.c.bf16 %v1478_v59, %v1475_v43  ;;  %v1347_v21 = vpop.f32.mrb[12].mxu0 }
 0x257   :  { %v1456_v47 = vadd.f32 %v4271_v18, %v1347_v21  ;;  %v1349_v55 = vpop.f32.mrb[13].mxu0  ;;  %3319 = vmatprep.mubr.bf16.mxu0 %v1488_v45 }
 0x258   :  { %v1457_v28 = vadd.f32 %v4274_v20, %v1349_v55  ;;  %3352 = vmatpush3.bf16.msra.mxu0 %v3666_v40  ;;  %v1351_v25 = vpop.f32.mrb[14].mxu0  ;;  %3343 = vmatprep.mubr.bf16.mxu1 %v1492_v23 }
 0x259   :  { %v1459_v27 = vadd.f32 %v4271_v18, %v1351_v25  ;;  %v1353_v1 = vpop.f32.mrb[15].mxu0  ;;  %3353 = vmatprep.subr.bf16.mxu0 %v3667_v42  ;;  %v1480_v61 = vmax.f32 %v1456_v47, 0.0 }
 0x25a   :  { %v1460_v32 = vadd.f32 %v4274_v20, %v1353_v1  ;;  %v1481_v33 = vmax.f32 %v1457_v28, 0.0  ;;  %v3670_v20 = vld [vmem:[%s4549_s3 + $0xb0] sm:$0xff]  }
 0x25b   :  { %v1483_v53 = vmax.f32 %v1459_v27, 0.0 }
 0x25c   :  { %v1484_v49 = vmax.f32 %v1460_v32, 0.0  ;;  %3354 = vmatpush3.bf16.msra.mxu0 %v3667_v42  ;;  %v3672_v32 = vld [vmem:[%s4549_s3 + $0xc0] sm:$0xff]  }
 0x25d   :  { %v1489_v24 = vpack.c.bf16 %v1483_v53, %v1480_v61  ;;  %3355 = vmatprep.subr.bf16.mxu0 %v3668_v11  ;;  %v3674_v61 = vld [vmem:[%s4549_s3 + $0xc8] sm:$0xff]  }
 0x25e   :  { %v1493_v18 = vpack.c.bf16 %v1484_v49, %v1481_v33  ;;  %v3676_v49 = vld [vmem:[%s4549_s3 + $0xd0] sm:$0xff]  }
 0x25f   :  { %3320 = vmatmul.mubr.bf16.gmra.mrb[52].mxu0 %v1489_v24 }
 0x260   :  { %3356 = vmatpush3.bf16.msra.mxu0 %v3668_v11  ;;  %3344 = vmatmul.mubr.bf16.gmra.mrb[60].mxu1 %v1493_v18 }
 0x261   :  { %3363 = vmatprep.mubr.bf16.mxu0 %v4291_v39  ;;  %3357 = vmatprep.subr.bf16.mxu0 %v3669_v35 }
 0x262   :  { %1931 = vmatprep.mubr.bf16.mxu1 %v4556_v57 }
 0x264   :  { %3358 = vmatpush3.bf16.msra.mxu0 %v3669_v35 }
 0x265   :  { %3359 = vmatprep.subr.bf16.mxu0 %v3670_v20 }
 0x268   :  { %3360 = vmatpush3.bf16.msra.mxu0 %v3670_v20 }
 0x269   :  { %3361 = vmatprep.subr.bf16.mxu0 %v3671_v29 }
 0x26c   :  { %3362 = vmatpush3.bf16.msra.mxu0 %v3671_v29 }
 0x26f   :  { %3364 = vmatmul.mubr.bf16.vlgmr.msra.gmra.mrb[56].mxu0 %v4285_v15 }
 0x270   :  { %3367 = vmatprep.mubr.bf16.mxu0 %v1496_v34 }
 0x277   :  { %3368 = vmatmul.mubr.bf16.gmra.mrb[60].mxu0 %v1497_v31 }
 0x278   :  { %3379 = vmatprep.mubr.msk.bf16.mxu0 %vm1270_vm0, %v4107_v46 }
 0x322   :  { %v3317_v39 = vpop.f32.mrb[48].mxu0 }
 0x323   :  { %v1596_v22 = vpop.f32.mrb[49].mxu0  ;;  %v3341_v36 = vpop.f32.mrb[56].mxu1 }
 0x324   :  { %v3318_v38 = vpop.f32.mrb[50].mxu0  ;;  %v1730_v40 = vpop.f32.mrb[57].mxu1 }
 0x325   :  { %v1628_v41 = vpack.c.bf16 %v3318_v38, %v3317_v39  ;;  %v1599_v51 = vpop.f32.mrb[51].mxu0  ;;  %v3342_v37 = vpop.f32.mrb[58].mxu1 }
 0x326   :  { %v1627_v43 = vpack.c.bf16 %v1599_v51, %v1596_v22  ;;  %v1762_v59 = vpack.c.bf16 %v3342_v37, %v3341_v36  ;;  %v1733_v45 = vpop.f32.mrb[59].mxu1  ;;  %v3675_v51 = vld [vmem:[%s4549_s3 + $0x108] sm:$0xff]   ;;  %v3677_v37 = vld [vmem:[%s4549_s3 + $0x110] sm:$0xff]  }
 0x327   :  { %v1761_v42 = vpack.c.bf16 %v1733_v45, %v1730_v40  ;;  %v3682_v45 = vld [vmem:[%s4549_s3 + $0xe8] sm:$0xff]  }
 0x329   :  { %1899 = vmatprep.subr.bf16.mxu1 %v1761_v42  ;;  %v3683_v42 = vld [vmem:[%s4549_s3 + $0x128] sm:$0xff]  }
 0x32a   :  { %1900 = vmatpush1.bf16.msra.mxu1 %v1627_v43  ;;  %v3679_v43 = vld [vmem:[%s4549_s3 + $0x118] sm:$0xff]  }
 0x32b   :  { %1901 = vmatprep.subr.bf16.mxu1 %v1762_v59  ;;  %v3681_v59 = vld [vmem:[%s4549_s3 + $0x120] sm:$0xff]  }
 0x32e   :  { %1902 = vmatpush1.bf16.msra.mxu1 %v1628_v41  ;;  %v3673_v41 = vld [vmem:[%s4549_s3 + $0x100] sm:$0xff]  }
 0x332   :  { %v3321_v15 = vpop.f32.mrb[52].mxu0 }
 0x333   :  { %v1612_v31 = vpop.f32.mrb[53].mxu0  ;;  %v3345_v34 = vpop.f32.mrb[60].mxu1 }
 0x334   :  { %v3322_v23 = vpop.f32.mrb[54].mxu0  ;;  %v1746_v21 = vpop.f32.mrb[61].mxu1 }
 0x335   :  { %v1630_v47 = vpack.c.bf16 %v3322_v23, %v3321_v15  ;;  %v1615_v55 = vpop.f32.mrb[55].mxu0  ;;  %v3346_v28 = vpop.f32.mrb[62].mxu1  ;;  %v3684_v15 = vld [vmem:[%s4549_s3 + $0xf0] sm:$0xff]   ;;  %v3687_v23 = vld [vmem:[%s4549_s3 + $0x138] sm:$0xff]  }
 0x336   :  { %v1629_v25 = vpack.c.bf16 %v1615_v55, %v1612_v31  ;;  %v1764_v27 = vpack.c.bf16 %v3346_v28, %v3345_v34  ;;  %v1749_v1 = vpop.f32.mrb[63].mxu1  ;;  %v3685_v31 = vld [vmem:[%s4549_s3 + $0x130] sm:$0xff]   ;;  %v3686_v34 = vld [vmem:[%s4549_s3 + $0xf8] sm:$0xff]  }
 0x337   :  { %v1763_v11 = vpack.c.bf16 %v1749_v1, %v1746_v21  ;;  %v3688_v21 = vld [vmem:[%s4549_s3 + $0x140] sm:$0xff]  }
 0x339   :  { %1903 = vmatprep.subr.bf16.mxu1 %v1763_v11 }
 0x33a   :  { %1904 = vmatpush1.bf16.msra.mxu1 %v1629_v25 }
 0x33b   :  { %1905 = vmatprep.subr.bf16.mxu1 %v1764_v27 }
 0x33e   :  { %1906 = vmatpush1.bf16.msra.mxu1 %v1630_v47  ;;  %v2961_v47 = vld [vmem:[%s4550_s5 + $0x3] sm:$0x7] }
 0x33f   :  { %3387 = vmatprep.subr.bf16.mxu1 %v3672_v32  ;;  %v4404_v55 = vrot.slane %v2961_v47, %v4261_v44  ;;  %v4407_v25 = vrot.slane %v2961_v47, %v4266_v16 }
 0x341   :  { %2953 = vmatmul.mubr.msk.bf16.vlgmr.msra.gmra.mrb[64].mxu1 %vm1270_vm0, %v4107_v46  ;;  %v3678_v46 = vld [vmem:[%s4549_s3 + $0xd8] sm:$0xff]  }
 0x342   :  { %v3365_v53 = vpop.f32.mrb[56].mxu0  ;;  %1941 = vmatprep.mubr.bf16.mxu1 %v4556_v57  ;;  %3388 = vmatpush3.bf16.msra.mxu1 %v3672_v32 }
 0x343   :  { %v1864_v33 = vpop.f32.mrb[57].mxu0  ;;  %3389 = vmatprep.subr.bf16.mxu1 %v3674_v61 }
 0x344   :  { %v3366_v24 = vpop.f32.mrb[58].mxu0 }
 0x345   :  { %v1896_v35 = vpack.c.bf16 %v3366_v24, %v3365_v53  ;;  %v1867_v18 = vpop.f32.mrb[59].mxu0 }
 0x346   :  { %v1895_v20 = vpack.c.bf16 %v1867_v18, %v1864_v33  ;;  %3390 = vmatpush3.bf16.msra.mxu1 %v3674_v61 }
 0x347   :  { %3391 = vmatprep.subr.bf16.mxu1 %v3676_v49 }
 0x348   :  { %3371 = vmatprep.subr.bf16.mxu0 %v1895_v20 }
 0x349   :  { %3372 = vmatpush3.bf16.msra.mxu0 %v1895_v20  ;;  %2954 = vmatmul.mubr.msk.bf16.gmra.mrb[68].mxu1 %vm1270_vm0, %v4184_v19 }
 0x34a   :  { %v3369_v29 = vpop.f32.mrb[60].mxu0  ;;  %3373 = vmatprep.subr.bf16.mxu0 %v1896_v35  ;;  %1951 = vmatprep.mubr.bf16.mxu1 %v4556_v57 }
 0x34b   :  { %v1880_v39 = vpop.f32.mrb[61].mxu0  ;;  %3392 = vmatpush3.bf16.msra.mxu1 %v3676_v49 }
 0x34c   :  { %v3370_v22 = vpop.f32.mrb[62].mxu0  ;;  %3393 = vmatprep.subr.bf16.mxu1 %v3678_v46 }
 0x34d   :  { %v1898_v36 = vpack.c.bf16 %v3370_v22, %v3369_v29  ;;  %v1883_v38 = vpop.f32.mrb[63].mxu0  ;;  %3374 = vmatpush3.bf16.msra.mxu0 %v1896_v35 }
 0x34e   :  { %v1897_v40 = vpack.c.bf16 %v1883_v38, %v1880_v39 }
 0x34f   :  { %3394 = vmatpush3.bf16.msra.mxu1 %v3678_v46 }
 0x350   :  { %3375 = vmatprep.subr.bf16.mxu0 %v1897_v40 }
 0x351   :  { %3376 = vmatpush3.bf16.msra.mxu0 %v1897_v40  ;;  %2955 = vmatmul.mubr.msk.bf16.gmra.mrb[72].mxu1 %vm1270_vm0, %v4189_v26 }
 0x352   :  { %3377 = vmatprep.subr.bf16.mxu0 %v1898_v36  ;;  %1961 = vmatprep.mubr.bf16.mxu1 %v4556_v57 }
 0x355   :  { %3378 = vmatpush3.bf16.msra.mxu0 %v1898_v36 }
 0x356   :  { %3411 = vmatprep.subr.bf16.mxu0 %v3673_v41 }
 0x358   :  { %3380 = vmatmul.mubr.msk.bf16.vlgmr.msra.gmra.mrb[64].mxu0 %vm1270_vm0, %v4184_v19 }
 0x359   :  { %2956 = vmatmul.mubr.msk.bf16.gmra.mrb[76].mxu1 %vm1270_vm0, %v4213_v30  ;;  %3383 = vmatprep.mubr.msk.bf16.mxu0 %vm1270_vm0, %v4189_v26  ;;  %v3680_v26 = vld [vmem:[%s4549_s3 + $0xe0] sm:$0xff]  }
 0x35a   :  { %3412 = vmatpush3.bf16.msra.mxu0 %v3673_v41  ;;  %3395 = vmatprep.subr.bf16.mxu1 %v3680_v26 }
 0x35b   :  { %3413 = vmatprep.subr.bf16.mxu0 %v3675_v51  ;;  %3396 = vmatpush3.bf16.msra.mxu1 %v3680_v26 }
 0x35c   :  { %3397 = vmatprep.subr.bf16.mxu1 %v3682_v45 }
 0x35e   :  { %3414 = vmatpush3.bf16.msra.mxu0 %v3675_v51 }
 0x35f   :  { %3415 = vmatprep.subr.bf16.mxu0 %v3677_v37  ;;  %3398 = vmatpush3.bf16.msra.mxu1 %v3682_v45 }
 0x360   :  { %3384 = vmatmul.mubr.msk.bf16.gmra.mrb[68].mxu0 %vm1270_vm0, %v4213_v30  ;;  %3399 = vmatprep.subr.bf16.mxu1 %v3684_v15 }
 0x362   :  { %3416 = vmatpush3.bf16.msra.mxu0 %v3677_v37 }
 0x363   :  { %3417 = vmatprep.subr.bf16.mxu0 %v3679_v43  ;;  %3400 = vmatpush3.bf16.msra.mxu1 %v3684_v15 }
 0x364   :  { %3401 = vmatprep.subr.bf16.mxu1 %v3686_v34 }
 0x366   :  { %3418 = vmatpush3.bf16.msra.mxu0 %v3679_v43 }
 0x367   :  { %3419 = vmatprep.subr.bf16.mxu0 %v3681_v59  ;;  %3402 = vmatpush3.bf16.msra.mxu1 %v3686_v34 }
 0x368   :  { %3435 = vmatprep.subr.bf16.mxu1 %v3688_v21 }
 0x36a   :  { %3420 = vmatpush3.bf16.msra.mxu0 %v3681_v59 }
 0x36b   :  { %3421 = vmatprep.subr.bf16.mxu0 %v3683_v42 }
 0x36e   :  { %3422 = vmatpush3.bf16.msra.mxu0 %v3683_v42 }
 0x36f   :  { %3423 = vmatprep.subr.bf16.mxu0 %v3685_v31 }
 0x372   :  { %3424 = vmatpush3.bf16.msra.mxu0 %v3685_v31 }
 0x373   :  { %3425 = vmatprep.subr.bf16.mxu0 %v3687_v23 }
 0x376   :  { %3426 = vmatpush3.bf16.msra.mxu0 %v3687_v23  ;;  %v3689_v23 = vld [vmem:[%s4549_s3 + $0x148] sm:$0xff]  }
 0x414   :  { %v1933_v28 = vpop.f32.mrb[64].mxu1 }
 0x415   :  { %v1934_v27 = vadd.f32 %v1933_v28, %v4113_v48  ;;  %v1935_v1 = vpop.f32.mrb[65].mxu1 }
 0x416   :  { %v1936_v11 = vadd.f32 %v1935_v1, %v4143_v63  ;;  %v1937_v32 = vpop.f32.mrb[66].mxu1 }
 0x417   :  { %v2055_v61 = vadd.f32 %v4404_v55, %v1934_v27  ;;  %v1938_v53 = vadd.f32 %v1937_v32, %v4117_v50  ;;  %v1939_v33 = vpop.f32.mrb[67].mxu1 }
 0x418   :  { %v2056_v49 = vadd.f32 %v4407_v25, %v1936_v11  ;;  %v1940_v24 = vadd.f32 %v1939_v33, %v4147_v2 }
 0x419   :  { %v2058_v35 = vadd.f32 %v4404_v55, %v1938_v53  ;;  %v2079_v20 = vmax.f32 %v2055_v61, 0.0 }
 0x41a   :  { %v2059_v18 = vadd.f32 %v4407_v25, %v1940_v24  ;;  %v2080_v48 = vmax.f32 %v2056_v49, 0.0  ;;  %v4440_v49 = vrot.slane %v2961_v47, %v4268_v17  ;;  %v3691_v47 = vld [vmem:[%s4549_s3 + $0x158] sm:$0xff]  }
 0x41b   :  { %v2082_v46 = vmax.f32 %v2058_v35, 0.0 }
 0x41c   :  { %v2083_v29 = vmax.f32 %v2059_v18, 0.0  ;;  %v1943_v39 = vpop.f32.mrb[68].mxu1 }
 0x41d   :  { %v1944_v63 = vadd.f32 %v1943_v39, %v4121_v52  ;;  %v1945_v22 = vpop.f32.mrb[69].mxu1  ;;  %v2103_v36 = vpack.c.bf16 %v2082_v46, %v2079_v20 }
 0x41e   :  { %v1946_v50 = vadd.f32 %v1945_v22, %v4151_v4  ;;  %v1947_v38 = vpop.f32.mrb[70].mxu1  ;;  %v2107_v40 = vpack.c.bf16 %v2083_v29, %v2080_v48 }
 0x41f   :  { %v2061_v41 = vadd.f32 %v4404_v55, %v1944_v63  ;;  %v1948_v2 = vadd.f32 %v1947_v38, %v4125_v54  ;;  %v1949_v51 = vpop.f32.mrb[71].mxu1  ;;  %3403 = vmatprep.mubr.bf16.mxu1 %v2103_v36 }
 0x420   :  { %v2062_v37 = vadd.f32 %v4407_v25, %v1946_v50  ;;  %v1950_v43 = vadd.f32 %v1949_v51, %v4155_v6  ;;  %3427 = vmatprep.mubr.bf16.mxu0 %v2107_v40 }
 0x421   :  { %v2064_v26 = vadd.f32 %v4404_v55, %v1948_v2  ;;  %v2085_v59 = vmax.f32 %v2061_v41, 0.0 }
 0x422   :  { %v2065_v52 = vadd.f32 %v4407_v25, %v1950_v43  ;;  %v2086_v4 = vmax.f32 %v2062_v37, 0.0 }
 0x423   :  { %v2088_v45 = vmax.f32 %v2064_v26, 0.0 }
 0x424   :  { %v2089_v42 = vmax.f32 %v2065_v52, 0.0  ;;  %v1953_v15 = vpop.f32.mrb[72].mxu1 }
 0x425   :  { %v2104_v31 = vpack.c.bf16 %v2088_v45, %v2085_v59  ;;  %v1954_v34 = vadd.f32 %v1953_v15, %v4129_v56  ;;  %v1955_v54 = vpop.f32.mrb[73].mxu1 }
 0x426   :  { %v2108_v28 = vpack.c.bf16 %v2089_v42, %v2086_v4  ;;  %v1956_v6 = vadd.f32 %v1955_v54, %v4159_v8  ;;  %v1957_v27 = vpop.f32.mrb[74].mxu1  ;;  %v3690_v8 = vld [vmem:[%s4549_s3 + $0x150] sm:$0xff]  }
 0x427   :  { %v2067_v1 = vadd.f32 %v4404_v55, %v1954_v34  ;;  %v1958_v11 = vadd.f32 %v1957_v27, %v4133_v58  ;;  %v1959_v32 = vpop.f32.mrb[75].mxu1  ;;  %3404 = vmatmul.mubr.bf16.vlgmr.msra.gmra.mrb[80].mxu1 %v2104_v31 }
 0x428   :  { %v2068_v61 = vadd.f32 %v4407_v25, %v1956_v6  ;;  %v1960_v53 = vadd.f32 %v1959_v32, %v4163_v10  ;;  %3436 = vmatpush3.bf16.msra.mxu1 %v3688_v21  ;;  %3428 = vmatmul.mubr.bf16.vlgmr.msra.gmra.mrb[72].mxu0 %v2108_v28 }
 0x429   :  { %v2070_v56 = vadd.f32 %v4404_v55, %v1958_v11  ;;  %3437 = vmatprep.subr.bf16.mxu1 %v3689_v23  ;;  %v2091_v58 = vmax.f32 %v2067_v1, 0.0 }
 0x42a   :  { %v2071_v33 = vadd.f32 %v4407_v25, %v1960_v53  ;;  %v2092_v18 = vmax.f32 %v2068_v61, 0.0  ;;  %v4557_v61 = vld [vmem:[#allocation3_spill] sm:$0xff] }
 0x42b   :  { %v2094_v24 = vmax.f32 %v2070_v56, 0.0  ;;  %v3381_v35 = vpop.f32.mrb[64].mxu0 }
 0x42c   :  { %v2095_v20 = vmax.f32 %v2071_v33, 0.0  ;;  %v2015_v10 = vadd.f32 %v3381_v35, %v4153_v5  ;;  %v2006_v21 = vpop.f32.mrb[65].mxu0  ;;  %3438 = vmatpush3.bf16.msra.mxu1 %v3689_v23  ;;  %v1963_v46 = vpop.f32.mrb[76].mxu1  ;;  %v4558_v33 = vld [vmem:[#allocation2_spill] sm:$0xff]  ;;  %v3694_v35 = vld [vmem:[%s4549_s3 + $0x170] sm:$0xff]  }
 0x42d   :  { %v2007_v48 = vadd.f32 %v2006_v21, %v4145_v0  ;;  %v1964_v29 = vadd.f32 %v1963_v46, %v4137_v60  ;;  %v3382_v39 = vpop.f32.mrb[66].mxu0  ;;  %v1965_v63 = vpop.f32.mrb[77].mxu1  ;;  %3439 = vmatprep.subr.bf16.mxu1 %v3690_v8  ;;  %v2105_v22 = vpack.c.bf16 %v2094_v24, %v2091_v58 }
 0x42e   :  { %v2063_v36 = vadd.f32 %v4440_v49, %v2015_v10  ;;  %v2018_v50 = vadd.f32 %v3382_v39, %v4157_v7  ;;  %v1966_v5 = vadd.f32 %v1965_v63, %v4167_v12  ;;  %v2009_v38 = vpop.f32.mrb[67].mxu0  ;;  %v1967_v40 = vpop.f32.mrb[78].mxu1  ;;  %v2109_v41 = vpack.c.bf16 %v2095_v20, %v2092_v18  ;;  %v3696_v10 = vld [vmem:[%s4548_s0] sm:$0xff]  }
 0x42f   :  { %v2057_v0 = vadd.f32 %v4440_v49, %v2007_v48  ;;  %v2073_v60 = vadd.f32 %v4404_v55, %v1964_v29  ;;  %v2010_v2 = vadd.f32 %v2009_v38, %v4149_v3  ;;  %v1968_v51 = vadd.f32 %v1967_v40, %v4141_v62  ;;  %v1969_v37 = vpop.f32.mrb[79].mxu1  ;;  %3407 = vmatprep.mubr.bf16.mxu1 %v2105_v22  ;;  %v3692_v3 = vld [vmem:[%s4549_s3 + $0x160] sm:$0xff]  }
 0x430   :  { %v2066_v43 = vadd.f32 %v4440_v49, %v2018_v50  ;;  %v2074_v26 = vadd.f32 %v4407_v25, %v1966_v5  ;;  %v1970_v7 = vadd.f32 %v1969_v37, %v4171_v14  ;;  %3440 = vmatpush3.bf16.msra.mxu1 %v3690_v8  ;;  %3431 = vmatprep.mubr.bf16.mxu0 %v2109_v41  ;;  %v2087_v62 = vmax.f32 %v2063_v36, 0.0 }
 0x431   :  { %v2060_v12 = vadd.f32 %v4440_v49, %v2010_v2  ;;  %v2076_v52 = vadd.f32 %v4404_v55, %v1968_v51  ;;  %3441 = vmatprep.subr.bf16.mxu1 %v3691_v47  ;;  %v2081_v4 = vmax.f32 %v2057_v0, 0.0  ;;  %v2097_v42 = vmax.f32 %v2073_v60, 0.0 }
 0x432   :  { %v2090_v59 = vmax.f32 %v2066_v43, 0.0  ;;  %v2077_v45 = vadd.f32 %v4407_v25, %v1970_v7  ;;  %v2098_v54 = vmax.f32 %v2074_v26, 0.0  ;;  %v3693_v25 = vld [vmem:[%s4549_s3 + $0x168] sm:$0xff]  }
 0x433   :  { %v2084_v15 = vmax.f32 %v2060_v12, 0.0  ;;  %v2100_v31 = vmax.f32 %v2076_v52, 0.0  ;;  %v3385_v14 = vpop.f32.mrb[68].mxu0 }
 0x434   :  { %v2112_v34 = vpack.c.bf16 %v2090_v59, %v2087_v62  ;;  %v2101_v23 = vmax.f32 %v2077_v45, 0.0  ;;  %v2031_v28 = vadd.f32 %v3385_v14, %v4169_v13  ;;  %v2022_v55 = vpop.f32.mrb[69].mxu0  ;;  %3442 = vmatpush3.bf16.msra.mxu1 %v3691_v47 }
 0x435   :  { %v2023_v6 = vadd.f32 %v2022_v55, %v4161_v9  ;;  %v3386_v27 = vpop.f32.mrb[70].mxu0  ;;  %3443 = vmatprep.subr.bf16.mxu1 %v3692_v3  ;;  %v2106_v1 = vpack.c.bf16 %v2100_v31, %v2097_v42  ;;  %v2111_v11 = vpack.c.bf16 %v2084_v15, %v2081_v4 }
 0x436   :  { %v2075_v32 = vadd.f32 %v4440_v49, %v2031_v28  ;;  %v2034_v53 = vadd.f32 %v3386_v27, %v4557_v61  ;;  %v2025_v56 = vpop.f32.mrb[71].mxu0  ;;  %v2110_v8 = vpack.c.bf16 %v2101_v23, %v2098_v54 }
 0x437   :  { %v2069_v13 = vadd.f32 %v4440_v49, %v2023_v6  ;;  %v2026_v58 = vadd.f32 %v2025_v56, %v4558_v33  ;;  %3408 = vmatmul.mubr.bf16.gmra.mrb[84].mxu1 %v2106_v1  ;;  %v3697_v1 = vld [vmem:[%s4548_s0 + $0x10] sm:$0xff]  }
 0x438   :  { %v2078_v9 = vadd.f32 %v4440_v49, %v2034_v53  ;;  %3444 = vmatpush3.bf16.msra.mxu1 %v3692_v3  ;;  %3432 = vmatmul.mubr.bf16.gmra.mrb[76].mxu0 %v2110_v8  ;;  %v2099_v18 = vmax.f32 %v2075_v32, 0.0 }
 0x439   :  { %v2072_v24 = vadd.f32 %v4440_v49, %v2026_v58  ;;  %3451 = vmatprep.mubr.bf16.mxu1 %v2111_v11  ;;  %3445 = vmatprep.subr.bf16.mxu1 %v3693_v25  ;;  %v2093_v21 = vmax.f32 %v2069_v13, 0.0  ;;  %v3695_v49 = vld [vmem:[%s4549_s3 + $0x178] sm:$0xff]   ;;  %v3042_v11 = vld [vmem:[%s4550_s5 + $0x6] sm:$0x7] }
 0x43a   :  { %v2102_v20 = vmax.f32 %v2078_v9, 0.0  ;;  %3467 = vmatprep.mubr.msk.bf16.mxu0 %vm1270_vm0, %v3696_v10 }
 0x43b   :  { %v2096_v46 = vmax.f32 %v2072_v24, 0.0 }
 0x43c   :  { %3446 = vmatpush3.bf16.msra.mxu1 %v3693_v25  ;;  %v2114_v48 = vpack.c.bf16 %v2102_v20, %v2099_v18  ;;  %v4510_v25 = vrot.slane %v3042_v11, %v4266_v16 }
 0x43d   :  { %3447 = vmatprep.subr.bf16.mxu1 %v3694_v35  ;;  %v2113_v29 = vpack.c.bf16 %v2096_v46, %v2093_v21 }
 0x440   :  { %3448 = vmatpush3.bf16.msra.mxu1 %v3694_v35 }
 0x441   :  { %3449 = vmatprep.subr.bf16.mxu1 %v3695_v49 }
 0x444   :  { %3450 = vmatpush3.bf16.msra.mxu1 %v3695_v49 }
 0x447   :  { %3452 = vmatmul.mubr.bf16.vlgmr.msra.gmra.mrb[88].mxu1 %v2112_v34 }
 0x448   :  { %3455 = vmatprep.mubr.bf16.mxu1 %v2113_v29 }
 0x44f   :  { %3456 = vmatmul.mubr.bf16.gmra.mrb[92].mxu1 %v2114_v48 }
 0x450   :  { %2549 = vmatprep.mubr.bf16.mxu1 %v4556_v57 }
 0x4fa   :  { %v3405_v39 = vpop.f32.mrb[80].mxu1 }
 0x4fb   :  { %v2214_v63 = vpop.f32.mrb[81].mxu1  ;;  %v3429_v22 = vpop.f32.mrb[72].mxu0 }
 0x4fc   :  { %v3406_v47 = vpop.f32.mrb[82].mxu1  ;;  %v2348_v36 = vpop.f32.mrb[73].mxu0 }
 0x4fd   :  { %v2246_v50 = vpack.c.bf16 %v3406_v47, %v3405_v39  ;;  %v2217_v5 = vpop.f32.mrb[83].mxu1  ;;  %v3430_v38 = vpop.f32.mrb[74].mxu0 }
 0x4fe   :  { %v2245_v40 = vpack.c.bf16 %v2217_v5, %v2214_v63  ;;  %v2380_v41 = vpack.c.bf16 %v3430_v38, %v3429_v22  ;;  %v2351_v0 = vpop.f32.mrb[75].mxu0 }
 0x4ff   :  { %v2379_v60 = vpack.c.bf16 %v2351_v0, %v2348_v36 }
 0x501   :  { %2517 = vmatprep.subr.bf16.mxu1 %v2379_v60 }
 0x502   :  { %2518 = vmatpush1.bf16.msra.mxu1 %v2245_v40 }
 0x503   :  { %2519 = vmatprep.subr.bf16.mxu1 %v2380_v41 }
 0x506   :  { %2520 = vmatpush1.bf16.msra.mxu1 %v2246_v50 }
 0x50a   :  { %v3409_v2 = vpop.f32.mrb[84].mxu1 }
 0x50b   :  { %v2230_v51 = vpop.f32.mrb[85].mxu1  ;;  %v3433_v37 = vpop.f32.mrb[76].mxu0 }
 0x50c   :  { %v3410_v43 = vpop.f32.mrb[86].mxu1  ;;  %v2364_v26 = vpop.f32.mrb[77].mxu0 }
 0x50d   :  { %v2248_v7 = vpack.c.bf16 %v3410_v43, %v3409_v2  ;;  %v2233_v12 = vpop.f32.mrb[87].mxu1  ;;  %v3434_v52 = vpop.f32.mrb[78].mxu0 }
 0x50e   :  { %v2247_v3 = vpack.c.bf16 %v2233_v12, %v2230_v51  ;;  %v2382_v62 = vpack.c.bf16 %v3434_v52, %v3433_v37  ;;  %v2367_v59 = vpop.f32.mrb[79].mxu0 }
 0x50f   :  { %v2381_v45 = vpack.c.bf16 %v2367_v59, %v2364_v26  ;;  %v2669_v26 = vrot.slane %v3042_v11, %v4268_v17 }
 0x511   :  { %2521 = vmatprep.subr.bf16.mxu1 %v2381_v45 }
 0x512   :  { %2522 = vmatpush1.bf16.msra.mxu1 %v2247_v3 }
 0x513   :  { %2523 = vmatprep.subr.bf16.mxu1 %v2382_v62 }
 0x516   :  { %2524 = vmatpush1.bf16.msra.mxu1 %v2248_v7 }
 0x519   :  { %3034 = vmatmul.mubr.msk.bf16.vlgmr.msra.gmra.mrb[16].mxu1 %vm1270_vm0, %v3696_v10 }
 0x51a   :  { %v3453_v4 = vpop.f32.mrb[88].mxu1  ;;  %2559 = vmatprep.mubr.bf16.mxu1 %v4556_v57 }
 0x51b   :  { %v2482_v42 = vpop.f32.mrb[89].mxu1 }
 0x51c   :  { %v3454_v15 = vpop.f32.mrb[90].mxu1 }
 0x51d   :  { %v2514_v31 = vpack.c.bf16 %v3454_v15, %v3453_v4  ;;  %v2485_v14 = vpop.f32.mrb[91].mxu1 }
 0x51e   :  { %v2513_v34 = vpack.c.bf16 %v2485_v14, %v2482_v42 }
 0x520   :  { %3459 = vmatprep.subr.bf16.mxu0 %v2513_v34 }
 0x521   :  { %3460 = vmatpush3.bf16.msra.mxu0 %v2513_v34  ;;  %3035 = vmatmul.mubr.msk.bf16.gmra.mrb[20].mxu1 %vm1270_vm0, %v4184_v19  ;;  %v3698_v19 = vld [vmem:[%s4548_s0 + $0x8] sm:$0xff]  }
 0x522   :  { %v3457_v54 = vpop.f32.mrb[92].mxu1  ;;  %3461 = vmatprep.subr.bf16.mxu0 %v2514_v31  ;;  %2569 = vmatprep.mubr.bf16.mxu1 %v4556_v57 }
 0x523   :  { %v2498_v23 = vpop.f32.mrb[93].mxu1 }
 0x524   :  { %v3458_v28 = vpop.f32.mrb[94].mxu1 }
 0x525   :  { %v2516_v55 = vpack.c.bf16 %v3458_v28, %v3457_v54  ;;  %v2501_v6 = vpop.f32.mrb[95].mxu1  ;;  %3462 = vmatpush3.bf16.msra.mxu0 %v2514_v31 }
 0x526   :  { %v2515_v27 = vpack.c.bf16 %v2501_v6, %v2498_v23 }
 0x528   :  { %3463 = vmatprep.subr.bf16.mxu0 %v2515_v27 }
 0x529   :  { %3464 = vmatpush3.bf16.msra.mxu0 %v2515_v27  ;;  %3036 = vmatmul.mubr.msk.bf16.gmra.mrb[24].mxu1 %vm1270_vm0, %v3697_v1 }
 0x52a   :  { %3465 = vmatprep.subr.bf16.mxu0 %v2516_v55  ;;  %2579 = vmatprep.mubr.bf16.mxu1 %v4556_v57  ;;  %v2661_v57 = vrot.slane %v3042_v11, %v4261_v44 }
 0x52d   :  { %3466 = vmatpush3.bf16.msra.mxu0 %v2516_v55 }
 0x530   :  { %3468 = vmatmul.mubr.msk.bf16.vlgmr.msra.gmra.mrb[32].mxu0 %vm1270_vm0, %v3698_v19 }
 0x531   :  { %3037 = vmatmul.mubr.msk.bf16.gmra.mrb[28].mxu1 %vm1270_vm0, %v4213_v30  ;;  %3471 = vmatprep.mubr.msk.bf16.mxu0 %vm1270_vm0, %v3697_v1 }
 0x538   :  { %3472 = vmatmul.mubr.msk.bf16.gmra.mrb[36].mxu0 %vm1270_vm0, %v4213_v30 }
 0x5ec   :  { %v2551_v32 = vpop.f32.mrb[16].mxu1 }
 0x5ed   :  { %v2673_v61 = vadd.f32 %v2661_v57, %v2551_v32  ;;  %v2553_v53 = vpop.f32.mrb[17].mxu1 }
 0x5ee   :  { %v2674_v56 = vadd.f32 %v4510_v25, %v2553_v53  ;;  %v2555_v8 = vpop.f32.mrb[18].mxu1 }
 0x5ef   :  { %v2697_v13 = vmax.f32 %v2673_v61, 0.0  ;;  %v2676_v33 = vadd.f32 %v2661_v57, %v2555_v8  ;;  %v2557_v58 = vpop.f32.mrb[19].mxu1 }
 0x5f0   :  { %v2698_v9 = vmax.f32 %v2674_v56, 0.0  ;;  %v2677_v30 = vadd.f32 %v4510_v25, %v2557_v58 }
 0x5f1   :  { %v2700_v24 = vmax.f32 %v2676_v33, 0.0 }
 0x5f2   :  { %v2721_v35 = vadd.f32 %v2698_v9, %v2697_v13  ;;  %v2701_v18 = vmax.f32 %v2677_v30, 0.0 }
 0x5f4   :  { %v2722_v20 = vadd.f32 %v2701_v18, %v2700_v24  ;;  %v2561_v44 = vpop.f32.mrb[20].mxu1 }
 0x5f5   :  { %v2679_v10 = vadd.f32 %v2661_v57, %v2561_v44  ;;  %v2563_v16 = vpop.f32.mrb[21].mxu1 }
 0x5f6   :  { %v2680_v21 = vadd.f32 %v4510_v25, %v2563_v16  ;;  %v2565_v46 = vpop.f32.mrb[22].mxu1 }
 0x5f7   :  { %v2703_v48 = vmax.f32 %v2679_v10, 0.0  ;;  %v2682_v49 = vadd.f32 %v2661_v57, %v2565_v46  ;;  %v2567_v29 = vpop.f32.mrb[23].mxu1 }
 0x5f8   :  { %v2704_v39 = vmax.f32 %v2680_v21, 0.0  ;;  %v2683_v63 = vadd.f32 %v4510_v25, %v2567_v29 }
 0x5f9   :  { %v2706_v22 = vmax.f32 %v2682_v49, 0.0 }
 0x5fa   :  { %v2723_v47 = vadd.f32 %v2704_v39, %v2703_v48  ;;  %v2707_v36 = vmax.f32 %v2683_v63, 0.0 }
 0x5fc   :  { %v2724_v50 = vadd.f32 %v2707_v36, %v2706_v22  ;;  %v2571_v5 = vpop.f32.mrb[24].mxu1 }
 0x5fd   :  { %v2685_v38 = vadd.f32 %v2661_v57, %v2571_v5  ;;  %v2573_v40 = vpop.f32.mrb[25].mxu1 }
 0x5fe   :  { %v2686_v41 = vadd.f32 %v4510_v25, %v2573_v40  ;;  %v2575_v0 = vpop.f32.mrb[26].mxu1 }
 0x5ff   :  { %v2709_v60 = vmax.f32 %v2685_v38, 0.0  ;;  %v2688_v2 = vadd.f32 %v2661_v57, %v2575_v0  ;;  %v2577_v51 = vpop.f32.mrb[27].mxu1 }
 0x600   :  { %v2710_v37 = vmax.f32 %v2686_v41, 0.0  ;;  %v2689_v43 = vadd.f32 %v4510_v25, %v2577_v51 }
 0x601   :  { %v2712_v7 = vmax.f32 %v2688_v2, 0.0 }
 0x602   :  { %v2725_v12 = vadd.f32 %v2710_v37, %v2709_v60  ;;  %v2713_v52 = vmax.f32 %v2689_v43, 0.0 }
 0x603   :  { %v3469_v3 = vpop.f32.mrb[32].mxu0 }
 0x604   :  { %v2726_v62 = vadd.f32 %v2713_v52, %v2712_v7  ;;  %v2681_v59 = vadd.f32 %v3469_v3, %v2669_v26  ;;  %v2624_v45 = vpop.f32.mrb[33].mxu0  ;;  %v2581_v4 = vpop.f32.mrb[28].mxu1 }
 0x605   :  { %v2675_v42 = vadd.f32 %v2669_v26, %v2624_v45  ;;  %v2691_v15 = vadd.f32 %v2661_v57, %v2581_v4  ;;  %v3470_v31 = vpop.f32.mrb[34].mxu0  ;;  %v2583_v14 = vpop.f32.mrb[29].mxu1 }
 0x606   :  { %v2705_v34 = vmax.f32 %v2681_v59, 0.0  ;;  %v2684_v54 = vadd.f32 %v3470_v31, %v2669_v26  ;;  %v2692_v23 = vadd.f32 %v4510_v25, %v2583_v14  ;;  %v2627_v28 = vpop.f32.mrb[35].mxu0  ;;  %v2585_v55 = vpop.f32.mrb[30].mxu1 }
 0x607   :  { %v2699_v6 = vmax.f32 %v2675_v42, 0.0  ;;  %v2715_v17 = vmax.f32 %v2691_v15, 0.0  ;;  %v2678_v27 = vadd.f32 %v2669_v26, %v2627_v28  ;;  %v2694_v1 = vadd.f32 %v2661_v57, %v2585_v55  ;;  %v2587_v19 = vpop.f32.mrb[31].mxu1 }
 0x608   :  { %v2731_v11 = vadd.f32 %v2723_v47, %v2705_v34  ;;  %v2708_v32 = vmax.f32 %v2684_v54, 0.0  ;;  %v2716_v61 = vmax.f32 %v2692_v23, 0.0  ;;  %v2695_v53 = vadd.f32 %v4510_v25, %v2587_v19 }
 0x609   :  { %v2729_v56 = vadd.f32 %v2721_v35, %v2699_v6  ;;  %v2702_v8 = vmax.f32 %v2678_v27, 0.0  ;;  %v2718_v13 = vmax.f32 %v2694_v1, 0.0 }
 0x60a   :  { %v2739_v33 = vmul.f32 0.33333334, %v2731_v11  ;;  %v2732_v58 = vadd.f32 %v2724_v50, %v2708_v32  ;;  %v2727_v9 = vadd.f32 %v2716_v61, %v2715_v17  ;;  %v2719_v30 = vmax.f32 %v2695_v53, 0.0 }
 0x60b   :  { %v2737_v24 = vmul.f32 0.33333334, %v2729_v56  ;;  %v2730_v18 = vadd.f32 %v2722_v20, %v2702_v8  ;;  %v3473_v44 = vpop.f32.mrb[36].mxu0 }
 0x60c   :  { %2747 = vst [vmem:[%s4551_s6 + $0x10] sm:$0xff] %v2739_v33  ;;  %v2740_v57 = vmul.f32 0.33333334, %v2732_v58  ;;  %v2728_v10 = vadd.f32 %v2719_v30, %v2718_v13  ;;  %v2693_v16 = vadd.f32 %v3473_v44, %v2669_v26  ;;  %v2640_v21 = vpop.f32.mrb[37].mxu0 }
 0x60d   :  { %2745 = vst [vmem:[%s4551_s6] sm:$0xff] %v2737_v24  ;;  %v2738_v25 = vmul.f32 0.33333334, %v2730_v18  ;;  %v2687_v35 = vadd.f32 %v2669_v26, %v2640_v21  ;;  %v3474_v46 = vpop.f32.mrb[38].mxu0 }
 0x60e   :  { %2748 = vst [vmem:[%s4551_s6 + $0x18] sm:$0xff] %v2740_v57  ;;  %v2717_v20 = vmax.f32 %v2693_v16, 0.0  ;;  %v2696_v48 = vadd.f32 %v3474_v46, %v2669_v26  ;;  %v2643_v49 = vpop.f32.mrb[39].mxu0 }
 0x60f   :  { %2746 = vst [vmem:[%s4551_s6 + $0x8] sm:$0xff] %v2738_v25  ;;  %v2711_v29 = vmax.f32 %v2687_v35, 0.0  ;;  %v2690_v39 = vadd.f32 %v2669_v26, %v2643_v49 }
 0x610   :  { %v2735_v63 = vadd.f32 %v2727_v9, %v2717_v20  ;;  %v2720_v22 = vmax.f32 %v2696_v48, 0.0 }
 0x611   :  { %v2733_v47 = vadd.f32 %v2725_v12, %v2711_v29  ;;  %v2714_v36 = vmax.f32 %v2690_v39, 0.0 }
 0x612   :  { %v2743_v50 = vmul.f32 0.33333334, %v2735_v63  ;;  %v2736_v5 = vadd.f32 %v2728_v10, %v2720_v22 }
 0x613   :  { %v2741_v38 = vmul.f32 0.33333334, %v2733_v47  ;;  %v2734_v40 = vadd.f32 %v2726_v62, %v2714_v36 }
 0x614   :  { %2751 = vst [vmem:[%s4551_s6 + $0x30] sm:$0xff] %v2743_v50  ;;  %v2744_v41 = vmul.f32 0.33333334, %v2736_v5 }
 0x615   :  { %2749 = vst [vmem:[%s4551_s6 + $0x20] sm:$0xff] %v2741_v38  ;;  %v2742_v0 = vmul.f32 0.33333334, %v2734_v40 }
 0x616   :  { %2752 = vst [vmem:[%s4551_s6 + $0x38] sm:$0xff] %v2744_v41 }
 0x617   :  { %2750 = vst [vmem:[%s4551_s6 + $0x28] sm:$0xff] %v2742_v0 }

</bundles_post_ra>
